<compile_context>
chip_gen: v5e
topology: v5e:2x2
jax: 0.10.0
libtpu: 0.0.40
codegen_flags: <defaults>
</compile_context>

<pallas_src>
import math

import jax
import jax.numpy as jnp
from jax import lax
from jax.experimental import pallas as pl
from jax.experimental.pallas import tpu as pltpu

EPS = 1e-5


def fusion_kernel(x_ref, y_ref, wdwx_ref, wdwy_ref, wpwx_ref, wpwy_ref,
                  g1x_ref, b1x_ref, g1y_ref, b1y_ref, g2_ref, b2_ref,
                  wfc_ref, bfc_ref, out_ref, pad_ref, acc_ref):
    i = pl.program_id(0)
    B, H, W, TC = x_ref.shape          # TC = channel tile of the x/y halves
    M = B * H * W
    C = acc_ref.shape[1]               # output channels of the 1x1 conv

    @pl.when(i == 0)
    def _init():
        acc_ref[...] = jnp.zeros_like(acc_ref)
        # Zero only the 1-pixel border of the padded scratch (not the whole
        # buffer): the interior is fully overwritten every step, and the
        # border stays zero because scratch persists across grid steps.
        zrow = jnp.zeros((B, 1, W + 2, TC), jnp.float32)
        zcol = jnp.zeros((B, H, 1, TC), jnp.float32)
        pad_ref[:, 0:1, :, :] = zrow
        pad_ref[:, H + 1:H + 2, :, :] = zrow
        pad_ref[:, 1:H + 1, 0:1, :] = zcol
        pad_ref[:, 1:H + 1, W + 1:W + 2, :] = zcol

    def dw_bn_relu(src_ref, wdw_ref, g_ref, b_ref):
        """Depthwise 3x3 (pad=1, no bias) -> BN (batch stats) -> ReLU."""
        pad_ref[:, 1:H + 1, 1:W + 1, :] = src_ref[...]
        w = wdw_ref[...]                                   # (3, 3, TC)
        conv = jnp.zeros((B, H, W, TC), jnp.float32)
        # 9 unrolled taps; a further improvement would be aligned row slices
        # over dh plus pltpu.roll for the dw shifts (XLU), kept simple here.
        for dh in range(3):
            for dw in range(3):
                tap = w[dh, dw].reshape(1, 1, 1, TC)
                conv = conv + pad_ref[:, dh:dh + H, dw:dw + W, :] * tap
        a = conv.reshape(M, TC)
        # one-pass batch statistics (biased variance), exact per channel
        s1 = jnp.sum(a, axis=0, keepdims=True)
        s2 = jnp.sum(a * a, axis=0, keepdims=True)
        mu = s1 * (1.0 / M)
        var = jnp.maximum(s2 * (1.0 / M) - mu * mu, 0.0)
        h = (a - mu) * lax.rsqrt(var + EPS) * g_ref[...] + b_ref[...]
        return jnp.maximum(h, 0.0)

    # x-half and y-half of the (virtual) concat are channel-separable through
    # the depthwise conv + per-channel BN; their 1x1 contributions add up.
    h1x = dw_bn_relu(x_ref, wdwx_ref, g1x_ref, b1x_ref)
    part = jnp.dot(h1x.astype(jnp.bfloat16), wpwx_ref[...],
                   preferred_element_type=jnp.float32)
    h1y = dw_bn_relu(y_ref, wdwy_ref, g1y_ref, b1y_ref)
    part = part + jnp.dot(h1y.astype(jnp.bfloat16), wpwy_ref[...],
                          preferred_element_type=jnp.float32)
    acc_ref[...] += part      # 1x1 conv, accumulated over input-channel tiles

    @pl.when(i == pl.num_programs(0) - 1)
    def _finalize():
        h2 = acc_ref[...]
        s1 = jnp.sum(h2, axis=0, keepdims=True)
        s2 = jnp.sum(h2 * h2, axis=0, keepdims=True)
        mu = s1 * (1.0 / M)
        var = jnp.maximum(s2 * (1.0 / M) - mu * mu, 0.0)
        h2n = (h2 - mu) * lax.rsqrt(var + EPS) * g2_ref[...] + b2_ref[...]
        h2n = jnp.maximum(h2n, 0.0)
        # global average pool (kernel = sptial = H = W) then fc2
        pooled = jnp.mean(h2n.reshape(B, H * W, C), axis=1)        # (B, C)
        out_ref[...] = (jnp.dot(pooled.astype(jnp.bfloat16), wfc_ref[...],
                                preferred_element_type=jnp.float32)
                        + bfc_ref[...])


def _pick_channel_tile(C):
    # BlockSpec constraint: the channel tile must either equal C (full dim) or
    # be a multiple of 128 (it is the lane dim of x/y and the sublane dim of
    # the 1x1 weight tile).
    if C % 128 == 0:
        for t in (512, 256, 128):
            if C % t == 0:
                return t
    return C


def fusion_forward(x_nchw, y_nchw, params, *, channel_tile=None):
    """x_nchw, y_nchw: (B, C, H, W) float32 — PyTorch layout inputs."""
    x = jnp.transpose(x_nchw, (0, 2, 3, 1)).astype(jnp.float32)    # NHWC
    y = jnp.transpose(y_nchw, (0, 2, 3, 1)).astype(jnp.float32)
    B, H, W, C = x.shape
    numclass = params["wfc"].shape[1]

    TC = channel_tile if channel_tile is not None else _pick_channel_tile(C)
    assert C % TC == 0
    n_tiles = C // TC

    # Split the concatenated-channel parameters into x/y halves (exact).
    wdw = params["wdw"]
    wdw_x, wdw_y = wdw[:, :, :C], wdw[:, :, C:]
    wpw = params["wpw"].astype(jnp.bfloat16)       # MXU-native operand dtype
    wpw_x, wpw_y = wpw[:C, :], wpw[C:, :]
    g1x, g1y = params["g1"][:, :C], params["g1"][:, C:]
    b1x, b1y = params["b1"][:, :C], params["b1"][:, C:]
    g2, b2 = params["g2"], params["b2"]
    wfc = params["wfc"].astype(jnp.bfloat16)
    bfc = params["bfc"]

    grid_spec = pltpu.PrefetchScalarGridSpec(
        num_scalar_prefetch=0,
        grid=(n_tiles,),                # reduction over input-channel tiles
        in_specs=[
            pl.BlockSpec((B, H, W, TC), lambda i: (0, 0, 0, i)),   # x
            pl.BlockSpec((B, H, W, TC), lambda i: (0, 0, 0, i)),   # y
            pl.BlockSpec((3, 3, TC), lambda i: (0, 0, i)),         # wdw_x
            pl.BlockSpec((3, 3, TC), lambda i: (0, 0, i)),         # wdw_y
            pl.BlockSpec((TC, C), lambda i: (i, 0)),               # wpw_x
            pl.BlockSpec((TC, C), lambda i: (i, 0)),               # wpw_y
            pl.BlockSpec((1, TC), lambda i: (0, i)),               # gamma1_x
            pl.BlockSpec((1, TC), lambda i: (0, i)),               # beta1_x
            pl.BlockSpec((1, TC), lambda i: (0, i)),               # gamma1_y
            pl.BlockSpec((1, TC), lambda i: (0, i)),               # beta1_y
            pl.BlockSpec((1, C), lambda i: (0, 0)),                # gamma2
            pl.BlockSpec((1, C), lambda i: (0, 0)),                # beta2
            pl.BlockSpec((C, numclass), lambda i: (0, 0)),         # wfc
            pl.BlockSpec((1, numclass), lambda i: (0, 0)),         # bfc
        ],
        out_specs=pl.BlockSpec((B, numclass), lambda i: (0, 0)),
        scratch_shapes=[
            pltpu.VMEM((B, H + 2, W + 2, TC), jnp.float32),  # shared padded tile
            pltpu.VMEM((B * H * W, C), jnp.float32),         # h2 accumulator
        ],
    )

    # Explicit scoped-VMEM budget derived from the tiles, clamped so it also
    # fits v7x's smaller physical VMEM.
    est = 4 * (4 * B * H * W * TC                 # x/y tiles, double-buffered
               + B * (H + 2) * (W + 2) * TC       # padded scratch
               + 2 * B * H * W * C                # accumulator + live h2
               + 4 * TC * C)                      # weight tiles
    vmem_limit = int(min(max(3 * est, 16 * 1024 * 1024), 48 * 1024 * 1024))

    return pl.pallas_call(
        fusion_kernel,
        out_shape=jax.ShapeDtypeStruct((B, numclass), jnp.float32),
        grid_spec=grid_spec,
        compiler_params=pltpu.CompilerParams(
            dimension_semantics=("arbitrary",),   # channel axis is a reduction
            vmem_limit_bytes=vmem_limit,
        ),
    )(x, y, wdw_x, wdw_y, wpw_x, wpw_y,
      g1x, b1x, g1y, b1y, g2, b2, wfc, bfc)


def init_params(key, channel, numclass):
    """Deterministic init mirroring the PyTorch __init__ (synthetic weights)."""
    C, C2 = channel, 2 * channel
    k = jax.random.split(key, 4)
    # conv1: depthwise 3x3, normal(0, sqrt(2/(3*3*2C)))
    wdw = jax.random.normal(k[0], (3, 3, C2), jnp.float32) * math.sqrt(2.0 / (9 * C2))
    # conv1_1: 1x1, normal(0, sqrt(2/(1*1*C))) — stored as (2C, C)
    wpw = jax.random.normal(k[1], (C2, C), jnp.float32) * math.sqrt(2.0 / C)
    # BN: weight=1, bias=0
    g1 = jnp.ones((1, C2), jnp.float32)
    b1 = jnp.zeros((1, C2), jnp.float32)
    g2 = jnp.ones((1, C), jnp.float32)
    b2 = jnp.zeros((1, C), jnp.float32)
    # fc2: Linear(C, numclass) default uniform(-1/sqrt(C), 1/sqrt(C)); stored (C, numclass)
    bound = 1.0 / math.sqrt(C)
    wfc = jax.random.uniform(k[2], (C, numclass), jnp.float32, -bound, bound)
    bfc = jax.random.uniform(k[3], (1, numclass), jnp.float32, -bound, bound)
    return dict(wdw=wdw, wpw=wpw, g1=g1, b1=b1, g2=g2, b2=b2, wfc=wfc, bfc=bfc)


def reference(x_nchw, y_nchw, p):
    """Pure-JAX (XLA conv) reference for validation."""
    C = x_nchw.shape[1]
    C2 = 2 * C
    inp = jnp.concatenate([x_nchw, y_nchw], axis=1)
    wdw_oihw = jnp.transpose(p["wdw"], (2, 0, 1))[:, None, :, :]        # (2C,1,3,3)
    h = lax.conv_general_dilated(inp, wdw_oihw, (1, 1), "SAME",
                                 feature_group_count=C2,
                                 dimension_numbers=("NCHW", "OIHW", "NCHW"))

    def bn(z, g, b):
        mu = jnp.mean(z, axis=(0, 2, 3), keepdims=True)
        var = jnp.mean((z - mu) ** 2, axis=(0, 2, 3), keepdims=True)
        return ((z - mu) * lax.rsqrt(var + EPS) * g.reshape(1, -1, 1, 1)
                + b.reshape(1, -1, 1, 1))

    h = jax.nn.relu(bn(h, p["g1"], p["b1"]))
    wpw_oihw = jnp.transpose(p["wpw"], (1, 0))[:, :, None, None]        # (C,2C,1,1)
    h = lax.conv_general_dilated(h, wpw_oihw, (1, 1), "VALID",
                                 dimension_numbers=("NCHW", "OIHW", "NCHW"))
    h = jax.nn.relu(bn(h, p["g2"], p["b2"]))
    pooled = jnp.mean(h, axis=(2, 3))
    return pooled @ p["wfc"] + p["bfc"]


if __name__ == "__main__":
    B, C, H = 2, 4, 8          # batch, channel, spatial (= sptial)
    numclass = 10

    key = jax.random.PRNGKey(0)
    kx, ky, kp = jax.random.split(key, 3)
    x = jax.random.normal(kx, (B, C, H, H), jnp.float32)   # NCHW, like PyTorch
    y = jax.random.normal(ky, (B, C, H, H), jnp.float32)
    params = init_params(kp, C, numclass)

    out = fusion_forward(x, y, params)
    out = jax.block_until_ready(out)

    ref = reference(x, y, params)
    assert out.shape == (B, numclass)
    # bf16 MXU operands in the kernel -> small drift vs the all-f32 reference
    assert jnp.allclose(out, ref, rtol=2e-2, atol=2e-2), (out, ref)
    print("KERNEL_OK")
</pallas_src>

<mosaic_0001>
module attributes {stable_mosaic.version = 11 : i64} {
  func.func @fusion_kernel(%arg0: i32, %arg1: memref<2x8x8x4xf32, #tpu.memory_space<vmem>>, %arg2: memref<2x8x8x4xf32, #tpu.memory_space<vmem>>, %arg3: memref<3x3x4xf32, #tpu.memory_space<vmem>>, %arg4: memref<3x3x4xf32, #tpu.memory_space<vmem>>, %arg5: memref<4x4xbf16, #tpu.memory_space<vmem>>, %arg6: memref<4x4xbf16, #tpu.memory_space<vmem>>, %arg7: memref<1x4xf32, #tpu.memory_space<vmem>>, %arg8: memref<1x4xf32, #tpu.memory_space<vmem>>, %arg9: memref<1x4xf32, #tpu.memory_space<vmem>>, %arg10: memref<1x4xf32, #tpu.memory_space<vmem>>, %arg11: memref<1x4xf32, #tpu.memory_space<vmem>>, %arg12: memref<1x4xf32, #tpu.memory_space<vmem>>, %arg13: memref<4x10xbf16, #tpu.memory_space<vmem>>, %arg14: memref<1x10xf32, #tpu.memory_space<vmem>>, %arg15: memref<2x10xf32, #tpu.memory_space<vmem>>, %arg16: memref<2x10x10x4xf32, #tpu.memory_space<vmem>>, %arg17: memref<128x4xf32, #tpu.memory_space<vmem>>) attributes {dimension_semantics = [#tpu.dimension_semantics<arbitrary>], iteration_bounds = array<i64: 1>, scalar_prefetch = 0 : i64, scratch_operands = 2 : i64, tpu.core_type = #tpu.core_type<tc>, window_params = [{transform_indices = @transform_0, window_bounds = array<i64: 2, 8, 8, 4>}, {transform_indices = @transform_1, window_bounds = array<i64: 2, 8, 8, 4>}, {transform_indices = @transform_2, window_bounds = array<i64: 3, 3, 4>}, {transform_indices = @transform_3, window_bounds = array<i64: 3, 3, 4>}, {transform_indices = @transform_4, window_bounds = array<i64: 4, 4>}, {transform_indices = @transform_5, window_bounds = array<i64: 4, 4>}, {transform_indices = @transform_6, window_bounds = array<i64: 1, 4>}, {transform_indices = @transform_7, window_bounds = array<i64: 1, 4>}, {transform_indices = @transform_8, window_bounds = array<i64: 1, 4>}, {transform_indices = @transform_9, window_bounds = array<i64: 1, 4>}, {pipeline_mode = #tpu.pipeline_mode<synchronous>, transform_indices = @transform_10, window_bounds = array<i64: 1, 4>}, {pipeline_mode = #tpu.pipeline_mode<synchronous>, transform_indices = @transform_11, window_bounds = array<i64: 1, 4>}, {pipeline_mode = #tpu.pipeline_mode<synchronous>, transform_indices = @transform_12, window_bounds = array<i64: 4, 10>}, {pipeline_mode = #tpu.pipeline_mode<synchronous>, transform_indices = @transform_13, window_bounds = array<i64: 1, 10>}, {pipeline_mode = #tpu.pipeline_mode<synchronous>, transform_indices = @transform_14, window_bounds = array<i64: 2, 10>}]} {
    %c0_i32 = arith.constant 0 : i32
    %0 = arith.cmpi eq, %arg0, %c0_i32 : i32
    %1 = arith.extui %0 : i1 to i32
    %c0_i32_0 = arith.constant 0 : i32
    %2 = arith.cmpi ne, %1, %c0_i32_0 : i32
    scf.if %2 {
      %cst_127 = arith.constant 0.000000e+00 : f32
      %208 = vector.broadcast %cst_127 : f32 to vector<128x4xf32>
      %c0_128 = arith.constant 0 : index
      %c0_129 = arith.constant 0 : index
      %209 = vector.load %arg17[%c0_128, %c0_129] : memref<128x4xf32, #tpu.memory_space<vmem>>, vector<128x4xf32>
      tpu.vector_store %arg17[%c0_128, %c0_129], %208 {strides = array<i32>} : memref<128x4xf32, #tpu.memory_space<vmem>>, vector<128x4xf32>,
      %cst_130 = arith.constant 0.000000e+00 : f32
      %210 = vector.broadcast %cst_130 : f32 to vector<2x1x10x4xf32>
      %cst_131 = arith.constant 0.000000e+00 : f32
      %211 = vector.broadcast %cst_131 : f32 to vector<2x8x1x4xf32>
      %c0_132 = arith.constant 0 : index
      %c0_133 = arith.constant 0 : index
      %c0_134 = arith.constant 0 : index
      %c0_135 = arith.constant 0 : index
      %212 = vector.load %arg16[%c0_132, %c0_133, %c0_134, %c0_135] : memref<2x10x10x4xf32, #tpu.memory_space<vmem>>, vector<2x1x10x4xf32>
      tpu.vector_store %arg16[%c0_132, %c0_133, %c0_134, %c0_135], %210 {strides = array<i32>} : memref<2x10x10x4xf32, #tpu.memory_space<vmem>>, vector<2x1x10x4xf32>,
      %c0_136 = arith.constant 0 : index
      %c9 = arith.constant 9 : index
      %c0_137 = arith.constant 0 : index
      %c0_138 = arith.constant 0 : index
      %213 = vector.load %arg16[%c0_136, %c9, %c0_137, %c0_138] : memref<2x10x10x4xf32, #tpu.memory_space<vmem>>, vector<2x1x10x4xf32>
      tpu.vector_store %arg16[%c0_136, %c9, %c0_137, %c0_138], %210 {strides = array<i32>} : memref<2x10x10x4xf32, #tpu.memory_space<vmem>>, vector<2x1x10x4xf32>,
      %c0_139 = arith.constant 0 : index
      %c1_140 = arith.constant 1 : index
      %c0_141 = arith.constant 0 : index
      %c0_142 = arith.constant 0 : index
      %214 = vector.load %arg16[%c0_139, %c1_140, %c0_141, %c0_142] : memref<2x10x10x4xf32, #tpu.memory_space<vmem>>, vector<2x8x1x4xf32>
      tpu.vector_store %arg16[%c0_139, %c1_140, %c0_141, %c0_142], %211 {strides = array<i32>} : memref<2x10x10x4xf32, #tpu.memory_space<vmem>>, vector<2x8x1x4xf32>,
      %c0_143 = arith.constant 0 : index
      %c1_144 = arith.constant 1 : index
      %c9_145 = arith.constant 9 : index
      %c0_146 = arith.constant 0 : index
      %215 = vector.load %arg16[%c0_143, %c1_144, %c9_145, %c0_146] : memref<2x10x10x4xf32, #tpu.memory_space<vmem>>, vector<2x8x1x4xf32>
      tpu.vector_store %arg16[%c0_143, %c1_144, %c9_145, %c0_146], %211 {strides = array<i32>} : memref<2x10x10x4xf32, #tpu.memory_space<vmem>>, vector<2x8x1x4xf32>,
    } else {
    }
    %c0 = arith.constant 0 : index
    %c0_1 = arith.constant 0 : index
    %c0_2 = arith.constant 0 : index
    %c0_3 = arith.constant 0 : index
    %3 = vector.load %arg1[%c0, %c0_1, %c0_2, %c0_3] : memref<2x8x8x4xf32, #tpu.memory_space<vmem>>, vector<2x8x8x4xf32>
    %c0_4 = arith.constant 0 : index
    %c1 = arith.constant 1 : index
    %c1_5 = arith.constant 1 : index
    %c0_6 = arith.constant 0 : index
    %4 = vector.load %arg16[%c0_4, %c1, %c1_5, %c0_6] : memref<2x10x10x4xf32, #tpu.memory_space<vmem>>, vector<2x8x8x4xf32>
    tpu.vector_store %arg16[%c0_4, %c1, %c1_5, %c0_6], %3 {strides = array<i32>} : memref<2x10x10x4xf32, #tpu.memory_space<vmem>>, vector<2x8x8x4xf32>,
    %c0_7 = arith.constant 0 : index
    %c0_8 = arith.constant 0 : index
    %c0_9 = arith.constant 0 : index
    %5 = vector.load %arg3[%c0_7, %c0_8, %c0_9] : memref<3x3x4xf32, #tpu.memory_space<vmem>>, vector<3x3x4xf32>
    %cst = arith.constant 0.000000e+00 : f32
    %6 = vector.broadcast %cst : f32 to vector<2x8x8x4xf32>
    %7 = vector.extract_strided_slice %5 {offsets = [0, 0, 0], sizes = [1, 1, 4], strides = [1, 1, 1]} : vector<3x3x4xf32> to vector<1x1x4xf32>
    %8 = vector.shape_cast %7 : vector<1x1x4xf32> to vector<4xf32>
    %9 = vector.shape_cast %8 : vector<4xf32> to vector<1x1x1x4xf32>
    %c0_10 = arith.constant 0 : index
    %c0_11 = arith.constant 0 : index
    %c0_12 = arith.constant 0 : index
    %c0_13 = arith.constant 0 : index
    %10 = vector.load %arg16[%c0_10, %c0_11, %c0_12, %c0_13] : memref<2x10x10x4xf32, #tpu.memory_space<vmem>>, vector<2x8x8x4xf32>
    %11 = vector.broadcast %9 : vector<1x1x1x4xf32> to vector<2x8x8x4xf32>
    %12 = arith.mulf %10, %11 : vector<2x8x8x4xf32>
    %13 = arith.addf %6, %12 : vector<2x8x8x4xf32>
    %14 = vector.extract_strided_slice %5 {offsets = [0, 1, 0], sizes = [1, 1, 4], strides = [1, 1, 1]} : vector<3x3x4xf32> to vector<1x1x4xf32>
    %15 = vector.shape_cast %14 : vector<1x1x4xf32> to vector<4xf32>
    %16 = vector.shape_cast %15 : vector<4xf32> to vector<1x1x1x4xf32>
    %c0_14 = arith.constant 0 : index
    %c0_15 = arith.constant 0 : index
    %c1_16 = arith.constant 1 : index
    %c0_17 = arith.constant 0 : index
    %17 = vector.load %arg16[%c0_14, %c0_15, %c1_16, %c0_17] : memref<2x10x10x4xf32, #tpu.memory_space<vmem>>, vector<2x8x8x4xf32>
    %18 = vector.broadcast %16 : vector<1x1x1x4xf32> to vector<2x8x8x4xf32>
    %19 = arith.mulf %17, %18 : vector<2x8x8x4xf32>
    %20 = arith.addf %13, %19 : vector<2x8x8x4xf32>
    %21 = vector.extract_strided_slice %5 {offsets = [0, 2, 0], sizes = [1, 1, 4], strides = [1, 1, 1]} : vector<3x3x4xf32> to vector<1x1x4xf32>
    %22 = vector.shape_cast %21 : vector<1x1x4xf32> to vector<4xf32>
    %23 = vector.shape_cast %22 : vector<4xf32> to vector<1x1x1x4xf32>
    %c0_18 = arith.constant 0 : index
    %c0_19 = arith.constant 0 : index
    %c2 = arith.constant 2 : index
    %c0_20 = arith.constant 0 : index
    %24 = vector.load %arg16[%c0_18, %c0_19, %c2, %c0_20] : memref<2x10x10x4xf32, #tpu.memory_space<vmem>>, vector<2x8x8x4xf32>
    %25 = vector.broadcast %23 : vector<1x1x1x4xf32> to vector<2x8x8x4xf32>
    %26 = arith.mulf %24, %25 : vector<2x8x8x4xf32>
    %27 = arith.addf %20, %26 : vector<2x8x8x4xf32>
    %28 = vector.extract_strided_slice %5 {offsets = [1, 0, 0], sizes = [1, 1, 4], strides = [1, 1, 1]} : vector<3x3x4xf32> to vector<1x1x4xf32>
    %29 = vector.shape_cast %28 : vector<1x1x4xf32> to vector<4xf32>
    %30 = vector.shape_cast %29 : vector<4xf32> to vector<1x1x1x4xf32>
    %c0_21 = arith.constant 0 : index
    %c1_22 = arith.constant 1 : index
    %c0_23 = arith.constant 0 : index
    %c0_24 = arith.constant 0 : index
    %31 = vector.load %arg16[%c0_21, %c1_22, %c0_23, %c0_24] : memref<2x10x10x4xf32, #tpu.memory_space<vmem>>, vector<2x8x8x4xf32>
    %32 = vector.broadcast %30 : vector<1x1x1x4xf32> to vector<2x8x8x4xf32>
    %33 = arith.mulf %31, %32 : vector<2x8x8x4xf32>
    %34 = arith.addf %27, %33 : vector<2x8x8x4xf32>
    %35 = vector.extract_strided_slice %5 {offsets = [1, 1, 0], sizes = [1, 1, 4], strides = [1, 1, 1]} : vector<3x3x4xf32> to vector<1x1x4xf32>
    %36 = vector.shape_cast %35 : vector<1x1x4xf32> to vector<4xf32>
    %37 = vector.shape_cast %36 : vector<4xf32> to vector<1x1x1x4xf32>
    %c0_25 = arith.constant 0 : index
    %c1_26 = arith.constant 1 : index
    %c1_27 = arith.constant 1 : index
    %c0_28 = arith.constant 0 : index
    %38 = vector.load %arg16[%c0_25, %c1_26, %c1_27, %c0_28] : memref<2x10x10x4xf32, #tpu.memory_space<vmem>>, vector<2x8x8x4xf32>
    %39 = vector.broadcast %37 : vector<1x1x1x4xf32> to vector<2x8x8x4xf32>
    %40 = arith.mulf %38, %39 : vector<2x8x8x4xf32>
    %41 = arith.addf %34, %40 : vector<2x8x8x4xf32>
    %42 = vector.extract_strided_slice %5 {offsets = [1, 2, 0], sizes = [1, 1, 4], strides = [1, 1, 1]} : vector<3x3x4xf32> to vector<1x1x4xf32>
    %43 = vector.shape_cast %42 : vector<1x1x4xf32> to vector<4xf32>
    %44 = vector.shape_cast %43 : vector<4xf32> to vector<1x1x1x4xf32>
    %c0_29 = arith.constant 0 : index
    %c1_30 = arith.constant 1 : index
    %c2_31 = arith.constant 2 : index
    %c0_32 = arith.constant 0 : index
    %45 = vector.load %arg16[%c0_29, %c1_30, %c2_31, %c0_32] : memref<2x10x10x4xf32, #tpu.memory_space<vmem>>, vector<2x8x8x4xf32>
    %46 = vector.broadcast %44 : vector<1x1x1x4xf32> to vector<2x8x8x4xf32>
    %47 = arith.mulf %45, %46 : vector<2x8x8x4xf32>
    %48 = arith.addf %41, %47 : vector<2x8x8x4xf32>
    %49 = vector.extract_strided_slice %5 {offsets = [2, 0, 0], sizes = [1, 1, 4], strides = [1, 1, 1]} : vector<3x3x4xf32> to vector<1x1x4xf32>
    %50 = vector.shape_cast %49 : vector<1x1x4xf32> to vector<4xf32>
    %51 = vector.shape_cast %50 : vector<4xf32> to vector<1x1x1x4xf32>
    %c0_33 = arith.constant 0 : index
    %c2_34 = arith.constant 2 : index
    %c0_35 = arith.constant 0 : index
    %c0_36 = arith.constant 0 : index
    %52 = vector.load %arg16[%c0_33, %c2_34, %c0_35, %c0_36] : memref<2x10x10x4xf32, #tpu.memory_space<vmem>>, vector<2x8x8x4xf32>
    %53 = vector.broadcast %51 : vector<1x1x1x4xf32> to vector<2x8x8x4xf32>
    %54 = arith.mulf %52, %53 : vector<2x8x8x4xf32>
    %55 = arith.addf %48, %54 : vector<2x8x8x4xf32>
    %56 = vector.extract_strided_slice %5 {offsets = [2, 1, 0], sizes = [1, 1, 4], strides = [1, 1, 1]} : vector<3x3x4xf32> to vector<1x1x4xf32>
    %57 = vector.shape_cast %56 : vector<1x1x4xf32> to vector<4xf32>
    %58 = vector.shape_cast %57 : vector<4xf32> to vector<1x1x1x4xf32>
    %c0_37 = arith.constant 0 : index
    %c2_38 = arith.constant 2 : index
    %c1_39 = arith.constant 1 : index
    %c0_40 = arith.constant 0 : index
    %59 = vector.load %arg16[%c0_37, %c2_38, %c1_39, %c0_40] : memref<2x10x10x4xf32, #tpu.memory_space<vmem>>, vector<2x8x8x4xf32>
    %60 = vector.broadcast %58 : vector<1x1x1x4xf32> to vector<2x8x8x4xf32>
    %61 = arith.mulf %59, %60 : vector<2x8x8x4xf32>
    %62 = arith.addf %55, %61 : vector<2x8x8x4xf32>
    %63 = vector.extract_strided_slice %5 {offsets = [2, 2, 0], sizes = [1, 1, 4], strides = [1, 1, 1]} : vector<3x3x4xf32> to vector<1x1x4xf32>
    %64 = vector.shape_cast %63 : vector<1x1x4xf32> to vector<4xf32>
    %65 = vector.shape_cast %64 : vector<4xf32> to vector<1x1x1x4xf32>
    %c0_41 = arith.constant 0 : index
    %c2_42 = arith.constant 2 : index
    %c2_43 = arith.constant 2 : index
    %c0_44 = arith.constant 0 : index
    %66 = vector.load %arg16[%c0_41, %c2_42, %c2_43, %c0_44] : memref<2x10x10x4xf32, #tpu.memory_space<vmem>>, vector<2x8x8x4xf32>
    %67 = vector.broadcast %65 : vector<1x1x1x4xf32> to vector<2x8x8x4xf32>
    %68 = arith.mulf %66, %67 : vector<2x8x8x4xf32>
    %69 = arith.addf %62, %68 : vector<2x8x8x4xf32>
    %70 = vector.shape_cast %69 : vector<2x8x8x4xf32> to vector<128x4xf32>
    %cst_45 = arith.constant dense<0.000000e+00> : vector<4xf32>
    %71 = vector.multi_reduction <add>, %70, %cst_45 [0] : vector<128x4xf32> to vector<4xf32>
    %72 = vector.shape_cast %71 : vector<4xf32> to vector<1x4xf32>
    %73 = arith.mulf %70, %70 : vector<128x4xf32>
    %cst_46 = arith.constant dense<0.000000e+00> : vector<4xf32>
    %74 = vector.multi_reduction <add>, %73, %cst_46 [0] : vector<128x4xf32> to vector<4xf32>
    %75 = vector.shape_cast %74 : vector<4xf32> to vector<1x4xf32>
    %cst_47 = arith.constant 7.812500e-03 : f32
    %76 = vector.broadcast %cst_47 : f32 to vector<1x4xf32>
    %77 = arith.mulf %72, %76 : vector<1x4xf32>
    %cst_48 = arith.constant 7.812500e-03 : f32
    %78 = vector.broadcast %cst_48 : f32 to vector<1x4xf32>
    %79 = arith.mulf %75, %78 : vector<1x4xf32>
    %80 = arith.mulf %77, %77 : vector<1x4xf32>
    %81 = arith.subf %79, %80 : vector<1x4xf32>
    %cst_49 = arith.constant 0.000000e+00 : f32
    %82 = vector.broadcast %cst_49 : f32 to vector<1x4xf32>
    %83 = arith.maximumf %81, %82 : vector<1x4xf32>
    %84 = vector.broadcast %77 : vector<1x4xf32> to vector<128x4xf32>
    %85 = arith.subf %70, %84 : vector<128x4xf32>
    %cst_50 = arith.constant 9.99999974E-6 : f32
    %86 = vector.broadcast %cst_50 : f32 to vector<1x4xf32>
    %87 = arith.addf %83, %86 : vector<1x4xf32>
    %88 = math.rsqrt %87 : vector<1x4xf32>
    %89 = vector.broadcast %88 : vector<1x4xf32> to vector<128x4xf32>
    %90 = arith.mulf %85, %89 : vector<128x4xf32>
    %c0_51 = arith.constant 0 : index
    %c0_52 = arith.constant 0 : index
    %91 = vector.load %arg7[%c0_51, %c0_52] : memref<1x4xf32, #tpu.memory_space<vmem>>, vector<1x4xf32>
    %92 = vector.broadcast %91 : vector<1x4xf32> to vector<128x4xf32>
    %93 = arith.mulf %90, %92 : vector<128x4xf32>
    %c0_53 = arith.constant 0 : index
    %c0_54 = arith.constant 0 : index
    %94 = vector.load %arg8[%c0_53, %c0_54] : memref<1x4xf32, #tpu.memory_space<vmem>>, vector<1x4xf32>
    %95 = vector.broadcast %94 : vector<1x4xf32> to vector<128x4xf32>
    %96 = arith.addf %93, %95 : vector<128x4xf32>
    %cst_55 = arith.constant 0.000000e+00 : f32
    %97 = vector.broadcast %cst_55 : f32 to vector<128x4xf32>
    %98 = arith.maximumf %96, %97 : vector<128x4xf32>
    %99 = arith.truncf %98 : vector<128x4xf32> to vector<128x4xbf16>
    %c0_56 = arith.constant 0 : index
    %c0_57 = arith.constant 0 : index
    %100 = vector.load %arg5[%c0_56, %c0_57] : memref<4x4xbf16, #tpu.memory_space<vmem>>, vector<4x4xbf16>
    %cst_58 = arith.constant dense<0.000000e+00> : vector<128x4xf32>
    %101 = tpu.matmul %99, %100, %cst_58 {dimension_numbers = #tpu.dot_dimension_numbers<[1], [0], [0], [1], [0, 0, 1, 1], [], []>} : vector<128x4xbf16>, vector<4x4xbf16>, vector<128x4xf32> -> vector<128x4xf32>
    %c0_59 = arith.constant 0 : index
    %c0_60 = arith.constant 0 : index
    %c0_61 = arith.constant 0 : index
    %c0_62 = arith.constant 0 : index
    %102 = vector.load %arg2[%c0_59, %c0_60, %c0_61, %c0_62] : memref<2x8x8x4xf32, #tpu.memory_space<vmem>>, vector<2x8x8x4xf32>
    %c0_63 = arith.constant 0 : index
    %c1_64 = arith.constant 1 : index
    %c1_65 = arith.constant 1 : index
    %c0_66 = arith.constant 0 : index
    %103 = vector.load %arg16[%c0_63, %c1_64, %c1_65, %c0_66] : memref<2x10x10x4xf32, #tpu.memory_space<vmem>>, vector<2x8x8x4xf32>
    tpu.vector_store %arg16[%c0_63, %c1_64, %c1_65, %c0_66], %102 {strides = array<i32>} : memref<2x10x10x4xf32, #tpu.memory_space<vmem>>, vector<2x8x8x4xf32>,
    %c0_67 = arith.constant 0 : index
    %c0_68 = arith.constant 0 : index
    %c0_69 = arith.constant 0 : index
    %104 = vector.load %arg4[%c0_67, %c0_68, %c0_69] : memref<3x3x4xf32, #tpu.memory_space<vmem>>, vector<3x3x4xf32>
    %cst_70 = arith.constant 0.000000e+00 : f32
    %105 = vector.broadcast %cst_70 : f32 to vector<2x8x8x4xf32>
    %106 = vector.extract_strided_slice %104 {offsets = [0, 0, 0], sizes = [1, 1, 4], strides = [1, 1, 1]} : vector<3x3x4xf32> to vector<1x1x4xf32>
    %107 = vector.shape_cast %106 : vector<1x1x4xf32> to vector<4xf32>
    %108 = vector.shape_cast %107 : vector<4xf32> to vector<1x1x1x4xf32>
    %c0_71 = arith.constant 0 : index
    %c0_72 = arith.constant 0 : index
    %c0_73 = arith.constant 0 : index
    %c0_74 = arith.constant 0 : index
    %109 = vector.load %arg16[%c0_71, %c0_72, %c0_73, %c0_74] : memref<2x10x10x4xf32, #tpu.memory_space<vmem>>, vector<2x8x8x4xf32>
    %110 = vector.broadcast %108 : vector<1x1x1x4xf32> to vector<2x8x8x4xf32>
    %111 = arith.mulf %109, %110 : vector<2x8x8x4xf32>
    %112 = arith.addf %105, %111 : vector<2x8x8x4xf32>
    %113 = vector.extract_strided_slice %104 {offsets = [0, 1, 0], sizes = [1, 1, 4], strides = [1, 1, 1]} : vector<3x3x4xf32> to vector<1x1x4xf32>
    %114 = vector.shape_cast %113 : vector<1x1x4xf32> to vector<4xf32>
    %115 = vector.shape_cast %114 : vector<4xf32> to vector<1x1x1x4xf32>
    %c0_75 = arith.constant 0 : index
    %c0_76 = arith.constant 0 : index
    %c1_77 = arith.constant 1 : index
    %c0_78 = arith.constant 0 : index
    %116 = vector.load %arg16[%c0_75, %c0_76, %c1_77, %c0_78] : memref<2x10x10x4xf32, #tpu.memory_space<vmem>>, vector<2x8x8x4xf32>
    %117 = vector.broadcast %115 : vector<1x1x1x4xf32> to vector<2x8x8x4xf32>
    %118 = arith.mulf %116, %117 : vector<2x8x8x4xf32>
    %119 = arith.addf %112, %118 : vector<2x8x8x4xf32>
    %120 = vector.extract_strided_slice %104 {offsets = [0, 2, 0], sizes = [1, 1, 4], strides = [1, 1, 1]} : vector<3x3x4xf32> to vector<1x1x4xf32>
    %121 = vector.shape_cast %120 : vector<1x1x4xf32> to vector<4xf32>
    %122 = vector.shape_cast %121 : vector<4xf32> to vector<1x1x1x4xf32>
    %c0_79 = arith.constant 0 : index
    %c0_80 = arith.constant 0 : index
    %c2_81 = arith.constant 2 : index
    %c0_82 = arith.constant 0 : index
    %123 = vector.load %arg16[%c0_79, %c0_80, %c2_81, %c0_82] : memref<2x10x10x4xf32, #tpu.memory_space<vmem>>, vector<2x8x8x4xf32>
    %124 = vector.broadcast %122 : vector<1x1x1x4xf32> to vector<2x8x8x4xf32>
    %125 = arith.mulf %123, %124 : vector<2x8x8x4xf32>
    %126 = arith.addf %119, %125 : vector<2x8x8x4xf32>
    %127 = vector.extract_strided_slice %104 {offsets = [1, 0, 0], sizes = [1, 1, 4], strides = [1, 1, 1]} : vector<3x3x4xf32> to vector<1x1x4xf32>
    %128 = vector.shape_cast %127 : vector<1x1x4xf32> to vector<4xf32>
    %129 = vector.shape_cast %128 : vector<4xf32> to vector<1x1x1x4xf32>
    %c0_83 = arith.constant 0 : index
    %c1_84 = arith.constant 1 : index
    %c0_85 = arith.constant 0 : index
    %c0_86 = arith.constant 0 : index
    %130 = vector.load %arg16[%c0_83, %c1_84, %c0_85, %c0_86] : memref<2x10x10x4xf32, #tpu.memory_space<vmem>>, vector<2x8x8x4xf32>
    %131 = vector.broadcast %129 : vector<1x1x1x4xf32> to vector<2x8x8x4xf32>
    %132 = arith.mulf %130, %131 : vector<2x8x8x4xf32>
    %133 = arith.addf %126, %132 : vector<2x8x8x4xf32>
    %134 = vector.extract_strided_slice %104 {offsets = [1, 1, 0], sizes = [1, 1, 4], strides = [1, 1, 1]} : vector<3x3x4xf32> to vector<1x1x4xf32>
    %135 = vector.shape_cast %134 : vector<1x1x4xf32> to vector<4xf32>
    %136 = vector.shape_cast %135 : vector<4xf32> to vector<1x1x1x4xf32>
    %c0_87 = arith.constant 0 : index
    %c1_88 = arith.constant 1 : index
    %c1_89 = arith.constant 1 : index
    %c0_90 = arith.constant 0 : index
    %137 = vector.load %arg16[%c0_87, %c1_88, %c1_89, %c0_90] : memref<2x10x10x4xf32, #tpu.memory_space<vmem>>, vector<2x8x8x4xf32>
    %138 = vector.broadcast %136 : vector<1x1x1x4xf32> to vector<2x8x8x4xf32>
    %139 = arith.mulf %137, %138 : vector<2x8x8x4xf32>
    %140 = arith.addf %133, %139 : vector<2x8x8x4xf32>
    %141 = vector.extract_strided_slice %104 {offsets = [1, 2, 0], sizes = [1, 1, 4], strides = [1, 1, 1]} : vector<3x3x4xf32> to vector<1x1x4xf32>
    %142 = vector.shape_cast %141 : vector<1x1x4xf32> to vector<4xf32>
    %143 = vector.shape_cast %142 : vector<4xf32> to vector<1x1x1x4xf32>
    %c0_91 = arith.constant 0 : index
    %c1_92 = arith.constant 1 : index
    %c2_93 = arith.constant 2 : index
    %c0_94 = arith.constant 0 : index
    %144 = vector.load %arg16[%c0_91, %c1_92, %c2_93, %c0_94] : memref<2x10x10x4xf32, #tpu.memory_space<vmem>>, vector<2x8x8x4xf32>
    %145 = vector.broadcast %143 : vector<1x1x1x4xf32> to vector<2x8x8x4xf32>
    %146 = arith.mulf %144, %145 : vector<2x8x8x4xf32>
    %147 = arith.addf %140, %146 : vector<2x8x8x4xf32>
    %148 = vector.extract_strided_slice %104 {offsets = [2, 0, 0], sizes = [1, 1, 4], strides = [1, 1, 1]} : vector<3x3x4xf32> to vector<1x1x4xf32>
    %149 = vector.shape_cast %148 : vector<1x1x4xf32> to vector<4xf32>
    %150 = vector.shape_cast %149 : vector<4xf32> to vector<1x1x1x4xf32>
    %c0_95 = arith.constant 0 : index
    %c2_96 = arith.constant 2 : index
    %c0_97 = arith.constant 0 : index
    %c0_98 = arith.constant 0 : index
    %151 = vector.load %arg16[%c0_95, %c2_96, %c0_97, %c0_98] : memref<2x10x10x4xf32, #tpu.memory_space<vmem>>, vector<2x8x8x4xf32>
    %152 = vector.broadcast %150 : vector<1x1x1x4xf32> to vector<2x8x8x4xf32>
    %153 = arith.mulf %151, %152 : vector<2x8x8x4xf32>
    %154 = arith.addf %147, %153 : vector<2x8x8x4xf32>
    %155 = vector.extract_strided_slice %104 {offsets = [2, 1, 0], sizes = [1, 1, 4], strides = [1, 1, 1]} : vector<3x3x4xf32> to vector<1x1x4xf32>
    %156 = vector.shape_cast %155 : vector<1x1x4xf32> to vector<4xf32>
    %157 = vector.shape_cast %156 : vector<4xf32> to vector<1x1x1x4xf32>
    %c0_99 = arith.constant 0 : index
    %c2_100 = arith.constant 2 : index
    %c1_101 = arith.constant 1 : index
    %c0_102 = arith.constant 0 : index
    %158 = vector.load %arg16[%c0_99, %c2_100, %c1_101, %c0_102] : memref<2x10x10x4xf32, #tpu.memory_space<vmem>>, vector<2x8x8x4xf32>
    %159 = vector.broadcast %157 : vector<1x1x1x4xf32> to vector<2x8x8x4xf32>
    %160 = arith.mulf %158, %159 : vector<2x8x8x4xf32>
    %161 = arith.addf %154, %160 : vector<2x8x8x4xf32>
    %162 = vector.extract_strided_slice %104 {offsets = [2, 2, 0], sizes = [1, 1, 4], strides = [1, 1, 1]} : vector<3x3x4xf32> to vector<1x1x4xf32>
    %163 = vector.shape_cast %162 : vector<1x1x4xf32> to vector<4xf32>
    %164 = vector.shape_cast %163 : vector<4xf32> to vector<1x1x1x4xf32>
    %c0_103 = arith.constant 0 : index
    %c2_104 = arith.constant 2 : index
    %c2_105 = arith.constant 2 : index
    %c0_106 = arith.constant 0 : index
    %165 = vector.load %arg16[%c0_103, %c2_104, %c2_105, %c0_106] : memref<2x10x10x4xf32, #tpu.memory_space<vmem>>, vector<2x8x8x4xf32>
    %166 = vector.broadcast %164 : vector<1x1x1x4xf32> to vector<2x8x8x4xf32>
    %167 = arith.mulf %165, %166 : vector<2x8x8x4xf32>
    %168 = arith.addf %161, %167 : vector<2x8x8x4xf32>
    %169 = vector.shape_cast %168 : vector<2x8x8x4xf32> to vector<128x4xf32>
    %cst_107 = arith.constant dense<0.000000e+00> : vector<4xf32>
    %170 = vector.multi_reduction <add>, %169, %cst_107 [0] : vector<128x4xf32> to vector<4xf32>
    %171 = vector.shape_cast %170 : vector<4xf32> to vector<1x4xf32>
    %172 = arith.mulf %169, %169 : vector<128x4xf32>
    %cst_108 = arith.constant dense<0.000000e+00> : vector<4xf32>
    %173 = vector.multi_reduction <add>, %172, %cst_108 [0] : vector<128x4xf32> to vector<4xf32>
    %174 = vector.shape_cast %173 : vector<4xf32> to vector<1x4xf32>
    %cst_109 = arith.constant 7.812500e-03 : f32
    %175 = vector.broadcast %cst_109 : f32 to vector<1x4xf32>
    %176 = arith.mulf %171, %175 : vector<1x4xf32>
    %cst_110 = arith.constant 7.812500e-03 : f32
    %177 = vector.broadcast %cst_110 : f32 to vector<1x4xf32>
    %178 = arith.mulf %174, %177 : vector<1x4xf32>
    %179 = arith.mulf %176, %176 : vector<1x4xf32>
    %180 = arith.subf %178, %179 : vector<1x4xf32>
    %cst_111 = arith.constant 0.000000e+00 : f32
    %181 = vector.broadcast %cst_111 : f32 to vector<1x4xf32>
    %182 = arith.maximumf %180, %181 : vector<1x4xf32>
    %183 = vector.broadcast %176 : vector<1x4xf32> to vector<128x4xf32>
    %184 = arith.subf %169, %183 : vector<128x4xf32>
    %cst_112 = arith.constant 9.99999974E-6 : f32
    %185 = vector.broadcast %cst_112 : f32 to vector<1x4xf32>
    %186 = arith.addf %182, %185 : vector<1x4xf32>
    %187 = math.rsqrt %186 : vector<1x4xf32>
    %188 = vector.broadcast %187 : vector<1x4xf32> to vector<128x4xf32>
    %189 = arith.mulf %184, %188 : vector<128x4xf32>
    %c0_113 = arith.constant 0 : index
    %c0_114 = arith.constant 0 : index
    %190 = vector.load %arg9[%c0_113, %c0_114] : memref<1x4xf32, #tpu.memory_space<vmem>>, vector<1x4xf32>
    %191 = vector.broadcast %190 : vector<1x4xf32> to vector<128x4xf32>
    %192 = arith.mulf %189, %191 : vector<128x4xf32>
    %c0_115 = arith.constant 0 : index
    %c0_116 = arith.constant 0 : index
    %193 = vector.load %arg10[%c0_115, %c0_116] : memref<1x4xf32, #tpu.memory_space<vmem>>, vector<1x4xf32>
    %194 = vector.broadcast %193 : vector<1x4xf32> to vector<128x4xf32>
    %195 = arith.addf %192, %194 : vector<128x4xf32>
    %cst_117 = arith.constant 0.000000e+00 : f32
    %196 = vector.broadcast %cst_117 : f32 to vector<128x4xf32>
    %197 = arith.maximumf %195, %196 : vector<128x4xf32>
    %198 = arith.truncf %197 : vector<128x4xf32> to vector<128x4xbf16>
    %c0_118 = arith.constant 0 : index
    %c0_119 = arith.constant 0 : index
    %199 = vector.load %arg6[%c0_118, %c0_119] : memref<4x4xbf16, #tpu.memory_space<vmem>>, vector<4x4xbf16>
    %cst_120 = arith.constant dense<0.000000e+00> : vector<128x4xf32>
    %200 = tpu.matmul %198, %199, %cst_120 {dimension_numbers = #tpu.dot_dimension_numbers<[1], [0], [0], [1], [0, 0, 1, 1], [], []>} : vector<128x4xbf16>, vector<4x4xbf16>, vector<128x4xf32> -> vector<128x4xf32>
    %201 = arith.addf %101, %200 : vector<128x4xf32>
    %c0_121 = arith.constant 0 : index
    %c0_122 = arith.constant 0 : index
    %202 = vector.load %arg17[%c0_121, %c0_122] : memref<128x4xf32, #tpu.memory_space<vmem>>, vector<128x4xf32>
    %203 = arith.addf %202, %201 : vector<128x4xf32>
    %c0_123 = arith.constant 0 : index
    %c0_124 = arith.constant 0 : index
    %204 = vector.load %arg17[%c0_123, %c0_124] : memref<128x4xf32, #tpu.memory_space<vmem>>, vector<128x4xf32>
    tpu.vector_store %arg17[%c0_123, %c0_124], %203 {strides = array<i32>} : memref<128x4xf32, #tpu.memory_space<vmem>>, vector<128x4xf32>,
    %c0_i32_125 = arith.constant 0 : i32
    %205 = arith.cmpi eq, %arg0, %c0_i32_125 : i32
    %206 = arith.extui %205 : i1 to i32
    %c0_i32_126 = arith.constant 0 : i32
    %207 = arith.cmpi ne, %206, %c0_i32_126 : i32
    scf.if %207 {
      %c0_127 = arith.constant 0 : index
      %c0_128 = arith.constant 0 : index
      %208 = vector.load %arg17[%c0_127, %c0_128] : memref<128x4xf32, #tpu.memory_space<vmem>>, vector<128x4xf32>
      %cst_129 = arith.constant dense<0.000000e+00> : vector<4xf32>
      %209 = vector.multi_reduction <add>, %208, %cst_129 [0] : vector<128x4xf32> to vector<4xf32>
      %210 = vector.shape_cast %209 : vector<4xf32> to vector<1x4xf32>
      %211 = arith.mulf %208, %208 : vector<128x4xf32>
      %cst_130 = arith.constant dense<0.000000e+00> : vector<4xf32>
      %212 = vector.multi_reduction <add>, %211, %cst_130 [0] : vector<128x4xf32> to vector<4xf32>
      %213 = vector.shape_cast %212 : vector<4xf32> to vector<1x4xf32>
      %cst_131 = arith.constant 7.812500e-03 : f32
      %214 = vector.broadcast %cst_131 : f32 to vector<1x4xf32>
      %215 = arith.mulf %210, %214 : vector<1x4xf32>
      %cst_132 = arith.constant 7.812500e-03 : f32
      %216 = vector.broadcast %cst_132 : f32 to vector<1x4xf32>
      %217 = arith.mulf %213, %216 : vector<1x4xf32>
      %218 = arith.mulf %215, %215 : vector<1x4xf32>
      %219 = arith.subf %217, %218 : vector<1x4xf32>
      %cst_133 = arith.constant 0.000000e+00 : f32
      %220 = vector.broadcast %cst_133 : f32 to vector<1x4xf32>
      %221 = arith.maximumf %219, %220 : vector<1x4xf32>
      %222 = vector.broadcast %215 : vector<1x4xf32> to vector<128x4xf32>
      %223 = arith.subf %208, %222 : vector<128x4xf32>
      %cst_134 = arith.constant 9.99999974E-6 : f32
      %224 = vector.broadcast %cst_134 : f32 to vector<1x4xf32>
      %225 = arith.addf %221, %224 : vector<1x4xf32>
      %226 = math.rsqrt %225 : vector<1x4xf32>
      %227 = vector.broadcast %226 : vector<1x4xf32> to vector<128x4xf32>
      %228 = arith.mulf %223, %227 : vector<128x4xf32>
      %c0_135 = arith.constant 0 : index
      %c0_136 = arith.constant 0 : index
      %229 = vector.load %arg11[%c0_135, %c0_136] : memref<1x4xf32, #tpu.memory_space<vmem>>, vector<1x4xf32>
      %230 = vector.broadcast %229 : vector<1x4xf32> to vector<128x4xf32>
      %231 = arith.mulf %228, %230 : vector<128x4xf32>
      %c0_137 = arith.constant 0 : index
      %c0_138 = arith.constant 0 : index
      %232 = vector.load %arg12[%c0_137, %c0_138] : memref<1x4xf32, #tpu.memory_space<vmem>>, vector<1x4xf32>
      %233 = vector.broadcast %232 : vector<1x4xf32> to vector<128x4xf32>
      %234 = arith.addf %231, %233 : vector<128x4xf32>
      %cst_139 = arith.constant 0.000000e+00 : f32
      %235 = vector.broadcast %cst_139 : f32 to vector<128x4xf32>
      %236 = arith.maximumf %234, %235 : vector<128x4xf32>
      %237 = vector.shape_cast %236 : vector<128x4xf32> to vector<2x64x4xf32>
      %cst_140 = arith.constant dense<0.000000e+00> : vector<2x4xf32>
      %238 = vector.multi_reduction <add>, %237, %cst_140 [1] : vector<2x64x4xf32> to vector<2x4xf32>
      %cst_141 = arith.constant 6.400000e+01 : f32
      %239 = vector.broadcast %cst_141 : f32 to vector<2x4xf32>
      %240 = arith.divf %238, %239 : vector<2x4xf32>
      %241 = arith.truncf %240 : vector<2x4xf32> to vector<2x4xbf16>
      %c0_142 = arith.constant 0 : index
      %c0_143 = arith.constant 0 : index
      %242 = vector.load %arg13[%c0_142, %c0_143] : memref<4x10xbf16, #tpu.memory_space<vmem>>, vector<4x10xbf16>
      %cst_144 = arith.constant dense<0.000000e+00> : vector<2x10xf32>
      %243 = tpu.matmul %241, %242, %cst_144 {dimension_numbers = #tpu.dot_dimension_numbers<[1], [0], [0], [1], [0, 0, 1, 1], [], []>} : vector<2x4xbf16>, vector<4x10xbf16>, vector<2x10xf32> -> vector<2x10xf32>
      %c0_145 = arith.constant 0 : index
      %c0_146 = arith.constant 0 : index
      %244 = vector.load %arg14[%c0_145, %c0_146] : memref<1x10xf32, #tpu.memory_space<vmem>>, vector<1x10xf32>
      %245 = vector.broadcast %244 : vector<1x10xf32> to vector<2x10xf32>
      %246 = arith.addf %243, %245 : vector<2x10xf32>
      %c0_147 = arith.constant 0 : index
      %c0_148 = arith.constant 0 : index
      %247 = vector.load %arg15[%c0_147, %c0_148] : memref<2x10xf32, #tpu.memory_space<vmem>>, vector<2x10xf32>
      tpu.vector_store %arg15[%c0_147, %c0_148], %246 {strides = array<i32>} : memref<2x10xf32, #tpu.memory_space<vmem>>, vector<2x10xf32>,
    } else {
    }
    return
  }
  func.func @transform_0(%arg0: i32) -> (i32, i32, i32, i32) {
    %c0_i32 = arith.constant 0 : i32
    %c0_i32_0 = arith.constant 0 : i32
    %c0_i32_1 = arith.constant 0 : i32
    %c0_i32_2 = arith.constant 0 : i32
    return %c0_i32, %c0_i32_0, %c0_i32_1, %arg0 : i32, i32, i32, i32
  }
  func.func @transform_1(%arg0: i32) -> (i32, i32, i32, i32) {
    %c0_i32 = arith.constant 0 : i32
    %c0_i32_0 = arith.constant 0 : i32
    %c0_i32_1 = arith.constant 0 : i32
    %c0_i32_2 = arith.constant 0 : i32
    return %c0_i32, %c0_i32_0, %c0_i32_1, %arg0 : i32, i32, i32, i32
  }
  func.func @transform_2(%arg0: i32) -> (i32, i32, i32) {
    %c0_i32 = arith.constant 0 : i32
    %c0_i32_0 = arith.constant 0 : i32
    %c0_i32_1 = arith.constant 0 : i32
    return %c0_i32, %c0_i32_0, %arg0 : i32, i32, i32
  }
  func.func @transform_3(%arg0: i32) -> (i32, i32, i32) {
    %c0_i32 = arith.constant 0 : i32
    %c0_i32_0 = arith.constant 0 : i32
    %c0_i32_1 = arith.constant 0 : i32
    return %c0_i32, %c0_i32_0, %arg0 : i32, i32, i32
  }
  func.func @transform_4(%arg0: i32) -> (i32, i32) {
    %c0_i32 = arith.constant 0 : i32
    %c0_i32_0 = arith.constant 0 : i32
    return %arg0, %c0_i32 : i32, i32
  }
  func.func @transform_5(%arg0: i32) -> (i32, i32) {
    %c0_i32 = arith.constant 0 : i32
    %c0_i32_0 = arith.constant 0 : i32
    return %arg0, %c0_i32 : i32, i32
  }
  func.func @transform_6(%arg0: i32) -> (i32, i32) {
    %c0_i32 = arith.constant 0 : i32
    %c0_i32_0 = arith.constant 0 : i32
    return %c0_i32, %arg0 : i32, i32
  }
  func.func @transform_7(%arg0: i32) -> (i32, i32) {
    %c0_i32 = arith.constant 0 : i32
    %c0_i32_0 = arith.constant 0 : i32
    return %c0_i32, %arg0 : i32, i32
  }
  func.func @transform_8(%arg0: i32) -> (i32, i32) {
    %c0_i32 = arith.constant 0 : i32
    %c0_i32_0 = arith.constant 0 : i32
    return %c0_i32, %arg0 : i32, i32
  }
  func.func @transform_9(%arg0: i32) -> (i32, i32) {
    %c0_i32 = arith.constant 0 : i32
    %c0_i32_0 = arith.constant 0 : i32
    return %c0_i32, %arg0 : i32, i32
  }
  func.func @transform_10(%arg0: i32) -> (i32, i32) {
    %c0_i32 = arith.constant 0 : i32
    %c0_i32_0 = arith.constant 0 : i32
    %c0_i32_1 = arith.constant 0 : i32
    return %c0_i32, %c0_i32_0 : i32, i32
  }
  func.func @transform_11(%arg0: i32) -> (i32, i32) {
    %c0_i32 = arith.constant 0 : i32
    %c0_i32_0 = arith.constant 0 : i32
    %c0_i32_1 = arith.constant 0 : i32
    return %c0_i32, %c0_i32_0 : i32, i32
  }
  func.func @transform_12(%arg0: i32) -> (i32, i32) {
    %c0_i32 = arith.constant 0 : i32
    %c0_i32_0 = arith.constant 0 : i32
    %c0_i32_1 = arith.constant 0 : i32
    return %c0_i32, %c0_i32_0 : i32, i32
  }
  func.func @transform_13(%arg0: i32) -> (i32, i32) {
    %c0_i32 = arith.constant 0 : i32
    %c0_i32_0 = arith.constant 0 : i32
    %c0_i32_1 = arith.constant 0 : i32
    return %c0_i32, %c0_i32_0 : i32, i32
  }
  func.func @transform_14(%arg0: i32) -> (i32, i32) {
    %c0_i32 = arith.constant 0 : i32
    %c0_i32_0 = arith.constant 0 : i32
    %c0_i32_1 = arith.constant 0 : i32
    return %c0_i32, %c0_i32_0 : i32, i32
  }
}

</mosaic_0001>

<bundles_post_ra>
// kernel: tpu_custom_call.1
= control target key start
LH: loop header
LB: loop body
LE: loop exit
PB: predicated region body
PF: predicated region fallthrough
CT: control target
= control target key end

     0   :  { %vm1499_vm0 = vcmask 1041408   ;;  %vm53_vm1 = vcmask 31744   ;;  %vm71_vm2 = vcmask 25600   ;;  %v2054_v2 = vmov 0.0   ;;  %s3877_s0 = inlined_call_operand.vmem [shape: f32[2,8,8,4], index: 0, kind: input, shape index: {}]   ;;  %s3878_s1 = inlined_call_operand.vmem [shape: f32[2,8,8,4], index: 1, kind: input, shape index: {}]   ;;  %s3879_s2 = inlined_call_operand.vmem [shape: f32[3,3,4], index: 2, kind: input, shape index: {}]   ;;  %s3880_s3 = inlined_call_operand.vmem [shape: f32[3,3,4], index: 3, kind: input, shape index: {}]   ;;  %s3881_s4 = inlined_call_operand.vmem [shape: bf16[4,4], index: 4, kind: input, shape index: {}]   ;;  %s3882_s5 = inlined_call_operand.vmem [shape: bf16[4,4], index: 5, kind: input, shape index: {}]   ;;  %s3883_s6 = inlined_call_operand.vmem [shape: f32[1,4], index: 6, kind: input, shape index: {}]   ;;  %s3884_s7 = inlined_call_operand.vmem [shape: f32[1,4], index: 7, kind: input, shape index: {}]   ;;  %s3885_s8 = inlined_call_operand.vmem [shape: f32[1,4], index: 8, kind: input, shape index: {}]   ;;  %s3886_s9 = inlined_call_operand.vmem [shape: f32[1,4], index: 9, kind: input, shape index: {}]   ;;  %s3887_s10 = inlined_call_operand.vmem [shape: f32[1,4], index: 10, kind: input, shape index: {}]   ;;  %s3888_s11 = inlined_call_operand.vmem [shape: f32[1,4], index: 11, kind: input, shape index: {}]   ;;  %s3889_s12 = inlined_call_operand.vmem [shape: bf16[4,10], index: 12, kind: input, shape index: {}]   ;;  %s3890_s13 = inlined_call_operand.vmem [shape: f32[1,10], index: 13, kind: input, shape index: {}]   ;;  %s3891_s14 = inlined_call_operand.hbm [shape: f32[2,10], index: 14, kind: output, shape index: {}]  }
   0x1   :  { %v795_v0 = vld [vmem:[%s3881_s4] sm:$0x3]  ;;  %70 = vst.msk [vmem:[#allocation2] sm:$0xff] %vm53_vm1, %v2054_v2  ;;  %vm81_vm3 = vcmask 24576  }
   0x2   :  { %v1577_v1 = vsel %vm1499_vm0, %v795_v0, 0  ;;  %72 = vst.msk [vmem:[#allocation2 + $0x8] sm:$0x3] %vm71_vm2, %v2054_v2 }
   0x3   :  { %1586 = vmatpush.bf16.msra.mxu1 %v1577_v1  ;;  %2009 = vmatpush.bf16.msra.mxu2 %v1577_v1  ;;  %73 = vst.msk [vmem:[#allocation2 + $0xa0] sm:$0xff] %vm53_vm1, %v2054_v2 }
   0x4   :  { %74 = vst.msk [vmem:[#allocation2 + $0xa8] sm:$0x3] %vm71_vm2, %v2054_v2 }
   0x5   :  { %76 = vst.msk [vmem:[#allocation2 + $0x90] sm:$0xff] %vm53_vm1, %v2054_v2 }
   0x6   :  { %77 = vst.msk [vmem:[#allocation2 + $0x98] sm:$0x3] %vm71_vm2, %v2054_v2 }
   0x7   :  { %78 = vst.msk [vmem:[#allocation2 + $0x130] sm:$0xff] %vm53_vm1, %v2054_v2 }
   0x8   :  { %19 = vsyncpa [#allocation5], 0  ;;  %79 = vst.msk [vmem:[#allocation2 + $0x138] sm:$0x3] %vm71_vm2, %v2054_v2  ;;  %v114_v3 = vld [vmem:[%s3877_s0] sm:$0xff]  ;;  %v115_v4 = vld [vmem:[%s3877_s0 + $0x8] sm:$0xff] }
   0x9   :  { %82 = vst.msk [vmem:[#allocation2 + $0x10] sm:$0x1] %vm81_vm3, %v2054_v2  ;;  %v116_v5 = vld [vmem:[%s3877_s0 + $0x10] sm:$0xff]  ;;  %v117_v6 = vld [vmem:[%s3877_s0 + $0x18] sm:$0xff]  ;;  %v148_v7 = vld [vmem:[%s3879_s2] sm:$0x7] }
   0xa   :  { %83 = vst.msk [vmem:[#allocation2 + $0x20] sm:$0x1] %vm81_vm3, %v2054_v2  ;;  %v118_v8 = vld [vmem:[%s3877_s0 + $0x20] sm:$0xff]  ;;  %v119_v9 = vld [vmem:[%s3877_s0 + $0x28] sm:$0xff]  ;;  %v120_v10 = vld [vmem:[%s3877_s0 + $0x30] sm:$0xff]  ;;  %v2240_v11 = vperm.slane %v148_v7, 0 }
   0xb   :  { %84 = vst.msk [vmem:[#allocation2 + $0x30] sm:$0x1] %vm81_vm3, %v2054_v2  ;;  %v121_v12 = vld [vmem:[%s3877_s0 + $0x38] sm:$0xff]  ;;  %v122_v13 = vld [vmem:[%s3877_s0 + $0x40] sm:$0xff]  ;;  %v2249_v15 = vperm.slane %v148_v7, 1  ;;  %v123_v19 = vld [vmem:[%s3877_s0 + $0x48] sm:$0xff] }
   0xc   :  { %85 = vst.msk [vmem:[#allocation2 + $0x40] sm:$0x1] %vm81_vm3, %v2054_v2  ;;  %v151_v14 = vld [vmem:[#allocation2] sm:$0xff]  ;;  %v124_v20 = vld [vmem:[%s3877_s0 + $0x50] sm:$0xff]  ;;  %v125_v22 = vld [vmem:[%s3877_s0 + $0x58] sm:$0xff]  ;;  %v2268_v26 = vperm.slane %v148_v7, 2 }
   0xd   :  { %86 = vst.msk [vmem:[#allocation2 + $0x50] sm:$0x1] %vm81_vm3, %v2054_v2  ;;  %v159_v16 = vld [vmem:[#allocation2 + $0xa0] sm:$0xff]  ;;  %v168_v21 = vmul.f32 %v2240_v11, %v151_v14  ;;  %v127_v30 = vld [vmem:[%s3877_s0 + $0x68] sm:$0xff]  ;;  %v128_v31 = vld [vmem:[%s3877_s0 + $0x70] sm:$0xff]  ;;  %vm1951_vm14 = vcmask 1041409  }
   0xe   :  { %87 = vst.msk [vmem:[#allocation2 + $0x60] sm:$0x1] %vm81_vm3, %v2054_v2  ;;  %v200_v17 = vld [vmem:[#allocation2 + $0x1] sm:$0xff]  ;;  %v176_v23 = vmul.f32 %v2240_v11, %v159_v16  ;;  %v129_v32 = vld [vmem:[%s3877_s0 + $0x78] sm:$0xff]  ;;  %s2056_s25 = smov [#allocation4]   ;;  %s1982_s29 = sshll.u32 %s3891_s14, 4  ;;  %s1983_s29 = int_to_ptr.hbm [resolvable:$true] %s1982_s29 }
   0xf   :  { %88 = vst.msk [vmem:[#allocation2 + $0x70] sm:$0x1] %vm81_vm3, %v2054_v2  ;;  %v208_v18 = vld [vmem:[#allocation2 + $0xa1] sm:$0xff]  ;;  %v217_v24 = vmul.f32 %v2249_v15, %v200_v17  ;;  %s1980_s26 = sshll.u32 %s2056_s25, 4  ;;  %vm1973_vm15 = vcmask 74752   ;;  %s1981_s26 = int_to_ptr.vmem [resolvable:$true] %s1980_s26 }
  0x10   :  { %89 = vst.msk [vmem:[#allocation2 + $0x80] sm:$0x1] %vm81_vm3, %v2054_v2  ;;  %v225_v25 = vmul.f32 %v2249_v15, %v208_v18  ;;  %v126_v27 = vld [vmem:[%s3877_s0 + $0x60] sm:$0xff] }
  0x11   :  { %90 = vst.msk [vmem:[#allocation2 + $0xb0] sm:$0x1] %vm81_vm3, %v2054_v2  ;;  %v249_v28 = vld [vmem:[#allocation2 + $0x2] sm:$0xff]  ;;  %v233_v34 = vadd.f32 %v217_v24, %v168_v21 }
  0x12   :  { %91 = vst.msk [vmem:[#allocation2 + $0xc0] sm:$0x1] %vm81_vm3, %v2054_v2  ;;  %v257_v29 = vld [vmem:[#allocation2 + $0xa2] sm:$0xff]  ;;  %v241_v35 = vadd.f32 %v225_v25, %v176_v23  ;;  %v266_v36 = vmul.f32 %v2268_v26, %v249_v28 }
  0x13   :  { %92 = vst.msk [vmem:[#allocation2 + $0xd0] sm:$0x1] %vm81_vm3, %v2054_v2  ;;  %v149_v33 = vld [vmem:[%s3879_s2 + $0x4] sm:$0x7]  ;;  %v274_v37 = vmul.f32 %v2268_v26, %v257_v29 }
  0x14   :  { %93 = vst.msk [vmem:[#allocation2 + $0xe0] sm:$0x1] %vm81_vm3, %v2054_v2  ;;  %v2308_v46 = vperm.slane %v149_v33, 0  ;;  %v2317_v51 = vadd.f32 %v266_v36, %v233_v34 }
  0x15   :  { %94 = vst.msk [vmem:[#allocation2 + $0xf0] sm:$0x1] %vm81_vm3, %v2054_v2  ;;  %v2319_v52 = vadd.f32 %v274_v37, %v241_v35 }
  0x16   :  { %95 = vst.msk [vmem:[#allocation2 + $0x100] sm:$0x1] %vm81_vm3, %v2054_v2 }
  0x17   :  { %96 = vst.msk [vmem:[#allocation2 + $0x110] sm:$0x1] %vm81_vm3, %v2054_v2 }
  0x18   :  { %97 = vst.msk [vmem:[#allocation2 + $0x120] sm:$0x1] %vm81_vm3, %v2054_v2 }
  0x19   :  { %98 = vst.msk [vmem:[#allocation2 + $0x19] sm:$0x1] %vm81_vm3, %v2054_v2 }
  0x1a   :  { %99 = vst.msk [vmem:[#allocation2 + $0x29] sm:$0x1] %vm81_vm3, %v2054_v2 }
  0x1b   :  { %100 = vst.msk [vmem:[#allocation2 + $0x39] sm:$0x1] %vm81_vm3, %v2054_v2 }
  0x1c   :  { %101 = vst.msk [vmem:[#allocation2 + $0x49] sm:$0x1] %vm81_vm3, %v2054_v2 }
  0x1d   :  { %102 = vst.msk [vmem:[#allocation2 + $0x59] sm:$0x1] %vm81_vm3, %v2054_v2 }
  0x1e   :  { %103 = vst.msk [vmem:[#allocation2 + $0x69] sm:$0x1] %vm81_vm3, %v2054_v2 }
  0x1f   :  { %104 = vst.msk [vmem:[#allocation2 + $0x79] sm:$0x1] %vm81_vm3, %v2054_v2 }
  0x20   :  { %105 = vst.msk [vmem:[#allocation2 + $0x89] sm:$0x1] %vm81_vm3, %v2054_v2 }
  0x21   :  { %106 = vst.msk [vmem:[#allocation2 + $0xb9] sm:$0x1] %vm81_vm3, %v2054_v2 }
  0x22   :  { %107 = vst.msk [vmem:[#allocation2 + $0xc9] sm:$0x1] %vm81_vm3, %v2054_v2 }
  0x23   :  { %108 = vst.msk [vmem:[#allocation2 + $0xd9] sm:$0x1] %vm81_vm3, %v2054_v2 }
  0x24   :  { %109 = vst.msk [vmem:[#allocation2 + $0xe9] sm:$0x1] %vm81_vm3, %v2054_v2 }
  0x25   :  { %110 = vst.msk [vmem:[#allocation2 + $0xf9] sm:$0x1] %vm81_vm3, %v2054_v2 }
  0x26   :  { %111 = vst.msk [vmem:[#allocation2 + $0x109] sm:$0x1] %vm81_vm3, %v2054_v2 }
  0x27   :  { %112 = vst.msk [vmem:[#allocation2 + $0x119] sm:$0x1] %vm81_vm3, %v2054_v2 }
  0x28   :  { %113 = vst.msk [vmem:[#allocation2 + $0x129] sm:$0x1] %vm81_vm3, %v2054_v2 }
  0x29   :  { %132 = vst.msk [vmem:[#allocation2 + $0x11] sm:$0xff] %vm53_vm1, %v114_v3  ;;  %v2351_v3 = vperm.slane %v149_v33, 1 }
  0x2a   :  { %133 = vst.msk [vmem:[#allocation2 + $0x21] sm:$0xff] %vm53_vm1, %v115_v4  ;;  %v2353_v4 = vperm.slane %v149_v33, 2 }
  0x2b   :  { %134 = vst.msk [vmem:[#allocation2 + $0x31] sm:$0xff] %vm53_vm1, %v116_v5 }
  0x2c   :  { %135 = vst.msk [vmem:[#allocation2 + $0x41] sm:$0xff] %vm53_vm1, %v117_v6 }
  0x2d   :  { %136 = vst.msk [vmem:[#allocation2 + $0x51] sm:$0xff] %vm53_vm1, %v118_v8 }
  0x2e   :  { %137 = vst.msk [vmem:[#allocation2 + $0x61] sm:$0xff] %vm53_vm1, %v119_v9 }
  0x2f   :  { %138 = vst.msk [vmem:[#allocation2 + $0x71] sm:$0xff] %vm53_vm1, %v120_v10 }
  0x30   :  { %139 = vst.msk [vmem:[#allocation2 + $0x81] sm:$0xff] %vm53_vm1, %v121_v12  ;;  %v152_v38 = vld [vmem:[#allocation2 + $0x10] sm:$0xff] }
  0x31   :  { %140 = vst.msk [vmem:[#allocation2 + $0xb1] sm:$0xff] %vm53_vm1, %v122_v13  ;;  %v2292_v39 = vld [vmem:[#allocation2 + $0x20] sm:$0xff]  ;;  %v2294_v40 = vld [vmem:[#allocation2 + $0x11] sm:$0xff]  ;;  %v169_v48 = vmul.f32 %v2240_v11, %v152_v38  ;;  %v2372_v12 = vmul.f32 %v2308_v46, %v152_v38 }
  0x32   :  { %141 = vst.msk [vmem:[#allocation2 + $0xc1] sm:$0xff] %vm53_vm1, %v123_v19  ;;  %v2297_v41 = vld [vmem:[#allocation2 + $0x30] sm:$0xff]  ;;  %v2299_v42 = vld [vmem:[#allocation2 + $0x21] sm:$0xff]  ;;  %v218_v50 = vmul.f32 %v2249_v15, %v2294_v40  ;;  %v170_v53 = vmul.f32 %v2240_v11, %v2292_v39  ;;  %v2396_v21 = vmul.f32 %v2308_v46, %v2292_v39 }
  0x33   :  { %142 = vst.msk [vmem:[#allocation2 + $0xd1] sm:$0xff] %vm53_vm1, %v124_v20  ;;  %v2301_v43 = vld [vmem:[#allocation2 + $0x31] sm:$0xff]  ;;  %v2304_v44 = vld [vmem:[#allocation2 + $0x40] sm:$0xff]  ;;  %v171_v54 = vmul.f32 %v2240_v11, %v2297_v41  ;;  %v219_v55 = vmul.f32 %v2249_v15, %v2299_v42 }
  0x34   :  { %143 = vst.msk [vmem:[#allocation2 + $0xe1] sm:$0xff] %vm53_vm1, %v125_v22  ;;  %v2306_v45 = vld [vmem:[#allocation2 + $0x41] sm:$0xff]  ;;  %v2310_v47 = vld [vmem:[#allocation2 + $0x50] sm:$0xff]  ;;  %v220_v56 = vmul.f32 %v2249_v15, %v2301_v43  ;;  %v172_v61 = vmul.f32 %v2240_v11, %v2304_v44  ;;  %v2382_v17 = vadd.f32 %v218_v50, %v169_v48 }
  0x35   :  { %144 = vst.msk [vmem:[#allocation2 + $0xf1] sm:$0xff] %vm53_vm1, %v126_v27  ;;  %v2313_v49 = vld [vmem:[#allocation2 + $0x51] sm:$0xff]  ;;  %v2333_v58 = vld [vmem:[#allocation2 + $0x22] sm:$0xff]  ;;  %v221_v63 = vmul.f32 %v2249_v15, %v2306_v45  ;;  %v173_v6 = vmul.f32 %v2240_v11, %v2310_v47  ;;  %v2406_v25 = vadd.f32 %v219_v55, %v170_v53 }
  0x36   :  { %145 = vst.msk [vmem:[#allocation2 + $0x101] sm:$0xff] %vm53_vm1, %v127_v30  ;;  %v2331_v57 = vld [vmem:[#allocation2 + $0x12] sm:$0xff]  ;;  %v2339_v60 = vld [vmem:[#allocation2 + $0x60] sm:$0xff]  ;;  %v222_v8 = vmul.f32 %v2249_v15, %v2313_v49  ;;  %v2388_v19 = vmul.f32 %v2268_v26, %v2333_v58  ;;  %v2408_v27 = vadd.f32 %v220_v56, %v171_v54 }
  0x37   :  { %4031 = vst [vmem:[#allocation7_spill] sm:$0xff] %v2292_v39  ;;  %v2335_v59 = vld [vmem:[#allocation2 + $0x32] sm:$0xff]  ;;  %v2343_v62 = vld [vmem:[#allocation2 + $0x61] sm:$0xff]  ;;  %v2369_v10 = vmul.f32 %v2268_v26, %v2331_v57  ;;  %v237_v35 = vadd.f32 %v221_v63, %v172_v61 }
  0x38   :  { %146 = vst.msk [vmem:[#allocation2 + $0x111] sm:$0xff] %vm53_vm1, %v128_v31  ;;  %v2347_v0 = vld [vmem:[#allocation2 + $0x42] sm:$0xff]  ;;  %v2349_v1 = vld [vmem:[#allocation2 + $0x52] sm:$0xff]  ;;  %v2392_v20 = vmul.f32 %v2268_v26, %v2335_v59  ;;  %v223_v34 = vmul.f32 %v2249_v15, %v2343_v62  ;;  %v238_v54 = vadd.f32 %v222_v8, %v173_v6 }
  0x39   :  { %147 = vst.msk [vmem:[#allocation2 + $0x121] sm:$0xff] %vm53_vm1, %v129_v32  ;;  %v2357_v5 = vld [vmem:[#allocation2 + $0x70] sm:$0xff]  ;;  %v2365_v9 = vld [vmem:[#allocation2 + $0x62] sm:$0xff]  ;;  %v2412_v28 = vmul.f32 %v2268_v26, %v2347_v0  ;;  %v2416_v29 = vmul.f32 %v2268_v26, %v2349_v1  ;;  %v174_v32 = vmul.f32 %v2240_v11, %v2339_v60 }
  0x3a   :  { %4032 = vst [vmem:[#allocation8_spill] sm:$0xff] %v2306_v45  ;;  %v2361_v7 = vld [vmem:[#allocation2 + $0x71] sm:$0xff]  ;;  %v2378_v14 = vld [vmem:[#allocation2 + $0xc0] sm:$0xff]  ;;  %v2432_v36 = vmul.f32 %v2268_v26, %v2365_v9  ;;  %v175_v38 = vmul.f32 %v2240_v11, %v2357_v5 }
  0x3b   :  { %4033 = vst [vmem:[#allocation9_spill] sm:$0xff] %v2313_v49  ;;  %v2376_v13 = vld [vmem:[#allocation2 + $0xb0] sm:$0xff]  ;;  %v2402_v23 = vld [vmem:[#allocation2 + $0xc1] sm:$0xff]  ;;  %v224_v53 = vmul.f32 %v2249_v15, %v2361_v7  ;;  %v178_v63 = vmul.f32 %v2240_v11, %v2378_v14 }
  0x3c   :  { %54 = vst.msk [vmem:[#allocation3] sm:$0xff] %vm53_vm1, %v2054_v2  ;;  %v2380_v16 = vld [vmem:[#allocation2 + $0xb1] sm:$0xff]  ;;  %v2420_v30 = vld [vmem:[#allocation2 + $0xe0] sm:$0xff]  ;;  %v177_v61 = vmul.f32 %v2240_v11, %v2376_v13  ;;  %v227_v6 = vmul.f32 %v2249_v15, %v2402_v23 }
  0x3d   :  { %4034 = vst [vmem:[#allocation10_spill] sm:$0xff] %v2331_v57  ;;  %v2384_v18 = vld [vmem:[#allocation2 + $0x72] sm:$0xff]  ;;  %v2426_v33 = vld [vmem:[#allocation2 + $0xe1] sm:$0xff] }
  0x3e   :  { %4035 = vst [vmem:[#allocation11_spill] sm:$0xff] %v2333_v58  ;;  %v2400_v22 = vld [vmem:[#allocation2 + $0xd0] sm:$0xff]  ;;  %v2436_v37 = vld [vmem:[#allocation2 + $0x100] sm:$0xff]  ;;  %v273_v55 = vmul.f32 %v2268_v26, %v2384_v18 }
  0x3f   :  { %4036 = vst [vmem:[#allocation12_spill] sm:$0xff] %v2335_v59  ;;  %v2404_v24 = vld [vmem:[#allocation2 + $0xd1] sm:$0xff]  ;;  %v2442_v50 = vld [vmem:[#allocation2 + $0x101] sm:$0xff]  ;;  %v179_v8 = vmul.f32 %v2240_v11, %v2400_v22  ;;  %v182_v58 = vmul.f32 %v2240_v11, %v2436_v37 }
  0x40   :  { %55 = vst.msk [vmem:[#allocation3 + $0x8] sm:$0xff] %vm53_vm1, %v2054_v2  ;;  %v2422_v31 = vld [vmem:[#allocation2 + $0xf0] sm:$0xff]  ;;  %v231_v57 = vmul.f32 %v2249_v15, %v2442_v50 }
  0x41   :  { %4037 = vst [vmem:[#allocation13_spill] sm:$0xff] %v2343_v62  ;;  %v2440_v48 = vld [vmem:[#allocation2 + $0xf1] sm:$0xff]  ;;  %v181_v59 = vmul.f32 %v2240_v11, %v2422_v31  ;;  %v2490_v62 = vld [vmem:[#allocation2 + $0xc2] sm:$0xff] }
  0x42   :  { %4038 = vst [vmem:[#allocation14_spill] sm:$0xff] %v2347_v0  ;;  %v2450_v56 = vld [vmem:[#allocation2 + $0x110] sm:$0xff]  ;;  %v229_v0 = vmul.f32 %v2249_v15, %v2426_v33 }
  0x43   :  { %4039 = vst [vmem:[#allocation15_spill] sm:$0xff] %v2349_v1  ;;  %v2456_v39 = vld [vmem:[#allocation2 + $0x111] sm:$0xff]  ;;  %v228_v1 = vmul.f32 %v2249_v15, %v2404_v24 }
  0x44   :  { %4040 = vst [vmem:[#allocation16_spill] sm:$0xff] %v2353_v4  ;;  %v230_v4 = vmul.f32 %v2249_v15, %v2440_v48  ;;  %v2492_v49 = vld [vmem:[#allocation2 + $0xd2] sm:$0xff] }
  0x45   :  { %56 = vst.msk [vmem:[#allocation3 + $0x10] sm:$0xff] %vm53_vm1, %v2054_v2  ;;  %v2498_v45 = vld [vmem:[#allocation2 + $0xf2] sm:$0xff] }
  0x46   :  { %4041 = vst [vmem:[#allocation17_spill] sm:$0xff] %v2361_v7  ;;  %v2488_v7 = vld [vmem:[#allocation2 + $0xb2] sm:$0xff] }
  0x47   :  { %4042 = vst [vmem:[#allocation18_spill] sm:$0xff] %v2365_v9  ;;  %v226_v9 = vmul.f32 %v2249_v15, %v2380_v16 }
  0x48   :  { %57 = vst.msk [vmem:[#allocation3 + $0x18] sm:$0xff] %vm53_vm1, %v2054_v2 }
  0x49   :  { %4043 = vst [vmem:[#allocation19_spill] sm:$0xff] %v2380_v16  ;;  %v240_v16 = vadd.f32 %v224_v53, %v175_v38  ;;  %v244_v38 = vadd.f32 %v228_v1, %v179_v8  ;;  %v2508_v53 = vld [vmem:[#allocation2 + $0x102] sm:$0xff]  ;;  %v283_v8 = vadd.f32 %v2369_v10, %v2382_v17 }
  0x4a   :  { %4044 = vst [vmem:[#allocation20_spill] sm:$0xff] %v2384_v18  ;;  %v180_v18 = vmul.f32 %v2240_v11, %v2420_v30 }
  0x4b   :  { %58 = vst.msk [vmem:[#allocation3 + $0x20] sm:$0xff] %vm53_vm1, %v2054_v2  ;;  %v289_v10 = vadd.f32 %v273_v55, %v240_v16  ;;  %v318_v16 = vmul.f32 %v2308_v46, %v2304_v44  ;;  %v326_v55 = vmul.f32 %v2308_v46, %v2420_v30 }
  0x4c   :  { %4045 = vst [vmem:[#allocation21_spill] sm:$0xff] %v2402_v23  ;;  %v239_v23 = vadd.f32 %v223_v34, %v174_v32  ;;  %v277_v32 = vmul.f32 %v2268_v26, %v2492_v49  ;;  %v243_v34 = vadd.f32 %v227_v6, %v178_v63  ;;  %v280_v63 = vmul.f32 %v2268_v26, %v2508_v53 }
  0x4d   :  { %4046 = vst [vmem:[#allocation22_spill] sm:$0xff] %v2404_v24  ;;  %v232_v24 = vmul.f32 %v2249_v15, %v2456_v39  ;;  %v276_v15 = vmul.f32 %v2268_v26, %v2490_v62 }
  0x4e   :  { %59 = vst.msk [vmem:[#allocation3 + $0x28] sm:$0xff] %vm53_vm1, %v2054_v2 }
  0x4f   :  { %4047 = vst [vmem:[#allocation23_spill] sm:$0xff] %v2426_v33  ;;  %v183_v33 = vmul.f32 %v2240_v11, %v2450_v56  ;;  %v275_v11 = vmul.f32 %v2268_v26, %v2488_v7 }
  0x50   :  { %60 = vst.msk [vmem:[#allocation3 + $0x30] sm:$0xff] %vm53_vm1, %v2054_v2 }
  0x51   :  { %4048 = vst [vmem:[#allocation24_spill] sm:$0xff] %v2440_v48  ;;  %v2496_v48 = vld [vmem:[#allocation2 + $0xe2] sm:$0xff]  ;;  %v248_v1 = vadd.f32 %v232_v24, %v183_v33  ;;  %v319_v33 = vmul.f32 %v2308_v46, %v2310_v47 }
  0x52   :  { %4049 = vst [vmem:[#allocation25_spill] sm:$0xff] %v2442_v50  ;;  %v242_v50 = vadd.f32 %v226_v9, %v177_v61  ;;  %v278_v9 = vmul.f32 %v2268_v26, %v2496_v48  ;;  %v279_v61 = vmul.f32 %v2268_v26, %v2498_v45  ;;  %v2539_v24 = vld [vmem:[#allocation2 + $0x80] sm:$0xff] }
  0x53   :  { %61 = vst.msk [vmem:[#allocation3 + $0x38] sm:$0xff] %vm53_vm1, %v2054_v2 }
  0x54   :  { %4050 = vst [vmem:[#allocation26_spill] sm:$0xff] %v2450_v56  ;;  %v291_v17 = vadd.f32 %v275_v11, %v242_v50  ;;  %v324_v50 = vmul.f32 %v2308_v46, %v2378_v14  ;;  %v327_v11 = vmul.f32 %v2308_v46, %v2422_v31 }
  0x55   :  { %4051 = vst [vmem:[#allocation27_spill] sm:$0xff] %v2456_v39  ;;  %v247_v39 = vadd.f32 %v231_v57, %v182_v58  ;;  %v796_v57 = vld [vmem:[%s3878_s1] sm:$0xff]  ;;  %v285_v58 = vadd.f32 %v2392_v20, %v2408_v27 }
  0x56   :  { %62 = vst.msk [vmem:[#allocation3 + $0x40] sm:$0xff] %vm53_vm1, %v2054_v2 }
  0x57   :  { %63 = vst.msk [vmem:[#allocation3 + $0x48] sm:$0xff] %vm53_vm1, %v2054_v2  ;;  %v296_v27 = vadd.f32 %v280_v63, %v247_v39  ;;  %v798_v39 = vld [vmem:[%s3878_s1 + $0x10] sm:$0xff]  ;;  %v334_v63 = vadd.f32 %v318_v16, %v285_v58 }
  0x58   :  { %64 = vst.msk [vmem:[#allocation3 + $0x50] sm:$0xff] %vm53_vm1, %v2054_v2 }
  0x59   :  { %4052 = vst [vmem:[#allocation28_spill] sm:$0xff] %v2488_v7  ;;  %v246_v7 = vadd.f32 %v230_v4, %v181_v59  ;;  %v286_v59 = vadd.f32 %v2412_v28, %v237_v35  ;;  %v288_v4 = vadd.f32 %v2432_v36, %v239_v23  ;;  %v317_v28 = vmul.f32 %v2308_v46, %v2297_v41 }
  0x5a   :  { %4053 = vst [vmem:[#allocation29_spill] sm:$0xff] %v2490_v62  ;;  %v245_v62 = vadd.f32 %v229_v0, %v180_v18  ;;  %v284_v0 = vadd.f32 %v2388_v19, %v2406_v25  ;;  %v292_v18 = vadd.f32 %v276_v15, %v243_v34  ;;  %v293_v19 = vadd.f32 %v277_v32, %v244_v38 }
  0x5b   :  { %4054 = vst [vmem:[#allocation30_spill] sm:$0xff] %v2492_v49  ;;  %v2516_v49 = vld [vmem:[#allocation2 + $0x112] sm:$0xff]  ;;  %v295_v20 = vadd.f32 %v279_v61, %v246_v7  ;;  %v320_v35 = vmul.f32 %v2308_v46, %v2339_v60  ;;  %v322_v7 = vmul.f32 %v2308_v46, %v2539_v24  ;;  %v323_v36 = vmul.f32 %v2308_v46, %v2376_v13 }
  0x5c   :  { %65 = vst.msk [vmem:[#allocation3 + $0x58] sm:$0xff] %vm53_vm1, %v2054_v2  ;;  %v281_v6 = vmul.f32 %v2268_v26, %v2516_v49  ;;  %v287_v26 = vadd.f32 %v2416_v29, %v238_v54  ;;  %v294_v25 = vadd.f32 %v278_v9, %v245_v62  ;;  %v2547_v29 = vld [vmem:[#allocation2 + $0x120] sm:$0xff]  ;;  %v321_v62 = vmul.f32 %v2308_v46, %v2357_v5  ;;  %v799_v13 = vld [vmem:[%s3878_s1 + $0x18] sm:$0xff] }
  0x5d   :  { %4055 = vst [vmem:[#allocation31_spill] sm:$0xff] %v2496_v48  ;;  %v325_v54 = vmul.f32 %v2308_v46, %v2400_v22  ;;  %v328_v15 = vmul.f32 %v2308_v46, %v2436_v37  ;;  %v329_v32 = vmul.f32 %v2308_v46, %v2450_v56  ;;  %v330_v34 = vmul.f32 %v2308_v46, %v2547_v29 }
  0x5e   :  { %4056 = vst [vmem:[#allocation32_spill] sm:$0xff] %v2498_v45  ;;  %v297_v23 = vadd.f32 %v281_v6, %v248_v1  ;;  %v331_v38 = vadd.f32 %v2372_v12, %v2317_v51  ;;  %v332_v9 = vadd.f32 %v2396_v21, %v283_v8  ;;  %v333_v61 = vadd.f32 %v317_v28, %v284_v0  ;;  %v801_v0 = vld [vmem:[%s3878_s1 + $0x28] sm:$0xff]  ;;  %v4064_v28 = vld [vmem:[#allocation17_spill] sm:$0xff] }
  0x5f   :  { %66 = vst.msk [vmem:[#allocation3 + $0x60] sm:$0xff] %vm53_vm1, %v2054_v2  ;;  %v335_v1 = vadd.f32 %v319_v33, %v286_v59  ;;  %v336_v6 = vadd.f32 %v320_v35, %v287_v26  ;;  %v339_v56 = vadd.f32 %v323_v36, %v2319_v52  ;;  %v340_v46 = vadd.f32 %v324_v50, %v291_v17  ;;  %v2599_v52 = vld [vmem:[#allocation2 + $0x81] sm:$0xff]  ;;  %v4061_v17 = vld [vmem:[#allocation8_spill] sm:$0xff] }
  0x60   :  { %4057 = vst [vmem:[#allocation33_spill] sm:$0xff] %v2508_v53  ;;  %v341_v51 = vadd.f32 %v325_v54, %v292_v18  ;;  %v342_v12 = vadd.f32 %v326_v55, %v293_v19  ;;  %v343_v21 = vadd.f32 %v327_v11, %v294_v25  ;;  %v344_v8 = vadd.f32 %v328_v15, %v295_v20  ;;  %v4062_v19 = vld [vmem:[#allocation9_spill] sm:$0xff]  ;;  %v4065_v33 = vld [vmem:[#allocation19_spill] sm:$0xff]  ;;  %v4068_v50 = vld [vmem:[#allocation22_spill] sm:$0xff] }
  0x61   :  { %67 = vst.msk [vmem:[#allocation3 + $0x68] sm:$0xff] %vm53_vm1, %v2054_v2  ;;  %v345_v58 = vadd.f32 %v329_v32, %v296_v27  ;;  %v346_v59 = vadd.f32 %v330_v34, %v297_v23  ;;  %v364_v26 = vmul.f32 %v2351_v3, %v2294_v40  ;;  %v367_v18 = vmul.f32 %v2351_v3, %v4061_v17  ;;  %v4063_v20 = vld [vmem:[#allocation13_spill] sm:$0xff]  ;;  %v2621_v36 = vld [vmem:[#allocation2 + $0x121] sm:$0xff]  ;;  %v4070_v15 = vld [vmem:[#allocation24_spill] sm:$0xff] }
  0x62   :  { %4058 = vst [vmem:[#allocation34_spill] sm:$0xff] %v2516_v49  ;;  %v368_v25 = vmul.f32 %v2351_v3, %v4062_v19  ;;  %v369_v27 = vmul.f32 %v2351_v3, %v4063_v20  ;;  %v802_v40 = vld [vmem:[%s3878_s1 + $0x30] sm:$0xff]  ;;  %v370_v23 = vmul.f32 %v2351_v3, %v4064_v28  ;;  %v371_v16 = vmul.f32 %v2351_v3, %v2599_v52  ;;  %v4069_v55 = vld [vmem:[#allocation23_spill] sm:$0xff] }
  0x63   :  { %68 = vst.msk [vmem:[#allocation3 + $0x70] sm:$0xff] %vm53_vm1, %v2054_v2  ;;  %v372_v35 = vmul.f32 %v2351_v3, %v4065_v33  ;;  %v374_v54 = vmul.f32 %v2351_v3, %v4068_v50  ;;  %v375_v11 = vmul.f32 %v2351_v3, %v4069_v55  ;;  %v4071_v32 = vld [vmem:[#allocation25_spill] sm:$0xff]  ;;  %v383_v28 = vadd.f32 %v367_v18, %v334_v63  ;;  %v805_v63 = vld [vmem:[%s3878_s1 + $0x48] sm:$0xff] }
  0x64   :  { %69 = vst.msk [vmem:[#allocation3 + $0x78] sm:$0xff] %vm53_vm1, %v2054_v2  ;;  %v797_v2 = vld [vmem:[%s3878_s1 + $0x8] sm:$0xff]  ;;  %v377_v34 = vmul.f32 %v2351_v3, %v4071_v32  ;;  %v384_v20 = vadd.f32 %v368_v25, %v335_v1  ;;  %v385_v55 = vadd.f32 %v369_v27, %v336_v6  ;;  %v804_v32 = vld [vmem:[%s3878_s1 + $0x40] sm:$0xff]  ;;  %v806_v25 = vld [vmem:[%s3878_s1 + $0x50] sm:$0xff] }
  0x65   :  { %812 = vst.msk [vmem:[#allocation2 + $0x11] sm:$0xff] %vm53_vm1, %v796_v57  ;;  %v800_v57 = vld [vmem:[%s3878_s1 + $0x20] sm:$0xff]  ;;  %v4081_v27 = vld [vmem:[#allocation20_spill] sm:$0xff] }
  0x66   :  { %813 = vst.msk [vmem:[#allocation2 + $0x21] sm:$0xff] %vm53_vm1, %v797_v2  ;;  %v337_v2 = vadd.f32 %v321_v62, %v288_v4  ;;  %v365_v4 = vmul.f32 %v2351_v3, %v2299_v42  ;;  %v4066_v62 = vld [vmem:[#allocation21_spill] sm:$0xff] }
  0x67   :  { %4059 = vst [vmem:[#allocation35_spill] sm:$0xff] %v2547_v29 }
  0x68   :  { %814 = vst.msk [vmem:[#allocation2 + $0x31] sm:$0xff] %vm53_vm1, %v798_v39  ;;  %v338_v39 = vadd.f32 %v322_v7, %v289_v10  ;;  %v366_v10 = vmul.f32 %v2351_v3, %v2301_v43  ;;  %v373_v7 = vmul.f32 %v2351_v3, %v4066_v62  ;;  %v380_v62 = vadd.f32 %v364_v26, %v331_v38  ;;  %v4074_v26 = vld [vmem:[#allocation10_spill] sm:$0xff] }
  0x69   :  { %815 = vst.msk [vmem:[#allocation2 + $0x41] sm:$0xff] %vm53_vm1, %v799_v13  ;;  %v376_v13 = vmul.f32 %v2351_v3, %v4070_v15  ;;  %v803_v15 = vld [vmem:[%s3878_s1 + $0x38] sm:$0xff]  ;;  %v386_v19 = vadd.f32 %v370_v23, %v337_v2  ;;  %v391_v38 = vadd.f32 %v375_v11, %v342_v12 }
  0x6a   :  { %816 = vst.msk [vmem:[#allocation2 + $0x51] sm:$0xff] %vm53_vm1, %v800_v57  ;;  %v2631_v57 = vld [vmem:[#allocation2 + $0x82] sm:$0xff]  ;;  %v382_v50 = vadd.f32 %v366_v10, %v333_v61  ;;  %v387_v29 = vadd.f32 %v371_v16, %v338_v39  ;;  %v389_v17 = vadd.f32 %v373_v7, %v340_v46  ;;  %v393_v61 = vadd.f32 %v377_v34, %v344_v8  ;;  %v4080_v10 = vld [vmem:[#allocation18_spill] sm:$0xff] }
  0x6b   :  { %817 = vst.msk [vmem:[#allocation2 + $0x61] sm:$0xff] %vm53_vm1, %v801_v0  ;;  %v4073_v0 = vld [vmem:[#allocation27_spill] sm:$0xff] }
  0x6c   :  { %4060 = vst [vmem:[#allocation36_spill] sm:$0xff] %v2599_v52  ;;  %v378_v33 = vmul.f32 %v2351_v3, %v4073_v0  ;;  %v381_v52 = vadd.f32 %v365_v4, %v332_v9  ;;  %v388_v0 = vadd.f32 %v372_v35, %v339_v56  ;;  %v392_v9 = vadd.f32 %v376_v13, %v343_v21  ;;  %v4075_v4 = vld [vmem:[#allocation16_spill] sm:$0xff]  ;;  %v4076_v39 = vld [vmem:[#allocation11_spill] sm:$0xff]  ;;  %v4078_v21 = vld [vmem:[#allocation14_spill] sm:$0xff] }
  0x6d   :  { %818 = vst.msk [vmem:[#allocation2 + $0x71] sm:$0xff] %vm53_vm1, %v802_v40  ;;  %v379_v40 = vmul.f32 %v2351_v3, %v2621_v36  ;;  %v390_v3 = vadd.f32 %v374_v54, %v341_v51  ;;  %v413_v2 = vmul.f32 %v4075_v4, %v4074_v26  ;;  %v414_v56 = vmul.f32 %v4075_v4, %v4076_v39  ;;  %v150_v46 = vld [vmem:[%s3879_s2 + $0x8] sm:$0x7]  ;;  %v4083_v54 = vld [vmem:[#allocation29_spill] sm:$0xff]  ;;  %v4084_v13 = vld [vmem:[#allocation30_spill] sm:$0xff] }
  0x6e   :  { %4067 = vst [vmem:[#allocation19_spill] sm:$0xff] %v2621_v36  ;;  %v394_v1 = vadd.f32 %v378_v33, %v345_v58  ;;  %v4077_v51 = vld [vmem:[#allocation12_spill] sm:$0xff]  ;;  %v416_v8 = vmul.f32 %v4075_v4, %v4078_v21  ;;  %v4079_v58 = vld [vmem:[#allocation15_spill] sm:$0xff]  ;;  %v418_v18 = vmul.f32 %v4075_v4, %v4080_v10  ;;  %v419_v23 = vmul.f32 %v4075_v4, %v4081_v27 }
  0x6f   :  { %4072 = vst [vmem:[#allocation37_spill] sm:$0xff] %v2631_v57  ;;  %v395_v6 = vadd.f32 %v379_v40, %v346_v59  ;;  %v415_v12 = vmul.f32 %v4075_v4, %v4077_v51  ;;  %v417_v59 = vmul.f32 %v4075_v4, %v4079_v58  ;;  %v420_v16 = vmul.f32 %v4075_v4, %v2631_v57  ;;  %v4082_v35 = vld [vmem:[#allocation28_spill] sm:$0xff] }
  0x70   :  { %819 = vst.msk [vmem:[#allocation2 + $0x81] sm:$0xff] %vm53_vm1, %v803_v15  ;;  %v421_v7 = vmul.f32 %v4075_v4, %v4082_v35  ;;  %v422_v11 = vmul.f32 %v4075_v4, %v4083_v54  ;;  %v2676_v15 = vld [vmem:[#allocation2 + $0x122] sm:$0xff]  ;;  %v424_v34 = vmul.f32 %v4075_v4, %v2496_v48  ;;  %v425_v33 = vmul.f32 %v4075_v4, %v2498_v45 }
  0x71   :  { %820 = vst.msk [vmem:[#allocation2 + $0xb1] sm:$0xff] %vm53_vm1, %v804_v32  ;;  %v423_v32 = vmul.f32 %v4075_v4, %v4084_v13  ;;  %v426_v40 = vmul.f32 %v4075_v4, %v2508_v53  ;;  %v427_v26 = vmul.f32 %v4075_v4, %v2516_v49  ;;  %v429_v35 = vadd.f32 %v413_v2, %v380_v62  ;;  %v808_v53 = vld [vmem:[%s3878_s1 + $0x60] sm:$0xff] }
  0x72   :  { %821 = vst.msk [vmem:[#allocation2 + $0xc1] sm:$0xff] %vm53_vm1, %v805_v63  ;;  %v807_v63 = vld [vmem:[%s3878_s1 + $0x58] sm:$0xff]  ;;  %v462_v13 = vperm.slane %v150_v46, 0  ;;  %v430_v48 = vadd.f32 %v414_v56, %v381_v52  ;;  %v431_v54 = vadd.f32 %v415_v12, %v382_v50  ;;  %v432_v45 = vadd.f32 %v416_v8, %v383_v28  ;;  %v809_v52 = vld [vmem:[%s3878_s1 + $0x68] sm:$0xff] }
  0x73   :  { %822 = vst.msk [vmem:[#allocation2 + $0xd1] sm:$0xff] %vm53_vm1, %v806_v25  ;;  %v428_v25 = vmul.f32 %v4075_v4, %v2676_v15  ;;  %v433_v36 = vadd.f32 %v417_v59, %v384_v20  ;;  %v434_v57 = vadd.f32 %v418_v18, %v385_v55  ;;  %v435_v27 = vadd.f32 %v419_v23, %v386_v19  ;;  %v453_v20 = vld [vmem:[#allocation2 + $0x90] sm:$0xff]  ;;  %v4085_v50 = vld [vmem:[#allocation7_spill] sm:$0xff] }
  0x74   :  { %823 = vst.msk [vmem:[#allocation2 + $0xe1] sm:$0xff] %vm53_vm1, %v807_v63  ;;  %v436_v10 = vadd.f32 %v420_v16, %v387_v29  ;;  %v437_v58 = vadd.f32 %v421_v7, %v388_v0  ;;  %v438_v49 = vadd.f32 %v422_v11, %v389_v17  ;;  %v439_v4 = vadd.f32 %v423_v32, %v390_v3  ;;  %v810_v0 = vld [vmem:[%s3878_s1 + $0x70] sm:$0xff]  ;;  %v4088_v16 = vld [vmem:[#allocation35_spill] sm:$0xff] }
  0x75   :  { %824 = vst.msk [vmem:[#allocation2 + $0xf1] sm:$0xff] %vm53_vm1, %v808_v53  ;;  %v440_v62 = vadd.f32 %v424_v34, %v391_v38  ;;  %v441_v2 = vadd.f32 %v425_v33, %v392_v9  ;;  %v442_v28 = vadd.f32 %v426_v40, %v393_v61  ;;  %v463_v56 = vmul.f32 %v462_v13, %v4085_v50  ;;  %v461_v61 = vld [vmem:[#allocation2 + $0x130] sm:$0xff] }
  0x76   :  { %v464_v12 = vmul.f32 %v462_v13, %v2297_v41  ;;  %v2703_v55 = vperm.slane %v150_v46, 1  ;;  %825 = vst.msk [vmem:[#allocation2 + $0x101] sm:$0xff] %vm53_vm1, %v809_v52  ;;  %v443_v29 = vadd.f32 %v427_v26, %v394_v1  ;;  %v444_v53 = vadd.f32 %v428_v25, %v395_v6  ;;  %v4086_v23 = vld [vmem:[#allocation8_spill] sm:$0xff]  ;;  %v4090_v33 = vld [vmem:[#allocation13_spill] sm:$0xff] }
  0x77   :  { %v465_v17 = vmul.f32 %v462_v13, %v2304_v44  ;;  %v2707_v19 = vperm.slane %v150_v46, 2  ;;  %v466_v3 = vmul.f32 %v462_v13, %v2310_v47  ;;  %v467_v38 = vmul.f32 %v462_v13, %v2339_v60  ;;  %826 = vst.msk [vmem:[#allocation2 + $0x111] sm:$0xff] %vm53_vm1, %v810_v0  ;;  %v4091_v50 = vld [vmem:[#allocation17_spill] sm:$0xff] }
  0x78   :  { %v468_v41 = vmul.f32 %v462_v13, %v2357_v5  ;;  %v469_v9 = vmul.f32 %v462_v13, %v2539_v24  ;;  %v470_v1 = vmul.f32 %v462_v13, %v453_v20  ;;  %v471_v44 = vmul.f32 %v462_v13, %v2378_v14  ;;  %v502_v20 = vld [vmem:[#allocation2 + $0x91] sm:$0xff] }
  0x79   :  { %v472_v6 = vmul.f32 %v462_v13, %v2400_v22  ;;  %v473_v46 = vmul.f32 %v462_v13, %v2420_v30  ;;  %v479_v8 = vadd.f32 %v463_v56, %v429_v35  ;;  %v480_v59 = vadd.f32 %v464_v12, %v430_v48  ;;  %v811_v22 = vld [vmem:[%s3878_s1 + $0x78] sm:$0xff] }
  0x7a   :  { %v512_v47 = vmul.f32 %v2703_v55, %v2299_v42  ;;  %v513_v60 = vmul.f32 %v2703_v55, %v2301_v43  ;;  %v474_v5 = vmul.f32 %v462_v13, %v2422_v31  ;;  %v475_v24 = vmul.f32 %v462_v13, %v2436_v37  ;;  %v4087_v30 = vld [vmem:[#allocation26_spill] sm:$0xff]  ;;  %827 = vst.msk [vmem:[#allocation2 + $0x121] sm:$0xff] %vm53_vm1, %v811_v22  ;;  %v4089_v37 = vld [vmem:[#allocation9_spill] sm:$0xff] }
  0x7b   :  { %v481_v18 = vadd.f32 %v465_v17, %v431_v54  ;;  %v514_v14 = vmul.f32 %v2703_v55, %v4086_v23  ;;  %v476_v48 = vmul.f32 %v462_v13, %v4087_v30  ;;  %v477_v7 = vmul.f32 %v462_v13, %v4088_v16  ;;  %v4092_v17 = vld [vmem:[#allocation15_spill] sm:$0xff]  ;;  %v4103_v22 = vld [vmem:[#allocation37_spill] sm:$0xff] }
  0x7c   :  { %v478_v42 = vmul.f32 %v462_v13, %v461_v61  ;;  %v482_v11 = vadd.f32 %v466_v3, %v432_v45  ;;  %v483_v43 = vadd.f32 %v467_v38, %v433_v36  ;;  %v484_v31 = vadd.f32 %v468_v41, %v434_v57  ;;  %v4093_v38 = vld [vmem:[#allocation36_spill] sm:$0xff]  ;;  %v4096_v61 = vld [vmem:[#allocation21_spill] sm:$0xff] }
  0x7d   :  { %v485_v32 = vadd.f32 %v469_v9, %v435_v27  ;;  %v515_v54 = vmul.f32 %v2703_v55, %v4089_v37  ;;  %v486_v34 = vadd.f32 %v470_v1, %v436_v10  ;;  %v516_v40 = vmul.f32 %v2703_v55, %v4090_v33 }
  0x7e   :  { %v528_v63 = vadd.f32 %v512_v47, %v479_v8  ;;  %v529_v26 = vadd.f32 %v513_v60, %v480_v59  ;;  %v530_v25 = vadd.f32 %v514_v14, %v481_v18  ;;  %v561_v35 = vmul.f32 %v2707_v19, %v4076_v39  ;;  %v4099_v59 = vld [vmem:[#allocation20_spill] sm:$0xff]  ;;  %v551_v14 = vld [vmem:[#allocation2 + $0x92] sm:$0xff] }
  0x7f   :  { %v562_v45 = vmul.f32 %v2707_v19, %v4077_v51  ;;  %v563_v36 = vmul.f32 %v2707_v19, %v4078_v21  ;;  %v487_v57 = vadd.f32 %v471_v44, %v437_v58  ;;  %v488_v27 = vadd.f32 %v472_v6, %v438_v49  ;;  %v4094_v21 = vld [vmem:[#allocation18_spill] sm:$0xff]  ;;  %v510_v44 = vld [vmem:[#allocation2 + $0x131] sm:$0xff]  ;;  %v4098_v6 = vld [vmem:[#allocation23_spill] sm:$0xff] }
  0x80   :  { %v489_v13 = vadd.f32 %v473_v46, %v439_v4  ;;  %v490_v52 = vadd.f32 %v474_v5, %v440_v62  ;;  %v491_v10 = vadd.f32 %v475_v24, %v441_v2  ;;  %v517_v56 = vmul.f32 %v2703_v55, %v4091_v50  ;;  %v4102_v24 = vld [vmem:[#allocation25_spill] sm:$0xff] }
  0x81   :  { %v531_v12 = vadd.f32 %v515_v54, %v482_v11  ;;  %v564_v0 = vmul.f32 %v2707_v19, %v4092_v17  ;;  %v492_v39 = vadd.f32 %v476_v48, %v442_v28  ;;  %v493_v3 = vadd.f32 %v477_v7, %v443_v29  ;;  %v4097_v29 = vld [vmem:[#allocation22_spill] sm:$0xff]  ;;  %v4105_v11 = vld [vmem:[#allocation27_spill] sm:$0xff]  ;;  %v4108_v50 = vld [vmem:[#allocation29_spill] sm:$0xff] }
  0x82   :  { %v518_v51 = vmul.f32 %v2703_v55, %v4093_v38  ;;  %v532_v41 = vadd.f32 %v516_v40, %v483_v43  ;;  %v565_v49 = vmul.f32 %v2707_v19, %v4094_v21  ;;  %v2752_v58 = vadd.f32 %v561_v35, %v528_v63 }
  0x83   :  { %v2754_v4 = vadd.f32 %v562_v45, %v529_v26  ;;  %v2756_v62 = vadd.f32 %v563_v36, %v530_v25  ;;  %v2758_v2 = vadd.f32 %v478_v42, %v444_v53  ;;  %v519_v9 = vmul.f32 %v2703_v55, %v502_v20  ;;  %v4101_v53 = vld [vmem:[#allocation24_spill] sm:$0xff] }
  0x84   :  { %v520_v28 = vmul.f32 %v2703_v55, %v4096_v61  ;;  %v521_v1 = vmul.f32 %v2703_v55, %v4097_v29  ;;  %v522_v46 = vmul.f32 %v2703_v55, %v4098_v6  ;;  %v533_v8 = vadd.f32 %v517_v56, %v484_v31  ;;  %v4106_v31 = vld [vmem:[#allocation19_spill] sm:$0xff] }
  0x85   :  { %4095 = vst [vmem:[#allocation10_spill] sm:$0xff] %v2756_v62  ;;  %v566_v47 = vmul.f32 %v2707_v19, %v4099_v59  ;;  %v2769_v60 = vadd.f32 %v564_v0, %v531_v12  ;;  %v523_v5 = vmul.f32 %v2703_v55, %v4101_v53  ;;  %v524_v18 = vmul.f32 %v2703_v55, %v4102_v24  ;;  %v4112_v61 = vld [vmem:[#allocation31_spill] sm:$0xff] }
  0x86   :  { %v534_v23 = vadd.f32 %v518_v51, %v485_v32  ;;  %v567_v30 = vmul.f32 %v2707_v19, %v4103_v22  ;;  %v2777_v48 = vadd.f32 %v565_v49, %v532_v41  ;;  %v593_v16 = vsel %vm53_vm1, %v2752_v58, 0.0  ;;  %v559_v22 = vld [vmem:[#allocation2 + $0x132] sm:$0xff] }
  0x87   :  { %4100 = vst [vmem:[#allocation16_spill] sm:$0xff] %v2769_v60  ;;  %v594_v7 = vsel %vm53_vm1, %v2754_v4, 0.0  ;;  %v596_v42 = vsel %vm53_vm1, %v2756_v62, 0.0  ;;  %v525_v43 = vmul.f32 %v2703_v55, %v4105_v11  ;;  %v526_v32 = vmul.f32 %v2703_v55, %v4106_v31 }
  0x88   :  { %4104 = vst [vmem:[#allocation11_spill] sm:$0xff] %v2777_v48  ;;  %v527_v37 = vmul.f32 %v2703_v55, %v510_v44  ;;  %v595_v54 = vadd.f32 %v594_v7, %v593_v16  ;;  %v535_v33 = vadd.f32 %v519_v9, %v486_v34  ;;  %v568_v40 = vmul.f32 %v2707_v19, %v551_v14 }
  0x89   :  { %v2791_v63 = vadd.f32 %v566_v47, %v533_v8  ;;  %v598_v26 = vsel %vm53_vm1, %v2769_v60, 0.0  ;;  %v536_v25 = vadd.f32 %v520_v28, %v487_v57  ;;  %v537_v35 = vadd.f32 %v521_v1, %v488_v27 }
  0x8a   :  { %v538_v45 = vadd.f32 %v522_v46, %v489_v13  ;;  %v597_v36 = vadd.f32 %v596_v42, %v595_v54  ;;  %v539_v20 = vadd.f32 %v523_v5, %v490_v52  ;;  %v569_v56 = vmul.f32 %v2707_v19, %v4108_v50  ;;  %v4110_v13 = vld [vmem:[#allocation30_spill] sm:$0xff]  ;;  %v4114_v46 = vld [vmem:[#allocation32_spill] sm:$0xff]  ;;  %v4116_v5 = vld [vmem:[#allocation33_spill] sm:$0xff] }
  0x8b   :  { %4107 = vst [vmem:[#allocation12_spill] sm:$0xff] %v2791_v63  ;;  %v2797_v12 = vadd.f32 %v567_v30, %v534_v23  ;;  %v600_v55 = vsel %vm53_vm1, %v2777_v48, 0.0  ;;  %v630_v17 = vmul.f32 %v2752_v58, %v2752_v58  ;;  %v631_v0 = vmul.f32 %v2754_v4, %v2754_v4  ;;  %v4117_v30 = vld [vmem:[#allocation34_spill] sm:$0xff] }
  0x8c   :  { %v599_v34 = vadd.f32 %v598_v26, %v597_v36  ;;  %v632_v57 = vmul.f32 %v2756_v62, %v2756_v62  ;;  %v540_v27 = vadd.f32 %v524_v18, %v491_v10  ;;  %v570_v52 = vmul.f32 %v2707_v19, %v4110_v13 }
  0x8d   :  { %4109 = vst [vmem:[#allocation14_spill] sm:$0xff] %v2797_v12  ;;  %v2809_v38 = vadd.f32 %v568_v40, %v535_v33  ;;  %v602_v51 = vsel %vm53_vm1, %v2791_v63, 0.0  ;;  %v541_v41 = vadd.f32 %v525_v43, %v492_v39  ;;  %v542_v21 = vadd.f32 %v526_v32, %v493_v3 }
  0x8e   :  { %v601_v49 = vadd.f32 %v600_v55, %v599_v34  ;;  %v633_v9 = vmul.f32 %v2769_v60, %v2769_v60  ;;  %v571_v28 = vmul.f32 %v2707_v19, %v4112_v61  ;;  %v2817_v29 = vadd.f32 %v569_v56, %v536_v25 }
  0x8f   :  { %4111 = vst [vmem:[#allocation28_spill] sm:$0xff] %v2809_v38  ;;  %v604_v10 = vsel %vm53_vm1, %v2797_v12, 0.0  ;;  %v634_v1 = vmul.f32 %v2777_v48, %v2777_v48  ;;  %v646_v6 = vsel %vm53_vm1, %v630_v17, 0.0  ;;  %v647_v39 = vsel %vm53_vm1, %v631_v0, 0.0  ;;  %v3026_v48 = vld [vmem:[#allocation2 + $0x101] sm:$0xff] }
  0x90   :  { %4113 = vst [vmem:[#allocation7_spill] sm:$0xff] %v2817_v29  ;;  %v603_v44 = vadd.f32 %v602_v51, %v601_v49  ;;  %v649_v3 = vsel %vm53_vm1, %v632_v57, 0.0  ;;  %v572_v8 = vmul.f32 %v2707_v19, %v4114_v46  ;;  %v2828_v59 = vadd.f32 %v570_v52, %v537_v35  ;;  %v2882_v49 = vld [vmem:[%s3880_s3] sm:$0x7] }
  0x91   :  { %v606_v47 = vsel %vm53_vm1, %v2809_v38, 0.0  ;;  %v648_v53 = vadd.f32 %v647_v39, %v646_v6  ;;  %v573_v24 = vmul.f32 %v2707_v19, %v4116_v5  ;;  %v635_v23 = vmul.f32 %v2791_v63, %v2791_v63  ;;  %v3024_v63 = vld [vmem:[#allocation2 + $0xf1] sm:$0xff]  ;;  %4145 = vst [vmem:[#allocation42_spill] sm:$0xff] %v3026_v48 }
  0x92   :  { %4115 = vst [vmem:[#allocation8_spill] sm:$0xff] %v2828_v59  ;;  %v605_v18 = vadd.f32 %v604_v10, %v603_v44  ;;  %v651_v14 = vsel %vm53_vm1, %v633_v9, 0.0  ;;  %v574_v16 = vmul.f32 %v2707_v19, %v4117_v30  ;;  %v2839_v7 = vadd.f32 %v571_v28, %v538_v45 }
  0x93   :  { %v608_v42 = vsel %vm53_vm1, %v2817_v29, 0.0  ;;  %v650_v11 = vadd.f32 %v649_v3, %v648_v53  ;;  %v543_v43 = vadd.f32 %v527_v37, %v2758_v2  ;;  %v636_v32 = vmul.f32 %v2797_v12, %v2797_v12  ;;  %4144 = vst [vmem:[#allocation41_spill] sm:$0xff] %v3024_v63 }
  0x94   :  { %4118 = vst [vmem:[#allocation26_spill] sm:$0xff] %v2839_v7  ;;  %v607_v31 = vadd.f32 %v606_v47, %v605_v18  ;;  %v653_v54 = vsel %vm53_vm1, %v634_v1, 0.0  ;;  %v575_v33 = vmul.f32 %v2707_v19, %v2676_v15  ;;  %v2849_v40 = vadd.f32 %v572_v8, %v539_v20  ;;  %v2901_v18 = vld [vmem:[#allocation2 + $0x10] sm:$0xff] }
  0x95   :  { %v610_v26 = vsel %vm53_vm1, %v2828_v59, 0.0  ;;  %v652_v25 = vadd.f32 %v651_v14, %v650_v11  ;;  %v576_v35 = vmul.f32 %v2707_v19, %v559_v22  ;;  %v637_v2 = vmul.f32 %v2809_v38, %v2809_v38  ;;  %v2911_v11 = vld [vmem:[#allocation2 + $0x40] sm:$0xff] }
  0x96   :  { %4119 = vst [vmem:[#allocation35_spill] sm:$0xff] %v2849_v40  ;;  %v609_v45 = vadd.f32 %v608_v42, %v607_v31  ;;  %v655_v37 = vsel %vm53_vm1, %v635_v23, 0.0  ;;  %v2857_v36 = vadd.f32 %v573_v24, %v540_v27  ;;  %v2859_v50 = vadd.f32 %v574_v16, %v541_v41  ;;  %v831_v24 = vld [vmem:[#allocation2] sm:$0xff]  ;;  %v2909_v42 = vld [vmem:[#allocation2 + $0x30] sm:$0xff] }
  0x97   :  { %v612_v15 = vsel %vm53_vm1, %v2839_v7, 0.0  ;;  %v654_v20 = vadd.f32 %v653_v54, %v652_v25  ;;  %v638_v55 = vmul.f32 %v2817_v29, %v2817_v29  ;;  %v657_v19 = vsel %vm53_vm1, %v636_v32, 0.0  ;;  %v2907_v16 = vld [vmem:[#allocation2 + $0x20] sm:$0xff]  ;;  %v2922_v25 = vld [vmem:[#allocation2 + $0x70] sm:$0xff] }
  0x98   :  { %4120 = vst [vmem:[#allocation9_spill] sm:$0xff] %v2857_v36  ;;  %v611_v56 = vadd.f32 %v610_v26, %v609_v45  ;;  %v2866_v34 = vadd.f32 %v575_v33, %v542_v21  ;;  %v614_v17 = vsel %vm53_vm1, %v2849_v40, 0.0  ;;  %v2870_v57 = vadd.f32 %v576_v35, %v543_v43  ;;  %v2918_v33 = vld [vmem:[#allocation2 + $0x50] sm:$0xff]  ;;  %v2920_v26 = vld [vmem:[#allocation2 + $0x60] sm:$0xff] }
  0x99   :  { %4121 = vst [vmem:[#allocation13_spill] sm:$0xff] %v2859_v50  ;;  %v656_v0 = vadd.f32 %v655_v37, %v654_v20  ;;  %v639_v13 = vmul.f32 %v2828_v59, %v2828_v59  ;;  %v659_v52 = vsel %vm53_vm1, %v637_v2, 0.0  ;;  %v616_v51 = vsel %vm53_vm1, %v2857_v36, 0.0  ;;  %v839_v2 = vld [vmem:[#allocation2 + $0xa0] sm:$0xff]  ;;  %v2927_v37 = vld [vmem:[#allocation2 + $0xb0] sm:$0xff] }
  0x9a   :  { %4122 = vst [vmem:[#allocation17_spill] sm:$0xff] %v2866_v34  ;;  %v613_v27 = vadd.f32 %v612_v15, %v611_v56  ;;  %v618_v41 = vsel %vm53_vm1, %v2859_v50, 0.0  ;;  %v640_v61 = vmul.f32 %v2839_v7, %v2839_v7  ;;  %v641_v28 = vmul.f32 %v2849_v40, %v2849_v40  ;;  %v3003_v59 = vld [vmem:[#allocation2 + $0x71] sm:$0xff]  ;;  %v3016_v38 = vld [vmem:[#allocation2 + $0xc1] sm:$0xff] }
  0x9b   :  { %4123 = vst [vmem:[#allocation15_spill] sm:$0xff] %v2870_v57  ;;  %v658_v21 = vadd.f32 %v657_v19, %v656_v0  ;;  %v661_v10 = vsel %vm53_vm1, %v638_v55, 0.0  ;;  %v642_v1 = vmul.f32 %v2857_v36, %v2857_v36  ;;  %v643_v44 = vmul.f32 %v2859_v50, %v2859_v50  ;;  %v2934_v55 = vld [vmem:[#allocation2 + $0xc0] sm:$0xff]  ;;  %v2936_v19 = vld [vmem:[#allocation2 + $0xd0] sm:$0xff] }
  0x9c   :  { %v615_v9 = vadd.f32 %v614_v17, %v613_v27  ;;  %v644_v6 = vmul.f32 %v2866_v34, %v2866_v34  ;;  %v645_v46 = vmul.f32 %v2870_v57, %v2870_v57  ;;  %v663_v8 = vsel %vm53_vm1, %v639_v13, 0.0  ;;  %4124 = vst [vmem:[#allocation36_spill] sm:$0xff] %v2927_v37  ;;  %v2938_v17 = vld [vmem:[#allocation2 + $0xe0] sm:$0xff]  ;;  %v3014_v36 = vld [vmem:[#allocation2 + $0xb1] sm:$0xff] }
  0x9d   :  { %v660_v39 = vadd.f32 %v659_v52, %v658_v21  ;;  %v847_v47 = vperm.slane %v2882_v49, 0  ;;  %v620_v53 = vsel %vm53_vm1, %v2866_v34, 0.0  ;;  %v622_v14 = vsel %vm53_vm1, %v2870_v57, 0.0  ;;  %4125 = vst [vmem:[#allocation18_spill] sm:$0xff] %v2934_v55  ;;  %v2953_v21 = vld [vmem:[#allocation2 + $0x110] sm:$0xff]  ;;  %v3001_v34 = vld [vmem:[#allocation2 + $0x61] sm:$0xff] }
  0x9e   :  { %v617_v3 = vadd.f32 %v616_v51, %v615_v9  ;;  %v665_v22 = vsel %vm53_vm1, %v640_v61, 0.0  ;;  %v667_v30 = vsel %vm53_vm1, %v641_v28, 0.0  ;;  %v669_v31 = vsel %vm53_vm1, %v642_v1, 0.0  ;;  %4126 = vst [vmem:[#allocation21_spill] sm:$0xff] %v2936_v19  ;;  %v2949_v51 = vld [vmem:[#allocation2 + $0xf0] sm:$0xff]  ;;  %v3022_v7 = vld [vmem:[#allocation2 + $0xe1] sm:$0xff] }
  0x9f   :  { %v662_v5 = vadd.f32 %v661_v10, %v660_v39  ;;  %v671_v32 = vsel %vm53_vm1, %v643_v44, 0.0  ;;  %v2916_v54 = vsel %vm53_vm1, %v644_v6, 0.0  ;;  %v2925_v45 = vsel %vm53_vm1, %v645_v46, 0.0  ;;  %4127 = vst [vmem:[#allocation22_spill] sm:$0xff] %v2938_v17  ;;  %v2967_v1 = vld [vmem:[%s3880_s3 + $0x4] sm:$0x7] }
  0xa0   :  { %v619_v23 = vadd.f32 %v618_v41, %v617_v3  ;;  %v2929_v15 = vmul.f32 %v847_v47, %v831_v24  ;;  %v2932_v20 = vmul.f32 %v847_v47, %v2901_v18  ;;  %v2941_v0 = vmul.f32 %v847_v47, %v2907_v16  ;;  %4128 = vst [vmem:[#allocation23_spill] sm:$0xff] %v2949_v51  ;;  %v2951_v41 = vld [vmem:[#allocation2 + $0x100] sm:$0xff]  ;;  %v2982_v24 = vld [vmem:[#allocation2 + $0x11] sm:$0xff] }
  0xa1   :  { %v664_v43 = vadd.f32 %v663_v8, %v662_v5  ;;  %v2944_v27 = vmul.f32 %v847_v47, %v2909_v42  ;;  %v2947_v13 = vmul.f32 %v847_v47, %v2911_v11  ;;  %4129 = vst [vmem:[#allocation20_spill] sm:$0xff] %v2951_v41  ;;  %v2956_v9 = vmul.f32 %v847_v47, %v2918_v33  ;;  %v880_v5 = vld [vmem:[#allocation2 + $0x1] sm:$0xff] }
  0xa2   :  { %v621_v35 = vadd.f32 %v620_v53, %v619_v23  ;;  %4130 = vst [vmem:[#allocation24_spill] sm:$0xff] %v2953_v21  ;;  %v2959_v61 = vmul.f32 %v847_v47, %v2920_v26  ;;  %v2962_v28 = vmul.f32 %v847_v47, %v2922_v25  ;;  %v856_v44 = vmul.f32 %v847_v47, %v839_v2  ;;  %v2984_v23 = vld [vmem:[#allocation2 + $0x21] sm:$0xff] }
  0xa3   :  { %v666_v56 = vadd.f32 %v665_v22, %v664_v43  ;;  %4131 = vst [vmem:[#allocation25_spill] sm:$0xff] %v2967_v1  ;;  %v2970_v6 = vmul.f32 %v847_v47, %v2927_v37  ;;  %v896_v39 = vperm.slane %v2882_v49, 1  ;;  %v2974_v46 = vmul.f32 %v847_v47, %v2934_v55  ;;  %v2997_v2 = vld [vmem:[#allocation2 + $0x41] sm:$0xff] }
  0xa4   :  { %v623_v52 = vadd.f32 %v622_v14, %v621_v35  ;;  %v2977_v8 = vmul.f32 %v847_v47, %v2936_v19  ;;  %v2980_v53 = vmul.f32 %v847_v47, %v2938_v17  ;;  %4132 = vst [vmem:[#allocation37_spill] sm:$0xff] %v2982_v24  ;;  %v2987_v22 = vmul.f32 %v847_v47, %v2949_v51  ;;  %v2995_v35 = vld [vmem:[#allocation2 + $0x31] sm:$0xff] }
  0xa5   :  { %v668_v10 = vadd.f32 %v667_v30, %v666_v56  ;;  %4133 = vst [vmem:[#allocation27_spill] sm:$0xff] %v2984_v23  ;;  %v2990_v30 = vmul.f32 %v847_v47, %v2951_v41  ;;  %v2993_v43 = vmul.f32 %v847_v47, %v2953_v21  ;;  %v2999_v56 = vld [vmem:[#allocation2 + $0x51] sm:$0xff]  ;;  %v3009_v29 = vperm.slane %v2967_v1, 0 }
  0xa6   :  { %v624_v3 = vrot.slane %v623_v52, 4  ;;  %4134 = vst [vmem:[#allocation19_spill] sm:$0xff] %v2995_v35  ;;  %v3012_v47 = vperm.slane %v2967_v1, 1  ;;  %v898_v12 = vmul.f32 %v896_v39, %v2982_v24  ;;  %v899_v40 = vmul.f32 %v896_v39, %v2984_v23 }
  0xa7   :  { %v670_v14 = vadd.f32 %v669_v31, %v668_v10  ;;  %4135 = vst [vmem:[#allocation29_spill] sm:$0xff] %v2997_v2  ;;  %v888_v31 = vld [vmem:[#allocation2 + $0xa1] sm:$0xff]  ;;  %v3006_v10 = vperm.slane %v2882_v49, 2  ;;  %v902_v60 = vmul.f32 %v896_v39, %v2999_v56  ;;  %v903_v1 = vmul.f32 %v896_v39, %v3001_v34 }
  0xa8   :  { %4136 = vst [vmem:[#allocation30_spill] sm:$0xff] %v2999_v56  ;;  %v625_v57 = vadd.f32 %v624_v3, %v623_v52  ;;  %v3018_v52 = vld [vmem:[#allocation2 + $0xd1] sm:$0xff]  ;;  %v897_v3 = vmul.f32 %v896_v39, %v880_v5  ;;  %v904_v23 = vmul.f32 %v896_v39, %v3003_v59  ;;  %v906_v21 = vmul.f32 %v896_v39, %v3014_v36 }
  0xa9   :  { %4137 = vst [vmem:[#allocation31_spill] sm:$0xff] %v3001_v34  ;;  %v672_v50 = vadd.f32 %v671_v32, %v670_v14  ;;  %v900_v32 = vmul.f32 %v896_v39, %v2995_v35  ;;  %v901_v14 = vmul.f32 %v896_v39, %v2997_v2  ;;  %v3032_v5 = vld [vmem:[#allocation2 + $0x111] sm:$0xff]  ;;  %v907_v41 = vmul.f32 %v896_v39, %v3016_v38 }
  0xaa   :  { %4138 = vst [vmem:[#allocation32_spill] sm:$0xff] %v3003_v59  ;;  %v626_v49 = vrot.slane %v625_v57, 2  ;;  %v908_v35 = vmul.f32 %v896_v39, %v3018_v52  ;;  %v909_v56 = vmul.f32 %v896_v39, %v3022_v7  ;;  %v912_v34 = vmul.f32 %v896_v39, %v3032_v5 }
  0xab   :  { %4139 = vst [vmem:[#allocation33_spill] sm:$0xff] %v3012_v47  ;;  %v674_v62 = vadd.f32 %v2916_v54, %v672_v50  ;;  %v905_v47 = vmul.f32 %v896_v39, %v888_v31  ;;  %v910_v50 = vmul.f32 %v896_v39, %v3024_v63  ;;  %v911_v54 = vmul.f32 %v896_v39, %v3026_v48  ;;  %v3052_v39 = vld [vmem:[#allocation2 + $0x12] sm:$0xff] }
  0xac   :  { %4140 = vst [vmem:[#allocation34_spill] sm:$0xff] %v3014_v36  ;;  %v627_v24 = vadd.f32 %v626_v49, %v625_v57  ;;  %v913_v31 = vadd.f32 %v897_v3, %v2929_v15  ;;  %v914_v57 = vadd.f32 %v898_v12, %v2932_v20  ;;  %v919_v63 = vadd.f32 %v903_v1, %v2959_v61  ;;  %v929_v36 = vld [vmem:[#allocation2 + $0x2] sm:$0xff]  ;;  %v3098_v3 = vld [vmem:[#allocation2 + $0x112] sm:$0xff] }
  0xad   :  { %4141 = vst [vmem:[#allocation38_spill] sm:$0xff] %v3016_v38  ;;  %v676_v2 = vadd.f32 %v2925_v45, %v674_v62  ;;  %v915_v38 = vadd.f32 %v899_v40, %v2941_v0  ;;  %v917_v62 = vadd.f32 %v901_v14, %v2947_v13  ;;  %v918_v45 = vadd.f32 %v902_v60, %v2956_v9  ;;  %v3054_v15 = vld [vmem:[#allocation2 + $0x22] sm:$0xff]  ;;  %v3062_v60 = vld [vmem:[#allocation2 + $0x52] sm:$0xff] }
  0xae   :  { %4142 = vst [vmem:[#allocation39_spill] sm:$0xff] %v3018_v52  ;;  %v628_v51 = vrot.slane %v627_v24, 1  ;;  %v916_v52 = vadd.f32 %v900_v32, %v2944_v27  ;;  %v920_v48 = vadd.f32 %v904_v23, %v2962_v28  ;;  %v922_v40 = vadd.f32 %v906_v21, %v2970_v6  ;;  %v3058_v27 = vld [vmem:[#allocation2 + $0x32] sm:$0xff]  ;;  %v3060_v13 = vld [vmem:[#allocation2 + $0x42] sm:$0xff] }
  0xaf   :  { %4143 = vst [vmem:[#allocation40_spill] sm:$0xff] %v3022_v7  ;;  %v677_v49 = vrot.slane %v676_v2, 4  ;;  %v921_v7 = vadd.f32 %v905_v47, %v856_v44  ;;  %v923_v0 = vadd.f32 %v907_v41, %v2974_v46  ;;  %v924_v9 = vadd.f32 %v908_v35, %v2977_v8  ;;  %v3070_v44 = vld [vmem:[#allocation2 + $0x72] sm:$0xff]  ;;  %v937_v21 = vld [vmem:[#allocation2 + $0xa2] sm:$0xff] }
  0xb0   :  { %4146 = vst [vmem:[#allocation43_spill] sm:$0xff] %v3032_v5  ;;  %v629_v12 = vadd.f32 %v628_v51, %v627_v24  ;;  %v925_v61 = vadd.f32 %v909_v56, %v2980_v53  ;;  %v926_v28 = vadd.f32 %v910_v50, %v2987_v22  ;;  %v927_v1 = vadd.f32 %v911_v54, %v2990_v30  ;;  %v3068_v51 = vld [vmem:[#allocation2 + $0x62] sm:$0xff]  ;;  %v3073_v46 = vld [vmem:[#allocation2 + $0xb2] sm:$0xff] }
  0xb1   :  { %4147 = vst [vmem:[#allocation44_spill] sm:$0xff] %v3052_v39  ;;  %v678_v20 = vadd.f32 %v677_v49, %v676_v2  ;;  %v928_v6 = vadd.f32 %v912_v34, %v2993_v43  ;;  %v3075_v24 = vld [vmem:[#allocation2 + $0xc2] sm:$0xff]  ;;  %v3077_v23 = vld [vmem:[#allocation2 + $0xd2] sm:$0xff]  ;;  %v946_v8 = vmul.f32 %v3006_v10, %v929_v36  ;;  %v947_v53 = vmul.f32 %v3006_v10, %v3052_v39 }
  0xb2   :  { %4148 = vst [vmem:[#allocation45_spill] sm:$0xff] %v3054_v15  ;;  %v3082_v22 = vld [vmem:[#allocation2 + $0xe2] sm:$0xff]  ;;  %v3084_v30 = vld [vmem:[#allocation2 + $0xf2] sm:$0xff]  ;;  %v948_v34 = vmul.f32 %v3006_v10, %v3054_v15  ;;  %v949_v43 = vmul.f32 %v3006_v10, %v3058_v27  ;;  %v950_v2 = vmul.f32 %v3006_v10, %v3060_v13  ;;  %v951_v36 = vmul.f32 %v3006_v10, %v3062_v60 }
  0xb3   :  { %4149 = vst [vmem:[#allocation46_spill] sm:$0xff] %v3058_v27  ;;  %v679_v41 = vrot.slane %v678_v20, 2  ;;  %v3086_v35 = vld [vmem:[#allocation2 + $0x102] sm:$0xff]  ;;  %v3096_v47 = vmul.f32 0.0078125, %v629_v12  ;;  %v952_v32 = vmul.f32 %v3006_v10, %v3068_v51  ;;  %v953_v14 = vmul.f32 %v3006_v10, %v3070_v44 }
  0xb4   :  { %4150 = vst [vmem:[#allocation47_spill] sm:$0xff] %v3060_v13  ;;  %v954_v50 = vmul.f32 %v3006_v10, %v937_v21  ;;  %v955_v54 = vmul.f32 %v3006_v10, %v3073_v46  ;;  %v956_v49 = vmul.f32 %v3006_v10, %v3075_v24  ;;  %v957_v12 = vmul.f32 %v3006_v10, %v3077_v23 }
  0xb5   :  { %4151 = vst [vmem:[#allocation48_spill] sm:$0xff] %v3062_v60  ;;  %v680_v56 = vadd.f32 %v679_v41, %v678_v20  ;;  %v958_v41 = vmul.f32 %v3006_v10, %v3082_v22  ;;  %v961_v21 = vmul.f32 %v3006_v10, %v3098_v3  ;;  %v963_v60 = vadd.f32 %v947_v53, %v914_v57  ;;  %v3121_v57 = vld [vmem:[#allocation2 + $0x80] sm:$0xff] }
  0xb6   :  { %4152 = vst [vmem:[#allocation49_spill] sm:$0xff] %v3068_v51  ;;  %v959_v51 = vmul.f32 %v3006_v10, %v3084_v30  ;;  %v964_v13 = vadd.f32 %v948_v34, %v915_v38  ;;  %v965_v27 = vadd.f32 %v949_v43, %v916_v52  ;;  %v966_v15 = vadd.f32 %v950_v2, %v917_v62  ;;  %v4166_v34 = vld [vmem:[#allocation22_spill] sm:$0xff]  ;;  %v4167_v2 = vld [vmem:[#allocation23_spill] sm:$0xff] }
  0xb7   :  { %4153 = vst [vmem:[#allocation50_spill] sm:$0xff] %v3070_v44  ;;  %v681_v20 = vrot.slane %v680_v56, 1  ;;  %v960_v44 = vmul.f32 %v3006_v10, %v3086_v35  ;;  %v967_v39 = vadd.f32 %v951_v36, %v918_v45  ;;  %v969_v5 = vadd.f32 %v953_v14, %v920_v48  ;;  %v4169_v14 = vld [vmem:[#allocation24_spill] sm:$0xff] }
  0xb8   :  { %4154 = vst [vmem:[#allocation51_spill] sm:$0xff] %v3073_v46  ;;  %v962_v46 = vadd.f32 %v946_v8, %v913_v31  ;;  %v970_v59 = vadd.f32 %v954_v50, %v921_v7  ;;  %v971_v17 = vadd.f32 %v955_v54, %v922_v40  ;;  %v972_v19 = vadd.f32 %v956_v49, %v923_v0 }
  0xb9   :  { %4155 = vst [vmem:[#allocation52_spill] sm:$0xff] %v3075_v24  ;;  %v682_v24 = vadd.f32 %v681_v20, %v680_v56  ;;  %v974_v55 = vadd.f32 %v958_v41, %v925_v61  ;;  %v975_v37 = vadd.f32 %v959_v51, %v926_v28  ;;  %v976_v10 = vadd.f32 %v960_v44, %v927_v1  ;;  %v3144_v61 = vld [vmem:[#allocation2 + $0x120] sm:$0xff]  ;;  %v4163_v51 = vld [vmem:[#allocation36_spill] sm:$0xff] }
  0xba   :  { %4156 = vst [vmem:[#allocation53_spill] sm:$0xff] %v3077_v23  ;;  %v685_v23 = vmul.f32 %v3096_v47, %v3096_v47  ;;  %v977_v31 = vadd.f32 %v961_v21, %v928_v6  ;;  %v995_v8 = vmul.f32 %v3009_v29, %v2901_v18  ;;  %v996_v52 = vmul.f32 %v3009_v29, %v2907_v16  ;;  %v4164_v6 = vld [vmem:[#allocation18_spill] sm:$0xff]  ;;  %v4168_v56 = vld [vmem:[#allocation20_spill] sm:$0xff] }
  0xbb   :  { %4157 = vst [vmem:[#allocation54_spill] sm:$0xff] %v3082_v22  ;;  %v968_v22 = vadd.f32 %v952_v32, %v919_v63  ;;  %v997_v48 = vmul.f32 %v3009_v29, %v2909_v42  ;;  %v998_v63 = vmul.f32 %v3009_v29, %v2911_v11  ;;  %v999_v7 = vmul.f32 %v3009_v29, %v2918_v33 }
  0xbc   :  { %4158 = vst [vmem:[#allocation55_spill] sm:$0xff] %v3084_v30  ;;  %v684_v30 = vmul.f32 0.0078125, %v682_v24  ;;  %v1000_v62 = vmul.f32 %v3009_v29, %v2920_v26  ;;  %v1001_v45 = vmul.f32 %v3009_v29, %v2922_v25  ;;  %v1002_v28 = vmul.f32 %v3009_v29, %v3121_v57 }
  0xbd   :  { %4159 = vst [vmem:[#allocation56_spill] sm:$0xff] %v3086_v35  ;;  %v973_v35 = vadd.f32 %v957_v12, %v924_v9  ;;  %v1474_v9 = vld [vmem:[%s3882_s5] sm:$0x3]  ;;  %v1003_v44 = vmul.f32 %v3009_v29, %v4163_v51  ;;  %v1004_v24 = vmul.f32 %v3009_v29, %v4164_v6  ;;  %v1006_v43 = vmul.f32 %v3009_v29, %v4166_v34 }
  0xbe   :  { %4160 = vst [vmem:[#allocation57_spill] sm:$0xff] %v3096_v47  ;;  %v686_v38 = vsub.f32 %v684_v30, %v685_v23  ;;  %v1501_v1 = vsel %vm1499_vm0, %v1474_v9, 0  ;;  %v4165_v23 = vld [vmem:[#allocation21_spill] sm:$0xff]  ;;  %v1007_v36 = vmul.f32 %v3009_v29, %v4167_v2  ;;  %v1008_v32 = vmul.f32 %v3009_v29, %v4168_v56  ;;  %v3168_v2 = vld [vmem:[#allocation2 + $0x81] sm:$0xff] }
  0xbf   :  { %4161 = vst [vmem:[#allocation58_spill] sm:$0xff] %v3098_v3  ;;  %v1005_v53 = vmul.f32 %v3009_v29, %v4165_v23  ;;  %1510 = vmatpush.bf16.msra.mxu0 %v1501_v1  ;;  %2008 = vmatpush.bf16.msra.mxu3 %v1501_v1  ;;  %v1009_v50 = vmul.f32 %v3009_v29, %v4169_v14 }
  0xc0   :  { %v687_v40 = vmax.f32 %v686_v38, 0.0  ;;  %4162 = vst [vmem:[#allocation59_spill] sm:$0xff] %v3144_v61  ;;  %v1010_v54 = vmul.f32 %v3009_v29, %v3144_v61  ;;  %v1011_v49 = vadd.f32 %v995_v8, %v962_v46  ;;  %v1012_v12 = vadd.f32 %v996_v52, %v963_v60  ;;  %v4171_v46 = vld [vmem:[#allocation37_spill] sm:$0xff]  ;;  %v3172_v52 = vld [vmem:[#allocation2 + $0x121] sm:$0xff] }
  0xc1   :  { %v1013_v20 = vadd.f32 %v997_v48, %v964_v13  ;;  %v1014_v41 = vadd.f32 %v998_v63, %v965_v27  ;;  %v1015_v21 = vadd.f32 %v999_v7, %v966_v15  ;;  %v1016_v38 = vadd.f32 %v1000_v62, %v967_v39  ;;  %4170 = vst [vmem:[#allocation36_spill] sm:$0xff] %v3168_v2  ;;  %v4172_v60 = vld [vmem:[#allocation33_spill] sm:$0xff]  ;;  %v4174_v27 = vld [vmem:[#allocation27_spill] sm:$0xff]  ;;  %v4181_v7 = vld [vmem:[#allocation38_spill] sm:$0xff] }
  0xc2   :  { %v3155_v30 = vadd.f32 1e-05, %v687_v40  ;;  %v1017_v40 = vadd.f32 %v1001_v45, %v968_v22  ;;  %v1018_v9 = vadd.f32 %v1002_v28, %v969_v5  ;;  %v1019_v51 = vadd.f32 %v1003_v44, %v970_v59  ;;  %4173 = vst [vmem:[#allocation37_spill] sm:$0xff] %v3172_v52  ;;  %v4175_v15 = vld [vmem:[#allocation19_spill] sm:$0xff]  ;;  %v4179_v22 = vld [vmem:[#allocation32_spill] sm:$0xff] }
  0xc3   :  { %v1020_v0 = vadd.f32 %v1004_v24, %v971_v17  ;;  %v1021_v18 = vadd.f32 %v1005_v53, %v972_v19  ;;  %v1022_v1 = vadd.f32 %v1006_v43, %v973_v35  ;;  %v1023_v56 = vadd.f32 %v1007_v36, %v974_v55  ;;  %v4176_v17 = vld [vmem:[#allocation29_spill] sm:$0xff]  ;;  %v4177_v55 = vld [vmem:[#allocation30_spill] sm:$0xff]  ;;  %v4182_v45 = vld [vmem:[#allocation39_spill] sm:$0xff] }
  0xc4   :  { %2020 = vrsqrt.f32 %v3155_v30  ;;  %v1024_v14 = vadd.f32 %v1008_v32, %v975_v37  ;;  %v1025_v34 = vadd.f32 %v1009_v50, %v976_v10  ;;  %v1026_v29 = vadd.f32 %v1010_v54, %v977_v31  ;;  %v4178_v37 = vld [vmem:[#allocation31_spill] sm:$0xff]  ;;  %v4180_v31 = vld [vmem:[#allocation34_spill] sm:$0xff]  ;;  %v4183_v44 = vld [vmem:[#allocation40_spill] sm:$0xff] }
  0xc5   :  { %v1044_v8 = vmul.f32 %v4172_v60, %v4171_v46  ;;  %v1045_v39 = vmul.f32 %v4172_v60, %v4174_v27  ;;  %v1046_v59 = vmul.f32 %v4172_v60, %v4175_v15  ;;  %v1047_v19 = vmul.f32 %v4172_v60, %v4176_v17  ;;  %v4184_v53 = vld [vmem:[#allocation41_spill] sm:$0xff]  ;;  %v4185_v32 = vld [vmem:[#allocation42_spill] sm:$0xff]  ;;  %v4186_v54 = vld [vmem:[#allocation43_spill] sm:$0xff] }
  0xc6   :  { %v1048_v5 = vmul.f32 %v4172_v60, %v4177_v55  ;;  %v1049_v13 = vmul.f32 %v4172_v60, %v4178_v37  ;;  %v1050_v35 = vmul.f32 %v4172_v60, %v4179_v22  ;;  %v1051_v10 = vmul.f32 %v4172_v60, %v3168_v2 }
  0xc7   :  { %v1052_v48 = vmul.f32 %v4172_v60, %v4180_v31  ;;  %v1053_v62 = vmul.f32 %v4172_v60, %v4181_v7  ;;  %v1054_v28 = vmul.f32 %v4172_v60, %v4182_v45  ;;  %v1055_v24 = vmul.f32 %v4172_v60, %v4183_v44 }
  0xc8   :  { %v1056_v43 = vmul.f32 %v4172_v60, %v4184_v53  ;;  %v1057_v50 = vmul.f32 %v4172_v60, %v4185_v32  ;;  %v1058_v46 = vmul.f32 %v4172_v60, %v4186_v54  ;;  %v1059_v31 = vmul.f32 %v4172_v60, %v3172_v52  ;;  %v830_v32 = vld [vmem:[%s3880_s3 + $0x8] sm:$0x7]  ;;  %v4187_v54 = vld [vmem:[#allocation25_spill] sm:$0xff] }
  0xc9   :  { %v1060_v7 = vadd.f32 %v1044_v8, %v1011_v49  ;;  %v1061_v2 = vadd.f32 %v1045_v39, %v1012_v12  ;;  %v1062_v45 = vadd.f32 %v1046_v59, %v1013_v20  ;;  %v1063_v22 = vadd.f32 %v1047_v19, %v1014_v41  ;;  %v3210_v8 = vld [vmem:[#allocation2 + $0x82] sm:$0xff]  ;;  %v4190_v19 = vld [vmem:[#allocation45_spill] sm:$0xff] }
  0xca   :  { %v2021_v63 = vpop.eup %2020  ;;  %v1064_v44 = vadd.f32 %v1048_v5, %v1015_v21  ;;  %v1065_v55 = vadd.f32 %v1049_v13, %v1016_v38  ;;  %v1066_v61 = vadd.f32 %v1050_v35, %v1017_v40  ;;  %vm711_vm4 = vweird.f32 %v3155_v30  ;;  %4188 = vst [vmem:[#allocation33_spill] sm:$0xff] %v3210_v8  ;;  %v3231_v35 = vld [vmem:[#allocation2 + $0x122] sm:$0xff] }
  0xcb   :  { %v706_v36 = vmul.f32 %v2021_v63, %v3155_v30  ;;  %v1067_v53 = vadd.f32 %v1051_v10, %v1018_v9  ;;  %v1068_v17 = vadd.f32 %v1052_v48, %v1019_v51  ;;  %v1092_v23 = vperm.slane %v4187_v54, 2  ;;  %v4189_v9 = vld [vmem:[#allocation44_spill] sm:$0xff]  ;;  %v3229_v30 = vld [vmem:[%s3883_s6] ss:$0 sm:$0xff] }
  0xcc   :  { %vm712_vm5 = vweird.f32 %v2021_v63  ;;  %v1069_v49 = vadd.f32 %v1053_v62, %v1020_v0  ;;  %v1070_v12 = vadd.f32 %v1054_v28, %v1021_v18  ;;  %v1071_v20 = vadd.f32 %v1055_v24, %v1022_v1  ;;  %v4191_v18 = vld [vmem:[#allocation46_spill] sm:$0xff]  ;;  %v4197_v28 = vld [vmem:[#allocation51_spill] sm:$0xff] }
  0xcd   :  { %v707_v37 = vmul.f32 %v2021_v63, %v706_v36  ;;  %v1072_v41 = vadd.f32 %v1056_v43, %v1023_v56  ;;  %v1073_v60 = vadd.f32 %v1057_v50, %v1024_v14  ;;  %v1074_v21 = vadd.f32 %v1058_v46, %v1025_v34  ;;  %vm713_vm6 = vmor %vm711_vm4, %vm712_vm5  ;;  %v4196_v10 = vld [vmem:[#allocation50_spill] sm:$0xff]  ;;  %v4198_v43 = vld [vmem:[#allocation52_spill] sm:$0xff] }
  0xce   :  { %v1075_v40 = vadd.f32 %v1059_v31, %v1026_v29  ;;  %v3212_v39 = vperm.slane %v830_v32, 0  ;;  %v3214_v59 = vperm.slane %v830_v32, 1  ;;  %v1093_v51 = vmul.f32 %v1092_v23, %v4189_v9  ;;  %v4194_v29 = vld [vmem:[#allocation48_spill] sm:$0xff]  ;;  %v4200_v50 = vld [vmem:[#allocation53_spill] sm:$0xff]  ;;  %v4201_v46 = vld [vmem:[#allocation54_spill] sm:$0xff] }
  0xcf   :  { %v708_v6 = vmul.f32 0.5, %v707_v37  ;;  %v1094_v0 = vmul.f32 %v1092_v23, %v4190_v19  ;;  %v1095_v1 = vmul.f32 %v1092_v23, %v4191_v18  ;;  %v3221_v56 = vperm.slane %v830_v32, 2  ;;  %v4195_v37 = vld [vmem:[#allocation49_spill] sm:$0xff] }
  0xd0   :  { %v1097_v5 = vmul.f32 %v1092_v23, %v4194_v29  ;;  %v1098_v13 = vmul.f32 %v1092_v23, %v4195_v37  ;;  %v1099_v48 = vmul.f32 %v1092_v23, %v4196_v10  ;;  %v1100_v62 = vmul.f32 %v1092_v23, %v3210_v8 }
  0xd1   :  { %v709_v38 = vsub.f32 1.5, %v708_v6  ;;  %4192 = vst [vmem:[#allocation27_spill] sm:$0xff] %v3221_v56  ;;  %v4193_v6 = vld [vmem:[#allocation47_spill] sm:$0xff]  ;;  %v1101_v24 = vmul.f32 %v1092_v23, %v4197_v28  ;;  %v1102_v36 = vmul.f32 %v1092_v23, %v4198_v43  ;;  %v1103_v54 = vmul.f32 %v1092_v23, %v4200_v50 }
  0xd2   :  { %v1096_v14 = vmul.f32 %v1092_v23, %v4193_v6  ;;  %v1104_v31 = vmul.f32 %v1092_v23, %v4201_v46  ;;  %v4203_v52 = vsub.f32 %v2752_v58, %v3096_v47  ;;  %v4204_v8 = vsub.f32 %v2754_v4, %v3096_v47 }
  0xd3   :  { %v710_v34 = vmul.f32 %v2021_v63, %v709_v38  ;;  %v4202_v38 = vld [vmem:[#allocation55_spill] sm:$0xff]  ;;  %v1107_v46 = vmul.f32 %v1092_v23, %v3098_v3  ;;  %v1109_v43 = vadd.f32 %v1093_v51, %v1060_v7  ;;  %v1110_v58 = vadd.f32 %v1094_v0, %v1061_v2  ;;  %v1132_v2 = vld [vmem:[#allocation2 + $0x90] sm:$0xff] }
  0xd4   :  { %v1105_v9 = vmul.f32 %v1092_v23, %v4202_v38  ;;  %v1108_v38 = vmul.f32 %v1092_v23, %v3231_v35  ;;  %v1111_v10 = vadd.f32 %v1095_v1, %v1062_v45  ;;  %v1112_v47 = vadd.f32 %v1096_v14, %v1063_v22 }
  0xd5   :  { %v3237_v32 = vsel %vm713_vm6, %v2021_v63, %v710_v34  ;;  %v3253_v63 = vld [vmem:[%s3884_s7] ss:$0 sm:$0xff]  ;;  %v4205_v34 = vld [vmem:[#allocation56_spill] sm:$0xff]  ;;  %v1115_v29 = vadd.f32 %v1099_v48, %v1066_v61  ;;  %v1116_v6 = vadd.f32 %v1100_v62, %v1067_v53  ;;  %v1117_v18 = vadd.f32 %v1101_v24, %v1068_v17 }
  0xd6   :  { %4199 = vst [vmem:[#allocation19_spill] sm:$0xff] %v3237_v32  ;;  %v715_v37 = vmul.f32 %v3237_v32, %v4203_v52  ;;  %v716_v28 = vmul.f32 %v3237_v32, %v4204_v8  ;;  %v1106_v50 = vmul.f32 %v1092_v23, %v4205_v34  ;;  %v1113_v8 = vadd.f32 %v1097_v5, %v1064_v44  ;;  %v4209_v5 = vld [vmem:[#allocation22_spill] sm:$0xff]  ;;  %v4211_v48 = vld [vmem:[#allocation20_spill] sm:$0xff] }
  0xd7   :  { %v1114_v32 = vadd.f32 %v1098_v13, %v1065_v55  ;;  %v1118_v3 = vadd.f32 %v1102_v36, %v1069_v49  ;;  %v1119_v19 = vadd.f32 %v1103_v54, %v1070_v12  ;;  %v1120_v23 = vadd.f32 %v1104_v31, %v1071_v20  ;;  %v4210_v13 = vld [vmem:[#allocation23_spill] sm:$0xff]  ;;  %v4212_v62 = vld [vmem:[#allocation24_spill] sm:$0xff]  ;;  %v4214_v54 = vld [vmem:[#allocation30_spill] sm:$0xff] }
  0xd8   :  { %v735_v52 = vmul.f32 %v3229_v30, %v715_v37  ;;  %v736_v4 = vmul.f32 %v3229_v30, %v716_v28  ;;  %v1121_v7 = vadd.f32 %v1105_v9, %v1072_v41  ;;  %v1142_v45 = vmul.f32 %v3212_v39, %v2907_v16 }
  0xd9   :  { %v1143_v22 = vmul.f32 %v3212_v39, %v2909_v42  ;;  %v1122_v61 = vadd.f32 %v1106_v50, %v1073_v60  ;;  %v1144_v17 = vmul.f32 %v3212_v39, %v2911_v11  ;;  %v1123_v53 = vadd.f32 %v1107_v46, %v1074_v21  ;;  %v1140_v60 = vld [vmem:[#allocation2 + $0x130] sm:$0xff] }
  0xda   :  { %v755_v56 = vadd.f32 %v3253_v63, %v735_v52  ;;  %v756_v34 = vadd.f32 %v3253_v63, %v736_v4  ;;  %v1124_v51 = vadd.f32 %v1108_v38, %v1075_v40  ;;  %v1145_v49 = vmul.f32 %v3212_v39, %v2918_v33  ;;  %v4215_v38 = vld [vmem:[#allocation31_spill] sm:$0xff]  ;;  %v4216_v52 = vld [vmem:[#allocation45_spill] sm:$0xff] }
  0xdb   :  { %v1146_v12 = vmul.f32 %v3212_v39, %v2920_v26  ;;  %v1147_v16 = vmul.f32 %v3212_v39, %v2922_v25  ;;  %v1148_v42 = vmul.f32 %v3212_v39, %v3121_v57  ;;  %v1149_v41 = vmul.f32 %v3212_v39, %v1132_v2  ;;  %v4206_v26 = vld [vmem:[#allocation18_spill] sm:$0xff]  ;;  %v4207_v25 = vld [vmem:[#allocation21_spill] sm:$0xff]  ;;  %v4217_v4 = vld [vmem:[#allocation27_spill] sm:$0xff] }
  0xdc   :  { %v771_v44 = vmax.f32 %v755_v56, 0.0  ;;  %v772_v55 = vmax.f32 %v756_v34, 0.0  ;;  %v1158_v0 = vadd.f32 %v1142_v45, %v1109_v43  ;;  %v1159_v11 = vadd.f32 %v1143_v22, %v1110_v58  ;;  %v4208_v56 = vld [vmem:[#allocation29_spill] sm:$0xff]  ;;  %v4213_v43 = vld [vmem:[#allocation59_spill] sm:$0xff]  ;;  %v4218_v45 = vld [vmem:[#allocation46_spill] sm:$0xff] }
  0xdd   :  { %v1191_v21 = vmul.f32 %v3214_v59, %v4174_v27  ;;  %v1192_v33 = vmul.f32 %v3214_v59, %v4175_v15  ;;  %v1150_v40 = vmul.f32 %v3212_v39, %v4206_v26  ;;  %v1151_v1 = vmul.f32 %v3212_v39, %v4207_v25  ;;  %v1181_v26 = vld [vmem:[#allocation2 + $0x91] sm:$0xff] }
  0xde   :  { %v787_v20 = vpack.c.bf16 %v772_v55, %v771_v44  ;;  %v1160_v57 = vadd.f32 %v1144_v17, %v1111_v10  ;;  %v1193_v14 = vmul.f32 %v3214_v59, %v4208_v56  ;;  %v1152_v37 = vmul.f32 %v3212_v39, %v4209_v5  ;;  %v4219_v44 = vld [vmem:[#allocation47_spill] sm:$0xff]  ;;  %v4222_v25 = vld [vmem:[#allocation36_spill] sm:$0xff] }
  0xdf   :  { %v1153_v27 = vmul.f32 %v3212_v39, %v4210_v13  ;;  %v1154_v15 = vmul.f32 %v3212_v39, %v4211_v48  ;;  %v1155_v24 = vmul.f32 %v3212_v39, %v4212_v62  ;;  %v1156_v36 = vmul.f32 %v3212_v39, %v4213_v43  ;;  %v1230_v48 = vld [vmem:[#allocation2 + $0x92] sm:$0xff] }
  0xe0   :  { %1999 = vmatmul.msk.bf16.vlgmr.msra.gmra.mxu1 %vm53_vm1, %v787_v20  ;;  %v1157_v10 = vmul.f32 %v3212_v39, %v1140_v60  ;;  %v1161_v50 = vadd.f32 %v1145_v49, %v1112_v47  ;;  %v1194_v46 = vmul.f32 %v3214_v59, %v4214_v54  ;;  %v1162_v31 = vadd.f32 %v1146_v12, %v1113_v8  ;;  %v4220_v12 = vld [vmem:[#allocation32_spill] sm:$0xff]  ;;  %v4229_v54 = vld [vmem:[#allocation41_spill] sm:$0xff] }
  0xe1   :  { %v1195_v9 = vmul.f32 %v3214_v59, %v4215_v38  ;;  %v1207_v28 = vadd.f32 %v1191_v21, %v1158_v0  ;;  %v1208_v34 = vadd.f32 %v1192_v33, %v1159_v11  ;;  %v1209_v58 = vadd.f32 %v1193_v14, %v1160_v57  ;;  %v4221_v0 = vld [vmem:[#allocation48_spill] sm:$0xff]  ;;  %v4223_v14 = vld [vmem:[#allocation49_spill] sm:$0xff] }
  0xe2   :  { %v1240_v2 = vmul.f32 %v4217_v4, %v4216_v52  ;;  %v1241_v22 = vmul.f32 %v4217_v4, %v4218_v45  ;;  %v1242_v39 = vmul.f32 %v4217_v4, %v4219_v44  ;;  %v1163_v47 = vadd.f32 %v1147_v16, %v1114_v32 }
  0xe3   :  { %v1164_v55 = vadd.f32 %v1148_v42, %v1115_v29  ;;  %v1165_v17 = vadd.f32 %v1149_v41, %v1116_v6  ;;  %v1166_v49 = vadd.f32 %v1150_v40, %v1117_v18  ;;  %v1167_v8 = vadd.f32 %v1151_v1, %v1118_v3  ;;  %v4224_v40 = vld [vmem:[#allocation50_spill] sm:$0xff] }
  0xe4   :  { %v1196_v20 = vmul.f32 %v3214_v59, %v4220_v12  ;;  %v1210_v60 = vadd.f32 %v1194_v46, %v1161_v50  ;;  %v1243_v11 = vmul.f32 %v4217_v4, %v4221_v0  ;;  %v1168_v21 = vadd.f32 %v1152_v37, %v1119_v19  ;;  %v4225_v37 = vld [vmem:[#allocation38_spill] sm:$0xff]  ;;  %v4233_v12 = vld [vmem:[#allocation52_spill] sm:$0xff] }
  0xe5   :  { %v1169_v33 = vadd.f32 %v1153_v27, %v1120_v23  ;;  %v1197_v57 = vmul.f32 %v3214_v59, %v4222_v25  ;;  %v1211_v56 = vadd.f32 %v1195_v9, %v1162_v31  ;;  %v1244_v29 = vmul.f32 %v4217_v4, %v4223_v14  ;;  %v4226_v27 = vld [vmem:[#allocation39_spill] sm:$0xff]  ;;  %v4230_v31 = vld [vmem:[#allocation42_spill] sm:$0xff] }
  0xe6   :  { %v3317_v6 = vadd.f32 %v1240_v2, %v1207_v28  ;;  %v3319_v3 = vadd.f32 %v1241_v22, %v1208_v34  ;;  %v3321_v18 = vadd.f32 %v1242_v39, %v1209_v58  ;;  %v1170_v32 = vadd.f32 %v1154_v15, %v1121_v7  ;;  %v1189_v15 = vld [vmem:[#allocation2 + $0x131] sm:$0xff]  ;;  %v4231_v2 = vld [vmem:[#allocation43_spill] sm:$0xff] }
  0xe7   :  { %v3323_v16 = vadd.f32 %v1155_v24, %v1122_v61  ;;  %v3325_v42 = vadd.f32 %v1156_v36, %v1123_v53  ;;  %v3327_v19 = vadd.f32 %v1157_v10, %v1124_v51  ;;  %v1198_v23 = vmul.f32 %v3214_v59, %v1181_v26  ;;  %v4227_v53 = vld [vmem:[#allocation33_spill] sm:$0xff]  ;;  %v4228_v10 = vld [vmem:[#allocation40_spill] sm:$0xff] }
  0xe8   :  { %v1212_v41 = vadd.f32 %v1196_v20, %v1163_v47  ;;  %v1245_v1 = vmul.f32 %v4217_v4, %v4224_v40  ;;  %v3332_v5 = vadd.f32 %v1243_v11, %v1210_v60  ;;  %v1199_v13 = vmul.f32 %v3214_v59, %v4225_v37  ;;  %v4232_v22 = vld [vmem:[#allocation37_spill] sm:$0xff] }
  0xe9   :  { %v1200_v7 = vmul.f32 %v3214_v59, %v4226_v27  ;;  %v1213_v61 = vadd.f32 %v1197_v57, %v1164_v55  ;;  %v1246_v51 = vmul.f32 %v4217_v4, %v4227_v53  ;;  %v3340_v62 = vadd.f32 %v1244_v29, %v1211_v56 }
  0xea   :  { %v1272_v24 = vsel %vm53_vm1, %v3317_v6, 0.0  ;;  %v1273_v43 = vsel %vm53_vm1, %v3319_v3, 0.0  ;;  %v1275_v36 = vsel %vm53_vm1, %v3321_v18, 0.0  ;;  %v1201_v50 = vmul.f32 %v3214_v59, %v4228_v10 }
  0xeb   :  { %v1202_v46 = vmul.f32 %v3214_v59, %v4229_v54  ;;  %v1203_v38 = vmul.f32 %v3214_v59, %v4230_v31  ;;  %v1274_v9 = vadd.f32 %v1273_v43, %v1272_v24  ;;  %v1214_v28 = vadd.f32 %v1198_v23, %v1165_v17  ;;  %v4237_v54 = vld [vmem:[#allocation56_spill] sm:$0xff] }
  0xec   :  { %v1247_v34 = vmul.f32 %v4217_v4, %v1230_v48  ;;  %v3355_v58 = vadd.f32 %v1245_v1, %v1212_v41  ;;  %v1277_v52 = vsel %vm53_vm1, %v3332_v5, 0.0  ;;  %v1204_v45 = vmul.f32 %v3214_v59, %v4231_v2  ;;  %v4235_v1 = vld [vmem:[#allocation54_spill] sm:$0xff]  ;;  %v4236_v48 = vld [vmem:[#allocation55_spill] sm:$0xff] }
  0xed   :  { %v1205_v44 = vmul.f32 %v3214_v59, %v4232_v22  ;;  %v1206_v39 = vmul.f32 %v3214_v59, %v1189_v15  ;;  %v1276_v47 = vadd.f32 %v1275_v36, %v1274_v9  ;;  %v1215_v55 = vadd.f32 %v1199_v13, %v1166_v49  ;;  %v4234_v49 = vld [vmem:[#allocation53_spill] sm:$0xff]  ;;  %v4238_v2 = vld [vmem:[#allocation58_spill] sm:$0xff] }
  0xee   :  { %v1248_v17 = vmul.f32 %v4217_v4, %v4233_v12  ;;  %v3366_v20 = vadd.f32 %v1246_v51, %v1213_v61  ;;  %v1279_v60 = vsel %vm53_vm1, %v3340_v62, 0.0  ;;  %v1309_v11 = vmul.f32 %v3317_v6, %v3317_v6 }
  0xef   :  { %v1278_v0 = vadd.f32 %v1277_v52, %v1276_v47  ;;  %v1310_v26 = vmul.f32 %v3319_v3, %v3319_v3  ;;  %v1311_v59 = vmul.f32 %v3321_v18, %v3321_v18  ;;  %v1216_v25 = vadd.f32 %v1200_v7, %v1167_v8 }
  0xf0   :  { %v1249_v57 = vmul.f32 %v4217_v4, %v4234_v49  ;;  %v3378_v56 = vadd.f32 %v1247_v34, %v1214_v28  ;;  %v1281_v14 = vsel %vm53_vm1, %v3355_v58, 0.0  ;;  %v1217_v29 = vadd.f32 %v1201_v50, %v1168_v21 }
  0xf1   :  { %v1218_v23 = vadd.f32 %v1202_v46, %v1169_v33  ;;  %v1280_v41 = vadd.f32 %v1279_v60, %v1278_v0  ;;  %v1312_v40 = vmul.f32 %v3332_v5, %v3332_v5  ;;  %v1250_v37 = vmul.f32 %v4217_v4, %v4235_v1  ;;  %v1238_v60 = vld [vmem:[#allocation2 + $0x132] sm:$0xff] }
  0xf2   :  { %v3386_v13 = vadd.f32 %v1248_v17, %v1215_v55  ;;  %v1283_v8 = vsel %vm53_vm1, %v3366_v20, 0.0  ;;  %v1313_v27 = vmul.f32 %v3340_v62, %v3340_v62  ;;  %v1325_v61 = vsel %vm53_vm1, %v1309_v11, 0.0 }
  0xf3   :  { %v1282_v7 = vadd.f32 %v1281_v14, %v1280_v41  ;;  %v1326_v21 = vsel %vm53_vm1, %v1310_v26, 0.0  ;;  %v1328_v33 = vsel %vm53_vm1, %v1311_v59, 0.0  ;;  %v1251_v53 = vmul.f32 %v4217_v4, %v4236_v48 }
  0xf4   :  { %v3397_v51 = vadd.f32 %v1249_v57, %v1216_v25  ;;  %v1285_v15 = vsel %vm53_vm1, %v3378_v56, 0.0  ;;  %v1327_v24 = vadd.f32 %v1326_v21, %v1325_v61  ;;  %v1219_v43 = vadd.f32 %v1203_v38, %v1170_v32 }
  0xf5   :  { %v1284_v36 = vadd.f32 %v1283_v8, %v1282_v7  ;;  %v1314_v10 = vmul.f32 %v3355_v58, %v3355_v58  ;;  %v1330_v50 = vsel %vm53_vm1, %v1312_v40, 0.0  ;;  %v1252_v46 = vmul.f32 %v4217_v4, %v4237_v54 }
  0xf6   :  { %v3406_v31 = vadd.f32 %v1250_v37, %v1217_v29  ;;  %v1287_v9 = vsel %vm53_vm1, %v3386_v13, 0.0  ;;  %v1329_v28 = vadd.f32 %v1328_v33, %v1327_v24  ;;  %v1220_v34 = vadd.f32 %v1204_v45, %v3323_v16 }
  0xf7   :  { %v1286_v52 = vadd.f32 %v1285_v15, %v1284_v36  ;;  %v1315_v32 = vmul.f32 %v3366_v20, %v3366_v20  ;;  %v1332_v38 = vsel %vm53_vm1, %v1313_v27, 0.0  ;;  %v1253_v22 = vmul.f32 %v4217_v4, %v4238_v2 }
  0xf8   :  { %v3416_v47 = vadd.f32 %v1251_v53, %v1218_v23  ;;  %v1289_v55 = vsel %vm53_vm1, %v3397_v51, 0.0  ;;  %v1331_v12 = vadd.f32 %v1330_v50, %v1329_v28  ;;  %v1221_v17 = vadd.f32 %v1205_v44, %v3325_v42 }
  0xf9   :  { %v1288_v0 = vadd.f32 %v1287_v9, %v1286_v52  ;;  %v1316_v16 = vmul.f32 %v3378_v56, %v3378_v56  ;;  %v1334_v45 = vsel %vm53_vm1, %v1314_v10, 0.0  ;;  %v1254_v11 = vmul.f32 %v4217_v4, %v3231_v35 }
  0xfa   :  { %v3426_v26 = vadd.f32 %v1252_v46, %v1219_v43  ;;  %v1291_v59 = vsel %vm53_vm1, %v3406_v31, 0.0  ;;  %v1333_v25 = vadd.f32 %v1332_v38, %v1331_v12  ;;  %v1222_v49 = vadd.f32 %v1206_v39, %v3327_v19 }
  0xfb   :  { %v1290_v57 = vadd.f32 %v1289_v55, %v1288_v0  ;;  %v1317_v42 = vmul.f32 %v3386_v13, %v3386_v13  ;;  %v1336_v44 = vsel %vm53_vm1, %v1315_v32, 0.0  ;;  %v1255_v14 = vmul.f32 %v4217_v4, %v1238_v60 }
  0xfc   :  { %v3435_v29 = vadd.f32 %v1253_v22, %v1220_v34  ;;  %v1293_v35 = vsel %vm53_vm1, %v3416_v47, 0.0  ;;  %v1335_v23 = vadd.f32 %v1334_v45, %v1333_v25  ;;  %v1318_v40 = vmul.f32 %v3397_v51, %v3397_v51 }
  0xfd   :  { %v1292_v41 = vadd.f32 %v1291_v59, %v1290_v57  ;;  %v1338_v19 = vsel %vm53_vm1, %v1316_v16, 0.0  ;;  %v3442_v39 = vadd.f32 %v1254_v11, %v1221_v17  ;;  %v1295_v1 = vsel %vm53_vm1, %v3426_v26, 0.0 }
  0xfe   :  { %v1337_v37 = vadd.f32 %v1336_v44, %v1335_v23  ;;  %v1319_v4 = vmul.f32 %v3406_v31, %v3406_v31  ;;  %v1340_v27 = vsel %vm53_vm1, %v1317_v42, 0.0  ;;  %v3449_v7 = vadd.f32 %v1255_v14, %v1222_v49 }
  0xff   :  { %v1294_v8 = vadd.f32 %v1293_v35, %v1292_v41  ;;  %v1297_v61 = vsel %vm53_vm1, %v3435_v29, 0.0  ;;  %v1320_v48 = vmul.f32 %v3416_v47, %v3416_v47  ;;  %v1342_v53 = vsel %vm53_vm1, %v1318_v40, 0.0 }
 0x100   :  { %v1339_v21 = vadd.f32 %v1338_v19, %v1337_v37  ;;  %v1299_v15 = vsel %vm53_vm1, %v3442_v39, 0.0  ;;  %v1321_v36 = vmul.f32 %v3426_v26, %v3426_v26  ;;  %v1344_v10 = vsel %vm53_vm1, %v1319_v4, 0.0  ;;  %v4240_v4 = vld [vmem:[#allocation10_spill] sm:$0xff] }
 0x101   :  { %v1296_v33 = vadd.f32 %v1295_v1, %v1294_v8  ;;  %v1301_v50 = vsel %vm53_vm1, %v3449_v7, 0.0  ;;  %v1322_v9 = vmul.f32 %v3435_v29, %v3435_v29  ;;  %v1346_v28 = vsel %vm53_vm1, %v1320_v48, 0.0  ;;  %v4239_v8 = vld [vmem:[#allocation57_spill] sm:$0xff]  ;;  %v4242_v48 = vld [vmem:[#allocation19_spill] sm:$0xff] }
 0x102   :  { %v1341_v24 = vadd.f32 %v1340_v27, %v1339_v21  ;;  %v1323_v32 = vmul.f32 %v3442_v39, %v3442_v39  ;;  %v1348_v38 = vsel %vm53_vm1, %v1321_v36, 0.0  ;;  %v1324_v55 = vmul.f32 %v3449_v7, %v3449_v7 }
 0x103   :  { %v1298_v43 = vadd.f32 %v1297_v61, %v1296_v33  ;;  %v1350_v12 = vsel %vm53_vm1, %v1322_v9, 0.0  ;;  %v690_v27 = vsub.f32 %v4240_v4, %v4239_v8  ;;  %v4241_v61 = vld [vmem:[#allocation16_spill] sm:$0xff] }
 0x104   :  { %v1343_v54 = vadd.f32 %v1342_v53, %v1341_v24  ;;  %v1352_v0 = vsel %vm53_vm1, %v1323_v32, 0.0  ;;  %v1354_v11 = vsel %vm53_vm1, %v1324_v55, 0.0  ;;  %v691_v21 = vsub.f32 %v4241_v61, %v4239_v8  ;;  %v4243_v32 = vld [vmem:[#allocation11_spill] sm:$0xff] }
 0x105   :  { %v1300_v46 = vadd.f32 %v1299_v15, %v1298_v43  ;;  %v717_v53 = vmul.f32 %v4242_v48, %v690_v27 }
 0x106   :  { %v1345_v34 = vadd.f32 %v1344_v10, %v1343_v54  ;;  %v718_v15 = vmul.f32 %v4242_v48, %v691_v21  ;;  %v3531_v21 = vld [vmem:[%s3886_s9] ss:$0 sm:$0xff] }
 0x107   :  { %v1302_v52 = vadd.f32 %v1301_v50, %v1300_v46  ;;  %v737_v43 = vmul.f32 %v3229_v30, %v717_v53 }
 0x108   :  { %v1347_v2 = vadd.f32 %v1346_v28, %v1345_v34  ;;  %v738_v36 = vmul.f32 %v3229_v30, %v718_v15 }
 0x109   :  { %v1303_v22 = vrot.slane %v1302_v52, 4  ;;  %v757_v50 = vadd.f32 %v3253_v63, %v737_v43 }
 0x10a   :  { %v1349_v17 = vadd.f32 %v1348_v38, %v1347_v2  ;;  %v758_v54 = vadd.f32 %v3253_v63, %v738_v36  ;;  %v692_v38 = vsub.f32 %v4243_v32, %v4239_v8  ;;  %v4244_v2 = vld [vmem:[#allocation12_spill] sm:$0xff] }
 0x10b   :  { %v1304_v60 = vadd.f32 %v1303_v22, %v1302_v52  ;;  %v773_v46 = vmax.f32 %v757_v50, 0.0  ;;  %v693_v22 = vsub.f32 %v4244_v2, %v4239_v8 }
 0x10c   :  { %v1351_v16 = vadd.f32 %v1350_v12, %v1349_v17  ;;  %v774_v9 = vmax.f32 %v758_v54, 0.0  ;;  %v719_v12 = vmul.f32 %v4242_v48, %v692_v38 }
 0x10d   :  { %v1305_v45 = vrot.slane %v1304_v60, 2  ;;  %v720_v17 = vmul.f32 %v4242_v48, %v693_v22 }
 0x10e   :  { %v1353_v59 = vadd.f32 %v1352_v0, %v1351_v16  ;;  %v788_v28 = vpack.c.bf16 %v774_v9, %v773_v46 }
 0x10f   :  { %v1306_v25 = vadd.f32 %v1305_v45, %v1304_v60  ;;  %v739_v45 = vmul.f32 %v3229_v30, %v719_v12 }
 0x110   :  { %v1355_v49 = vadd.f32 %v1354_v11, %v1353_v59  ;;  %2000 = vmatmul.msk.bf16.gmra.mxu1 %vm53_vm1, %v788_v28  ;;  %v740_v11 = vmul.f32 %v3229_v30, %v720_v17 }
 0x111   :  { %v1307_v57 = vrot.slane %v1306_v25, 1 }
 0x112   :  { %v1356_v42 = vrot.slane %v1355_v49, 4 }
 0x113   :  { %v1308_v44 = vadd.f32 %v1307_v57, %v1306_v25 }
 0x114   :  { %v1357_v14 = vadd.f32 %v1356_v42, %v1355_v49  ;;  %v4245_v49 = vld [vmem:[#allocation26_spill] sm:$0xff]  ;;  %v4246_v42 = vld [vmem:[#allocation35_spill] sm:$0xff] }
 0x115   :  { %v3474_v41 = vmul.f32 0.0078125, %v1308_v44  ;;  %v698_v57 = vsub.f32 %v4245_v49, %v4239_v8  ;;  %v699_v44 = vsub.f32 %v4246_v42, %v4239_v8  ;;  %v4247_v42 = vld [vmem:[#allocation14_spill] sm:$0xff] }
 0x116   :  { %v1358_v35 = vrot.slane %v1357_v14, 2 }
 0x117   :  { %v1364_v1 = vmul.f32 %v3474_v41, %v3474_v41  ;;  %v1367_v0 = vsub.f32 %v3317_v6, %v3474_v41  ;;  %v1368_v16 = vsub.f32 %v3319_v3, %v3474_v41  ;;  %v1369_v25 = vsub.f32 %v3321_v18, %v3474_v41 }
 0x118   :  { %v1359_v23 = vadd.f32 %v1358_v35, %v1357_v14  ;;  %v1370_v6 = vsub.f32 %v3332_v5, %v3474_v41  ;;  %v759_v3 = vadd.f32 %v3253_v63, %v739_v45  ;;  %v760_v14 = vadd.f32 %v3253_v63, %v740_v11 }
 0x119   :  { %v1377_v35 = vsub.f32 %v3406_v31, %v3474_v41  ;;  %v1378_v18 = vsub.f32 %v3416_v47, %v3474_v41 }
 0x11a   :  { %v1360_v40 = vrot.slane %v1359_v23, 1  ;;  %v775_v5 = vmax.f32 %v759_v3, 0.0  ;;  %v4248_v3 = vld [vmem:[#allocation28_spill] sm:$0xff] }
 0x11c   :  { %v1361_v19 = vadd.f32 %v1360_v40, %v1359_v23  ;;  %v725_v40 = vmul.f32 %v4242_v48, %v698_v57 }
 0x11e   :  { %v1363_v37 = vmul.f32 0.0078125, %v1361_v19  ;;  %v726_v19 = vmul.f32 %v4242_v48, %v699_v44  ;;  %v745_v27 = vmul.f32 %v3229_v30, %v725_v40  ;;  %v694_v44 = vsub.f32 %v4247_v42, %v4239_v8 }
 0x11f   :  { %v1380_v40 = vsub.f32 %v3435_v29, %v3474_v41 }
 0x120   :  { %v1365_v33 = vsub.f32 %v1363_v37, %v1364_v1  ;;  %v3520_v1 = vld [vmem:[%s3885_s8] ss:$0 sm:$0xff]  ;;  %v776_v37 = vmax.f32 %v760_v14, 0.0  ;;  %v746_v31 = vmul.f32 %v3229_v30, %v726_v19  ;;  %v765_v36 = vadd.f32 %v3253_v63, %v745_v27  ;;  %v4250_v27 = vld [vmem:[#allocation13_spill] sm:$0xff] }
 0x121   :  { %v695_v14 = vsub.f32 %v4248_v3, %v4239_v8 }
 0x122   :  { %v1366_v24 = vmax.f32 %v1365_v33, 0.0  ;;  %v789_v15 = vpack.c.bf16 %v776_v37, %v775_v5  ;;  %v4249_v5 = vld [vmem:[#allocation9_spill] sm:$0xff] }
 0x123   :  { %v722_v19 = vmul.f32 %v4242_v48, %v695_v14  ;;  %v700_v37 = vsub.f32 %v4249_v5, %v4239_v8  ;;  %v4254_v5 = vld [vmem:[#allocation15_spill] sm:$0xff] }
 0x124   :  { %v1383_v10 = vadd.f32 1e-05, %v1366_v24  ;;  %2001 = vmatmul.msk.bf16.gmra.mxu1 %vm53_vm1, %v789_v15 }
 0x125   :  { %v742_v29 = vmul.f32 %v3229_v30, %v722_v19 }
 0x126   :  { %2022 = vrsqrt.f32 %v1383_v10  ;;  %vm1390_vm7 = vweird.f32 %v1383_v10 }
 0x12c   :  { %v2023_v34 = vpop.eup %2022 }
 0x12d   :  { %v1385_v52 = vmul.f32 %v2023_v34, %v1383_v10  ;;  %vm1391_vm8 = vweird.f32 %v2023_v34 }
 0x12e   :  { %vm1392_vm9 = vmor %vm1390_vm7, %vm1391_vm8 }
 0x12f   :  { %v1386_v55 = vmul.f32 %v2023_v34, %v1385_v52  ;;  %v781_v52 = vmax.f32 %v765_v36, 0.0 }
 0x131   :  { %v1387_v60 = vmul.f32 0.5, %v1386_v55 }
 0x133   :  { %v1388_v59 = vsub.f32 1.5, %v1387_v60 }
 0x135   :  { %v1389_v23 = vmul.f32 %v2023_v34, %v1388_v59 }
 0x137   :  { %v3522_v4 = vsel %vm1392_vm9, %v2023_v34, %v1389_v23  ;;  %v766_v34 = vadd.f32 %v3253_v63, %v746_v31  ;;  %v721_v23 = vmul.f32 %v4242_v48, %v694_v44  ;;  %v701_v31 = vsub.f32 %v4250_v27, %v4239_v8 }
 0x138   :  { %v1394_v61 = vmul.f32 %v3522_v4, %v1367_v0  ;;  %v1395_v47 = vmul.f32 %v3522_v4, %v1368_v16  ;;  %v1396_v33 = vmul.f32 %v3522_v4, %v1369_v25  ;;  %v1397_v53 = vmul.f32 %v3522_v4, %v1370_v6 }
 0x139   :  { %v1404_v24 = vmul.f32 %v3522_v4, %v1377_v35  ;;  %v1405_v43 = vmul.f32 %v3522_v4, %v1378_v18  ;;  %v782_v17 = vmax.f32 %v766_v34, 0.0  ;;  %v1371_v35 = vsub.f32 %v3340_v62, %v3474_v41 }
 0x13a   :  { %v1414_v10 = vmul.f32 %v3520_v1, %v1394_v61  ;;  %v1415_v50 = vmul.f32 %v3520_v1, %v1395_v47  ;;  %v1416_v54 = vmul.f32 %v3520_v1, %v1396_v33  ;;  %v1417_v46 = vmul.f32 %v3520_v1, %v1397_v53 }
 0x13b   :  { %v1424_v9 = vmul.f32 %v3520_v1, %v1404_v24  ;;  %v1425_v28 = vmul.f32 %v3520_v1, %v1405_v43  ;;  %v792_v25 = vpack.c.bf16 %v782_v17, %v781_v52  ;;  %v1379_v18 = vsub.f32 %v3426_v26, %v3474_v41 }
 0x13c   :  { %v1434_v32 = vadd.f32 %v3531_v21, %v1414_v10  ;;  %v1435_v38 = vadd.f32 %v3531_v21, %v1415_v50  ;;  %v1436_v2 = vadd.f32 %v3531_v21, %v1416_v54  ;;  %v1437_v22 = vadd.f32 %v3531_v21, %v1417_v46 }
 0x13d   :  { %v1444_v55 = vadd.f32 %v3531_v21, %v1424_v9  ;;  %v1445_v12 = vadd.f32 %v3531_v21, %v1425_v28  ;;  %2004 = vmatmul.msk.bf16.vlgmr.msra.gmra.mxu2 %vm53_vm1, %v792_v25  ;;  %v741_v62 = vmul.f32 %v3229_v30, %v721_v23  ;;  %v1406_v61 = vmul.f32 %v3522_v4, %v1379_v18 }
 0x13e   :  { %v1450_v60 = vmax.f32 %v1434_v32, 0.0  ;;  %v1451_v0 = vmax.f32 %v1435_v38, 0.0  ;;  %v1452_v16 = vmax.f32 %v1436_v2, 0.0  ;;  %v1453_v45 = vmax.f32 %v1437_v22, 0.0 }
 0x13f   :  { %v1460_v11 = vmax.f32 %v1444_v55, 0.0  ;;  %v1461_v59 = vmax.f32 %v1445_v12, 0.0  ;;  %v1407_v47 = vmul.f32 %v3522_v4, %v1380_v40  ;;  %v1372_v26 = vsub.f32 %v3355_v58, %v3474_v41  ;;  %v4253_v40 = vld [vmem:[#allocation17_spill] sm:$0xff] }
 0x140   :  { %v1466_v49 = vpack.c.bf16 %v1451_v0, %v1450_v60  ;;  %v1467_v57 = vpack.c.bf16 %v1453_v45, %v1452_v16  ;;  %v727_v33 = vmul.f32 %v4242_v48, %v700_v37  ;;  %v728_v53 = vmul.f32 %v4242_v48, %v701_v31  ;;  %v4251_v45 = vld [vmem:[#allocation7_spill] sm:$0xff] }
 0x141   :  { %v1471_v6 = vpack.c.bf16 %v1461_v59, %v1460_v11  ;;  %v1398_v15 = vmul.f32 %v3522_v4, %v1371_v35  ;;  %v761_v24 = vadd.f32 %v3253_v63, %v741_v62  ;;  %v1426_v43 = vmul.f32 %v3520_v1, %v1406_v61  ;;  %v4252_v59 = vld [vmem:[#allocation8_spill] sm:$0xff] }
 0x142   :  { %1991 = vmatmul.msk.bf16.vlgmr.msra.gmra.mxu0 %vm53_vm1, %v1466_v49  ;;  %v1427_v36 = vmul.f32 %v3520_v1, %v1407_v47  ;;  %v762_v10 = vadd.f32 %v3253_v63, %v742_v29  ;;  %v747_v50 = vmul.f32 %v3229_v30, %v727_v33  ;;  %v748_v58 = vmul.f32 %v3229_v30, %v728_v53 }
 0x143   :  { %1996 = vmatmul.msk.bf16.vlgmr.msra.gmra.mxu3 %vm53_vm1, %v1471_v6  ;;  %v777_v54 = vmax.f32 %v761_v24, 0.0  ;;  %v1446_v46 = vadd.f32 %v3531_v21, %v1426_v43  ;;  %v1399_v28 = vmul.f32 %v3522_v4, %v1372_v26  ;;  %v1418_v38 = vmul.f32 %v3520_v1, %v1398_v15 }
 0x144   :  { %v1447_v9 = vadd.f32 %v3531_v21, %v1427_v36  ;;  %v778_v34 = vmax.f32 %v762_v10, 0.0  ;;  %v767_v52 = vadd.f32 %v3253_v63, %v747_v50  ;;  %v768_v32 = vadd.f32 %v3253_v63, %v748_v58 }
 0x145   :  { %v1462_v2 = vmax.f32 %v1446_v46, 0.0  ;;  %v1419_v60 = vmul.f32 %v3520_v1, %v1399_v28  ;;  %v1438_v16 = vadd.f32 %v3531_v21, %v1418_v38  ;;  %v696_v11 = vsub.f32 %v4251_v45, %v4239_v8 }
 0x146   :  { %v790_v22 = vpack.c.bf16 %v778_v34, %v777_v54  ;;  %v1463_v55 = vmax.f32 %v1447_v9, 0.0  ;;  %v783_v12 = vmax.f32 %v767_v52, 0.0  ;;  %v784_v17 = vmax.f32 %v768_v32, 0.0 }
 0x147   :  { %v697_v25 = vsub.f32 %v4252_v59, %v4239_v8  ;;  %v723_v42 = vmul.f32 %v4242_v48, %v696_v11  ;;  %v1439_v6 = vadd.f32 %v3531_v21, %v1419_v60  ;;  %v1454_v3 = vmax.f32 %v1438_v16, 0.0 }
 0x148   :  { %2002 = vmatmul.msk.bf16.gmra.mxu1 %vm53_vm1, %v790_v22  ;;  %v793_v0 = vpack.c.bf16 %v784_v17, %v783_v12  ;;  %v1472_v49 = vpack.c.bf16 %v1463_v55, %v1462_v2  ;;  %v1381_v23 = vsub.f32 %v3442_v39, %v3474_v41  ;;  %v1382_v18 = vsub.f32 %v3449_v7, %v3474_v41 }
 0x149   :  { %v724_v44 = vmul.f32 %v4242_v48, %v697_v25  ;;  %v743_v14 = vmul.f32 %v3229_v30, %v723_v42  ;;  %v702_v19 = vsub.f32 %v4253_v40, %v4239_v8  ;;  %v703_v37 = vsub.f32 %v4254_v5, %v4239_v8  ;;  %v1628_v42 = vld [vmem:[#allocation3] sm:$0xff] }
 0x14a   :  { %v1408_v39 = vmul.f32 %v3522_v4, %v1381_v23  ;;  %v1376_v62 = vsub.f32 %v3397_v51, %v3474_v41  ;;  %v1409_v7 = vmul.f32 %v3522_v4, %v1382_v18  ;;  %v1455_v43 = vmax.f32 %v1439_v6, 0.0  ;;  %v1638_v18 = vld [vmem:[#allocation3 + $0x50] sm:$0xff] }
 0x14b   :  { %v744_v35 = vmul.f32 %v3229_v30, %v724_v44  ;;  %v763_v27 = vadd.f32 %v3253_v63, %v743_v14  ;;  %v729_v61 = vmul.f32 %v4242_v48, %v702_v19  ;;  %v730_v47 = vmul.f32 %v4242_v48, %v703_v37 }
 0x14c   :  { %v1403_v33 = vmul.f32 %v3522_v4, %v1376_v62  ;;  %v1429_v53 = vmul.f32 %v3520_v1, %v1409_v7  ;;  %v1373_v9 = vsub.f32 %v3366_v20, %v3474_v41  ;;  %v1630_v62 = vld [vmem:[#allocation3 + $0x10] sm:$0xff] }
 0x14d   :  { %2005 = vmatmul.msk.bf16.gmra.mxu2 %vm53_vm1, %v793_v0  ;;  %v764_v31 = vadd.f32 %v3253_v63, %v744_v35  ;;  %v779_v26 = vmax.f32 %v763_v27, 0.0  ;;  %v749_v15 = vmul.f32 %v3229_v30, %v729_v61  ;;  %v750_v51 = vmul.f32 %v3229_v30, %v730_v47 }
 0x14e   :  { %v1423_v10 = vmul.f32 %v3520_v1, %v1403_v33  ;;  %v1449_v50 = vadd.f32 %v3531_v21, %v1429_v53  ;;  %v1374_v30 = vsub.f32 %v3378_v56, %v3474_v41  ;;  %v1400_v12 = vmul.f32 %v3522_v4, %v1373_v9  ;;  %v1640_v33 = vld [vmem:[#allocation3 + $0x60] sm:$0xff] }
 0x14f   :  { %v780_v29 = vmax.f32 %v764_v31, 0.0  ;;  %v769_v58 = vadd.f32 %v3253_v63, %v749_v15  ;;  %v770_v54 = vadd.f32 %v3253_v63, %v750_v51  ;;  %v1468_v63 = vpack.c.bf16 %v1455_v43, %v1454_v3  ;;  %v1639_v31 = vld [vmem:[#allocation3 + $0x58] sm:$0xff] }
 0x150   :  { %v1443_v34 = vadd.f32 %v3531_v21, %v1423_v10  ;;  %v1465_v52 = vmax.f32 %v1449_v50, 0.0  ;;  %v1401_v17 = vmul.f32 %v3522_v4, %v1374_v30  ;;  %v1420_v56 = vmul.f32 %v3520_v1, %v1400_v12  ;;  %v1631_v15 = vld [vmem:[#allocation3 + $0x18] sm:$0xff]  ;;  %v1641_v50 = vld [vmem:[#allocation3 + $0x68] sm:$0xff] }
 0x151   :  { %v791_v36 = vpack.c.bf16 %v780_v29, %v779_v26  ;;  %v785_v32 = vmax.f32 %v769_v58, 0.0  ;;  %v786_v38 = vmax.f32 %v770_v54, 0.0  ;;  %v1632_v54 = vld [vmem:[#allocation3 + $0x20] sm:$0xff] }
 0x152   :  { %1992 = vmatmul.msk.bf16.gmra.mxu0 %vm53_vm1, %v1467_v57  ;;  %v1375_v57 = vsub.f32 %v3386_v13, %v3474_v41  ;;  %v1428_v13 = vmul.f32 %v3520_v1, %v1408_v39  ;;  %v1459_v22 = vmax.f32 %v1443_v34, 0.0  ;;  %v1421_v41 = vmul.f32 %v3520_v1, %v1401_v17  ;;  %v1642_v17 = vld [vmem:[#allocation3 + $0x70] sm:$0xff] }
 0x153   :  { %1997 = vmatmul.msk.bf16.gmra.mxu3 %vm53_vm1, %v1472_v49  ;;  %v794_v55 = vpack.c.bf16 %v786_v38, %v785_v32  ;;  %v1440_v0 = vadd.f32 %v3531_v21, %v1420_v56 }
 0x154   :  { %v1402_v8 = vmul.f32 %v3522_v4, %v1375_v57  ;;  %v1448_v48 = vadd.f32 %v3531_v21, %v1428_v13  ;;  %v1441_v16 = vadd.f32 %v3531_v21, %v1421_v41  ;;  %v1643_v41 = vld [vmem:[#allocation3 + $0x78] sm:$0xff] }
 0x155   :  { %v1456_v45 = vmax.f32 %v1440_v0, 0.0 }
 0x156   :  { %v1422_v24 = vmul.f32 %v3520_v1, %v1402_v8  ;;  %v1464_v28 = vmax.f32 %v1448_v48, 0.0  ;;  %v1457_v11 = vmax.f32 %v1441_v16, 0.0  ;;  %v1634_v16 = vld [vmem:[#allocation3 + $0x30] sm:$0xff] }
 0x158   :  { %v1442_v46 = vadd.f32 %v3531_v21, %v1422_v24  ;;  %2003 = vmatmul.msk.bf16.gmra.mxu1 %vm53_vm1, %v791_v36  ;;  %v1473_v60 = vpack.c.bf16 %v1465_v52, %v1464_v28  ;;  %v1469_v59 = vpack.c.bf16 %v1457_v11, %v1456_v45  ;;  %v1629_v21 = vld [vmem:[#allocation3 + $0x8] sm:$0xff] }
 0x15a   :  { %v1458_v2 = vmax.f32 %v1442_v46, 0.0 }
 0x15c   :  { %v1470_v20 = vpack.c.bf16 %v1459_v22, %v1458_v2  ;;  %v1633_v2 = vld [vmem:[#allocation3 + $0x28] sm:$0xff] }
 0x15d   :  { %2006 = vmatmul.msk.bf16.gmra.mxu2 %vm53_vm1, %v794_v55  ;;  %v1588_v4 = vpop.f32.mrf.mxu1 }
 0x162   :  { %1993 = vmatmul.msk.bf16.gmra.mxu0 %vm53_vm1, %v1468_v63 }
 0x163   :  { %1998 = vmatmul.msk.bf16.gmra.mxu3 %vm53_vm1, %v1473_v60 }
 0x165   :  { %v1590_v25 = vpop.f32.mrf.mxu1 }
 0x172   :  { %1994 = vmatmul.msk.bf16.gmra.mxu0 %vm53_vm1, %v1469_v59 }
 0x182   :  { %1995 = vmatmul.msk.bf16.gmra.mxu0 %vm53_vm1, %v1470_v20 }
 0x18d   :  { %v1593_v6 = vpop.f32.mrf.mxu1 }
 0x195   :  { %v1595_v37 = vpop.f32.mrf.mxu1 }
 0x1a1   :  { %v1598_v29 = vpop.f32.mrf.mxu1 }
 0x1a9   :  { %v1600_v46 = vpop.f32.mrf.mxu1 }
 0x1bf   :  { %v1512_v49 = vpop.f32.mrf.mxu0 }
 0x1c0   :  { %v1589_v44 = vadd.f32 %v1588_v4, %v1512_v49  ;;  %v1613_v3 = vpop.f32.mrf.mxu2  ;;  %v1942_v49 = vld [vmem:[%s3889_s12] sm:$0x3] }
 0x1c2   :  { %v1644_v1 = vadd.f32 %v1628_v42, %v1589_v44  ;;  %v1958_v42 = vsel %vm1499_vm0, %v1942_v49, 0 }
 0x1c3   :  { %1967 = vmatpush.bf16.msrb.mxu2 %v1958_v42 }
 0x1c4   :  { %1660 = vst.msk [vmem:[#allocation3] sm:$0xff] %vm53_vm1, %v1644_v1 }
 0x1c5   :  { %v1603_v55 = vpop.f32.mrf.mxu1 }
 0x1c6   :  { %v1537_v14 = vpop.f32.mrf.mxu3 }
 0x1c7   :  { %v1514_v35 = vpop.f32.mrf.mxu0  ;;  %v1614_v23 = vadd.f32 %v1613_v3, %v1537_v14 }
 0x1c8   :  { %v1591_v40 = vadd.f32 %v1590_v25, %v1514_v35  ;;  %v1615_v57 = vpop.f32.mrf.mxu2 }
 0x1c9   :  { %v1654_v19 = vadd.f32 %v1638_v18, %v1614_v23 }
 0x1ca   :  { %v1645_v5 = vadd.f32 %v1629_v21, %v1591_v40  ;;  %v1636_v40 = vld [vmem:[#allocation3 + $0x40] sm:$0xff] }
 0x1cb   :  { %1670 = vst.msk [vmem:[#allocation3 + $0x50] sm:$0xff] %vm53_vm1, %v1654_v19  ;;  %v3675_v21 = vld [vmem:[#allocation3] sm:$0xff] }
 0x1cc   :  { %1661 = vst.msk [vmem:[#allocation3 + $0x8] sm:$0xff] %vm53_vm1, %v1645_v5 }
 0x1cd   :  { %v1605_v25 = vpop.f32.mrf.mxu1 }
 0x1ce   :  { %v1539_v27 = vpop.f32.mrf.mxu3 }
 0x1cf   :  { %v1517_v39 = vpop.f32.mrf.mxu0  ;;  %v1616_v7 = vadd.f32 %v1615_v57, %v1539_v27  ;;  %v1732_v57 = vmul.f32 %v3675_v21, %v3675_v21 }
 0x1d0   :  { %v1594_v61 = vadd.f32 %v1593_v6, %v1517_v39  ;;  %v1618_v26 = vpop.f32.mrf.mxu2  ;;  %v1635_v6 = vld [vmem:[#allocation3 + $0x38] sm:$0xff] }
 0x1d1   :  { %v1655_v47 = vadd.f32 %v1639_v31, %v1616_v7  ;;  %v1695_v7 = vsel %vm53_vm1, %v3675_v21, 0.0 }
 0x1d2   :  { %v1646_v8 = vadd.f32 %v1630_v62, %v1594_v61 }
 0x1d3   :  { %1671 = vst.msk [vmem:[#allocation3 + $0x58] sm:$0xff] %vm53_vm1, %v1655_v47  ;;  %v3673_v14 = vld [vmem:[#allocation3 + $0x8] sm:$0xff] }
 0x1d4   :  { %1662 = vst.msk [vmem:[#allocation3 + $0x10] sm:$0xff] %vm53_vm1, %v1646_v8  ;;  %v1733_v19 = vmul.f32 %v3673_v14, %v3673_v14  ;;  %v1696_v27 = vsel %vm53_vm1, %v3673_v14, 0.0 }
 0x1d5   :  { %v1608_v35 = vpop.f32.mrf.mxu1 }
 0x1d6   :  { %v1542_v13 = vpop.f32.mrf.mxu3  ;;  %v1749_v61 = vsel %vm53_vm1, %v1733_v19, 0.0 }
 0x1d7   :  { %v1519_v53 = vpop.f32.mrf.mxu0  ;;  %v1619_v51 = vadd.f32 %v1618_v26, %v1542_v13  ;;  %v1697_v26 = vadd.f32 %v1696_v27, %v1695_v7  ;;  %v1748_v13 = vsel %vm53_vm1, %v1732_v57, 0.0 }
 0x1d8   :  { %v1596_v24 = vadd.f32 %v1595_v37, %v1519_v53  ;;  %v1620_v48 = vpop.f32.mrf.mxu2 }
 0x1d9   :  { %v1656_v43 = vadd.f32 %v1640_v33, %v1619_v51  ;;  %v1750_v51 = vadd.f32 %v1749_v61, %v1748_v13 }
 0x1da   :  { %v1647_v36 = vadd.f32 %v1631_v15, %v1596_v24 }
 0x1db   :  { %1672 = vst.msk [vmem:[#allocation3 + $0x60] sm:$0xff] %vm53_vm1, %v1656_v43  ;;  %v3677_v23 = vld [vmem:[#allocation3 + $0x10] sm:$0xff] }
 0x1dc   :  { %1663 = vst.msk [vmem:[#allocation3 + $0x18] sm:$0xff] %vm53_vm1, %v1647_v36  ;;  %v1734_v31 = vmul.f32 %v3677_v23, %v3677_v23  ;;  %v1698_v47 = vsel %vm53_vm1, %v3677_v23, 0.0 }
 0x1dd   :  { %v1699_v24 = vadd.f32 %v1698_v47, %v1697_v26  ;;  %v1610_v43 = vpop.f32.mrf.mxu1 }
 0x1de   :  { %v1544_v10 = vpop.f32.mrf.mxu3  ;;  %v1751_v33 = vsel %vm53_vm1, %v1734_v31, 0.0 }
 0x1df   :  { %v1522_v58 = vpop.f32.mrf.mxu0  ;;  %v1621_v9 = vadd.f32 %v1620_v48, %v1544_v10  ;;  %v1637_v48 = vld [vmem:[#allocation3 + $0x48] sm:$0xff] }
 0x1e0   :  { %v1599_v30 = vadd.f32 %v1598_v29, %v1522_v58  ;;  %v1623_v52 = vpop.f32.mrf.mxu2 }
 0x1e1   :  { %v1657_v28 = vadd.f32 %v1641_v50, %v1621_v9  ;;  %v1752_v9 = vadd.f32 %v1751_v33, %v1750_v51 }
 0x1e2   :  { %v1648_v34 = vadd.f32 %v1632_v54, %v1599_v30  ;;  %v3750_v19 = vld [vmem:[#allocation3 + $0x60] sm:$0xff] }
 0x1e3   :  { %1673 = vst.msk [vmem:[#allocation3 + $0x68] sm:$0xff] %vm53_vm1, %v1657_v28  ;;  %v3681_v37 = vld [vmem:[#allocation3 + $0x18] sm:$0xff]  ;;  %v1744_v13 = vmul.f32 %v3750_v19, %v3750_v19 }
 0x1e4   :  { %1664 = vst.msk [vmem:[#allocation3 + $0x20] sm:$0xff] %vm53_vm1, %v1648_v34  ;;  %v1735_v8 = vmul.f32 %v3681_v37, %v3681_v37  ;;  %v1700_v53 = vsel %vm53_vm1, %v3681_v37, 0.0 }
 0x1e5   :  { %v1701_v30 = vadd.f32 %v1700_v53, %v1699_v24  ;;  %v1718_v24 = vsel %vm53_vm1, %v3750_v19, 0.0 }
 0x1e6   :  { %v1547_v32 = vpop.f32.mrf.mxu3  ;;  %v1753_v50 = vsel %vm53_vm1, %v1735_v8, 0.0 }
 0x1e7   :  { %v1524_v38 = vpop.f32.mrf.mxu0  ;;  %v1624_v12 = vadd.f32 %v1623_v52, %v1547_v32 }
 0x1e8   :  { %v1601_v22 = vadd.f32 %v1600_v46, %v1524_v38  ;;  %v1625_v20 = vpop.f32.mrf.mxu2 }
 0x1e9   :  { %v1658_v60 = vadd.f32 %v1642_v17, %v1624_v12 }
 0x1ea   :  { %v1649_v63 = vadd.f32 %v1633_v2, %v1601_v22  ;;  %v1754_v2 = vadd.f32 %v1753_v50, %v1752_v9  ;;  %v3757_v7 = vld [vmem:[#allocation3 + $0x68] sm:$0xff] }
 0x1eb   :  { %1674 = vst.msk [vmem:[#allocation3 + $0x70] sm:$0xff] %vm53_vm1, %v1658_v60  ;;  %v3689_v62 = vld [vmem:[#allocation3 + $0x20] sm:$0xff] }
 0x1ec   :  { %1665 = vst.msk [vmem:[#allocation3 + $0x28] sm:$0xff] %vm53_vm1, %v1649_v63  ;;  %v1736_v15 = vmul.f32 %v3689_v62, %v3689_v62  ;;  %v1702_v54 = vsel %vm53_vm1, %v3689_v62, 0.0 }
 0x1ee   :  { %v1549_v56 = vpop.f32.mrf.mxu3  ;;  %v1755_v38 = vsel %vm53_vm1, %v1736_v15, 0.0 }
 0x1ef   :  { %v1527_v0 = vpop.f32.mrf.mxu0  ;;  %v1626_v45 = vadd.f32 %v1625_v20, %v1549_v56  ;;  %v1756_v60 = vadd.f32 %v1755_v38, %v1754_v2 }
 0x1f0   :  { %v1604_v11 = vadd.f32 %v1603_v55, %v1527_v0  ;;  %v1703_v55 = vadd.f32 %v1702_v54, %v1701_v30 }
 0x1f1   :  { %v1659_v59 = vadd.f32 %v1643_v41, %v1626_v45 }
 0x1f2   :  { %v1650_v4 = vadd.f32 %v1634_v16, %v1604_v11  ;;  %v3764_v33 = vld [vmem:[#allocation3 + $0x70] sm:$0xff] }
 0x1f3   :  { %1675 = vst.msk [vmem:[#allocation3 + $0x78] sm:$0xff] %vm53_vm1, %v1659_v59  ;;  %v3699_v29 = vld [vmem:[#allocation3 + $0x28] sm:$0xff]  ;;  %v1746_v54 = vmul.f32 %v3764_v33, %v3764_v33 }
 0x1f4   :  { %1666 = vst.msk [vmem:[#allocation3 + $0x30] sm:$0xff] %vm53_vm1, %v1650_v4  ;;  %v1737_v46 = vmul.f32 %v3699_v29, %v3699_v29  ;;  %v1704_v52 = vsel %vm53_vm1, %v3699_v29, 0.0  ;;  %v3737_v4 = vld [vmem:[#allocation3 + $0x50] sm:$0xff] }
 0x1f5   :  { %v1705_v20 = vadd.f32 %v1704_v52, %v1703_v55  ;;  %v1714_v27 = vsel %vm53_vm1, %v3737_v4, 0.0 }
 0x1f6   :  { %v1757_v17 = vsel %vm53_vm1, %v1737_v46, 0.0  ;;  %v1771_v46 = vsel %vm53_vm1, %v1744_v13, 0.0 }
 0x1f7   :  { %v1529_v44 = vpop.f32.mrf.mxu0  ;;  %v1758_v45 = vadd.f32 %v1757_v17, %v1756_v60 }
 0x1f8   :  { %v1606_v1 = vadd.f32 %v1605_v25, %v1529_v44  ;;  %v3740_v44 = vld [vmem:[#allocation3 + $0x58] sm:$0xff] }
 0x1f9   :  { %v1743_v31 = vmul.f32 %v3740_v44, %v3740_v44  ;;  %v1716_v26 = vsel %vm53_vm1, %v3740_v44, 0.0 }
 0x1fa   :  { %v1651_v3 = vadd.f32 %v1635_v6, %v1606_v1 }
 0x1fb   :  { %v3707_v10 = vld [vmem:[#allocation3 + $0x30] sm:$0xff]  ;;  %v1769_v51 = vsel %vm53_vm1, %v1743_v31, 0.0 }
 0x1fc   :  { %1667 = vst.msk [vmem:[#allocation3 + $0x38] sm:$0xff] %vm53_vm1, %v1651_v3  ;;  %v1738_v32 = vmul.f32 %v3707_v10, %v3707_v10  ;;  %v1706_v63 = vsel %vm53_vm1, %v3707_v10, 0.0 }
 0x1fd   :  { %v1707_v16 = vadd.f32 %v1706_v63, %v1705_v20  ;;  %v1775_v63 = vsel %vm53_vm1, %v1746_v54, 0.0 }
 0x1fe   :  { %v1759_v0 = vsel %vm53_vm1, %v1738_v32, 0.0 }
 0x1ff   :  { %v1532_v18 = vpop.f32.mrf.mxu0  ;;  %v1760_v49 = vadd.f32 %v1759_v0, %v1758_v45 }
 0x200   :  { %v1609_v5 = vadd.f32 %v1608_v35, %v1532_v18  ;;  %v1742_v35 = vmul.f32 %v3737_v4, %v3737_v4 }
 0x202   :  { %v1652_v39 = vadd.f32 %v1636_v40, %v1609_v5  ;;  %v1767_v8 = vsel %vm53_vm1, %v1742_v35, 0.0 }
 0x203   :  { %v3714_v28 = vld [vmem:[#allocation3 + $0x38] sm:$0xff] }
 0x204   :  { %1668 = vst.msk [vmem:[#allocation3 + $0x40] sm:$0xff] %vm53_vm1, %v1652_v39  ;;  %v1739_v12 = vmul.f32 %v3714_v28, %v3714_v28  ;;  %v1708_v41 = vsel %vm53_vm1, %v3714_v28, 0.0 }
 0x205   :  { %v1709_v25 = vadd.f32 %v1708_v41, %v1707_v16 }
 0x206   :  { %v1761_v59 = vsel %vm53_vm1, %v1739_v12, 0.0 }
 0x207   :  { %v1534_v36 = vpop.f32.mrf.mxu0  ;;  %v1762_v3 = vadd.f32 %v1761_v59, %v1760_v49 }
 0x208   :  { %v1611_v58 = vadd.f32 %v1610_v43, %v1534_v36  ;;  %v1745_v43 = vmul.f32 %v3757_v7, %v3757_v7  ;;  %v3771_v36 = vld [vmem:[#allocation3 + $0x78] sm:$0xff] }
 0x209   :  { %v1747_v52 = vmul.f32 %v3771_v36, %v3771_v36  ;;  %v1724_v55 = vsel %vm53_vm1, %v3771_v36, 0.0 }
 0x20a   :  { %v1653_v34 = vadd.f32 %v1637_v48, %v1611_v58  ;;  %v1720_v58 = vsel %vm53_vm1, %v3757_v7, 0.0  ;;  %v1773_v32 = vsel %vm53_vm1, %v1745_v43, 0.0 }
 0x20b   :  { %v3721_v22 = vld [vmem:[#allocation3 + $0x40] sm:$0xff]  ;;  %v1777_v20 = vsel %vm53_vm1, %v1747_v52, 0.0 }
 0x20c   :  { %1669 = vst.msk [vmem:[#allocation3 + $0x48] sm:$0xff] %vm53_vm1, %v1653_v34  ;;  %v1740_v56 = vmul.f32 %v3721_v22, %v3721_v22  ;;  %v1710_v11 = vsel %vm53_vm1, %v3721_v22, 0.0  ;;  %v1722_v34 = vsel %vm53_vm1, %v3764_v33, 0.0 }
 0x20d   :  { %v1711_v1 = vadd.f32 %v1710_v11, %v1709_v25 }
 0x20e   :  { %v1763_v42 = vsel %vm53_vm1, %v1740_v56, 0.0 }
 0x20f   :  { %v1764_v57 = vadd.f32 %v1763_v42, %v1762_v3 }
 0x213   :  { %v3742_v6 = vld [vmem:[#allocation3 + $0x48] sm:$0xff] }
 0x214   :  { %v1741_v18 = vmul.f32 %v3742_v6, %v3742_v6  ;;  %v1712_v40 = vsel %vm53_vm1, %v3742_v6, 0.0 }
 0x215   :  { %v1713_v5 = vadd.f32 %v1712_v40, %v1711_v1 }
 0x216   :  { %v1765_v39 = vsel %vm53_vm1, %v1741_v18, 0.0 }
 0x217   :  { %v1715_v61 = vadd.f32 %v1714_v27, %v1713_v5  ;;  %v1766_v47 = vadd.f32 %v1765_v39, %v1764_v57 }
 0x219   :  { %v1717_v53 = vadd.f32 %v1716_v26, %v1715_v61  ;;  %v1768_v15 = vadd.f32 %v1767_v8, %v1766_v47 }
 0x21b   :  { %v1719_v48 = vadd.f32 %v1718_v24, %v1717_v53  ;;  %v1770_v50 = vadd.f32 %v1769_v51, %v1768_v15 }
 0x21d   :  { %v1721_v9 = vadd.f32 %v1720_v58, %v1719_v48  ;;  %v1772_v30 = vadd.f32 %v1771_v46, %v1770_v50 }
 0x21f   :  { %v1723_v38 = vadd.f32 %v1722_v34, %v1721_v9  ;;  %v1774_v2 = vadd.f32 %v1773_v32, %v1772_v30 }
 0x221   :  { %v1725_v12 = vadd.f32 %v1724_v55, %v1723_v38  ;;  %v1776_v17 = vadd.f32 %v1775_v63, %v1774_v2 }
 0x223   :  { %v1726_v60 = vrot.slane %v1725_v12, 4  ;;  %v1778_v56 = vadd.f32 %v1777_v20, %v1776_v17 }
 0x225   :  { %v1727_v41 = vadd.f32 %v1726_v60, %v1725_v12  ;;  %v1779_v0 = vrot.slane %v1778_v56, 4  ;;  %v2055_v60 = vmov 64.0  }
 0x227   :  { %v1728_v16 = vrot.slane %v1727_v41, 2  ;;  %v1780_v45 = vadd.f32 %v1779_v0, %v1778_v56 }
 0x229   :  { %v1729_v11 = vadd.f32 %v1728_v16, %v1727_v41  ;;  %v1781_v59 = vrot.slane %v1780_v45, 2 }
 0x22b   :  { %v1730_v25 = vrot.slane %v1729_v11, 1  ;;  %v1782_v49 = vadd.f32 %v1781_v59, %v1780_v45 }
 0x22d   :  { %v1731_v42 = vadd.f32 %v1730_v25, %v1729_v11  ;;  %v1783_v1 = vrot.slane %v1782_v49, 1 }
 0x22f   :  { %v1784_v3 = vadd.f32 %v1783_v1, %v1782_v49  ;;  %v3787_v35 = vmul.f32 0.0078125, %v1731_v42 }
 0x231   :  { %v1786_v18 = vmul.f32 0.0078125, %v1784_v3  ;;  %v1787_v40 = vmul.f32 %v3787_v35, %v3787_v35  ;;  %v1790_v13 = vsub.f32 %v3675_v21, %v3787_v35  ;;  %v1791_v53 = vsub.f32 %v3673_v14, %v3787_v35  ;;  %v2017_v21 = vld [vmem:[%s3887_s10] ss:$0 sm:$0xff] }
 0x232   :  { %v1792_v15 = vsub.f32 %v3677_v23, %v3787_v35  ;;  %v1798_v24 = vsub.f32 %v3721_v22, %v3787_v35  ;;  %v1799_v43 = vsub.f32 %v3742_v6, %v3787_v35  ;;  %v1793_v14 = vsub.f32 %v3681_v37, %v3787_v35 }
 0x233   :  { %v1788_v5 = vsub.f32 %v1786_v18, %v1787_v40  ;;  %v1794_v58 = vsub.f32 %v3689_v62, %v3787_v35  ;;  %v1795_v23 = vsub.f32 %v3699_v29, %v3787_v35  ;;  %v1800_v22 = vsub.f32 %v3737_v4, %v3787_v35  ;;  %v3821_v29 = vld [vmem:[%s3888_s11] ss:$0 sm:$0xff] }
 0x234   :  { %v1796_v9 = vsub.f32 %v3707_v10, %v3787_v35  ;;  %v1797_v30 = vsub.f32 %v3714_v28, %v3787_v35  ;;  %v1801_v37 = vsub.f32 %v3740_v44, %v3787_v35  ;;  %v1802_v4 = vsub.f32 %v3750_v19, %v3787_v35 }
 0x235   :  { %v1789_v57 = vmax.f32 %v1788_v5, 0.0  ;;  %v1803_v10 = vsub.f32 %v3757_v7, %v3787_v35  ;;  %v1804_v28 = vsub.f32 %v3764_v33, %v3787_v35  ;;  %v1805_v12 = vsub.f32 %v3771_v36, %v3787_v35 }
 0x237   :  { %v1806_v27 = vadd.f32 1e-05, %v1789_v57 }
 0x239   :  { %2024 = vrsqrt.f32 %v1806_v27  ;;  %vm1813_vm11 = vweird.f32 %v1806_v27 }
 0x23a   :  { %2026 = vrcp.f32 %v2055_v60 }
 0x23f   :  { %v2025_v31 = vpop.eup %2024 }
 0x240   :  { %v1808_v39 = vmul.f32 %v2025_v31, %v1806_v27  ;;  %vm1814_vm10 = vweird.f32 %v2025_v31  ;;  %v3838_v57 = vpop.eup %2026 }
 0x241   :  { %vm1815_vm12 = vmor %vm1813_vm11, %vm1814_vm10  ;;  %vm1936_vm13 = vweird.f32 %v3838_v57 }
 0x242   :  { %v1809_v61 = vmul.f32 %v2025_v31, %v1808_v39 }
 0x244   :  { %v1810_v47 = vmul.f32 0.5, %v1809_v61 }
 0x246   :  { %v1811_v8 = vsub.f32 1.5, %v1810_v47 }
 0x248   :  { %v1812_v26 = vmul.f32 %v2025_v31, %v1811_v8 }
 0x24a   :  { %v1816_v51 = vsel %vm1815_vm12, %v2025_v31, %v1812_v26 }
 0x24b   :  { %v1817_v48 = vmul.f32 %v1816_v51, %v1790_v13  ;;  %v1818_v50 = vmul.f32 %v1816_v51, %v1791_v53  ;;  %v1819_v54 = vmul.f32 %v1816_v51, %v1792_v15  ;;  %v1825_v6 = vmul.f32 %v1816_v51, %v1798_v24 }
 0x24c   :  { %v1826_v46 = vmul.f32 %v1816_v51, %v1799_v43  ;;  %v1820_v34 = vmul.f32 %v1816_v51, %v1793_v14  ;;  %v1827_v62 = vmul.f32 %v1816_v51, %v1800_v22  ;;  %v1821_v38 = vmul.f32 %v1816_v51, %v1794_v58 }
 0x24d   :  { %v1837_v52 = vmul.f32 %v2017_v21, %v1817_v48  ;;  %v1838_v32 = vmul.f32 %v2017_v21, %v1818_v50  ;;  %v1828_v44 = vmul.f32 %v1816_v51, %v1801_v37  ;;  %v1839_v2 = vmul.f32 %v2017_v21, %v1819_v54 }
 0x24e   :  { %v1845_v55 = vmul.f32 %v2017_v21, %v1825_v6  ;;  %v1846_v63 = vmul.f32 %v2017_v21, %v1826_v46  ;;  %v1822_v17 = vmul.f32 %v1816_v51, %v1795_v23  ;;  %v1829_v20 = vmul.f32 %v1816_v51, %v1802_v4 }
 0x24f   :  { %v1840_v56 = vmul.f32 %v2017_v21, %v1820_v34  ;;  %v1847_v19 = vmul.f32 %v2017_v21, %v1827_v62  ;;  %v1857_v41 = vadd.f32 %v3821_v29, %v1837_v52  ;;  %v1858_v7 = vadd.f32 %v3821_v29, %v1838_v32 }
 0x250   :  { %v1823_v0 = vmul.f32 %v1816_v51, %v1796_v9  ;;  %v1824_v33 = vmul.f32 %v1816_v51, %v1797_v30  ;;  %v1830_v16 = vmul.f32 %v1816_v51, %v1803_v10  ;;  %v1841_v45 = vmul.f32 %v2017_v21, %v1821_v38 }
 0x251   :  { %v1848_v11 = vmul.f32 %v2017_v21, %v1828_v44  ;;  %v1859_v59 = vadd.f32 %v3821_v29, %v1839_v2  ;;  %v1865_v25 = vadd.f32 %v3821_v29, %v1845_v55  ;;  %v1866_v36 = vadd.f32 %v3821_v29, %v1846_v63 }
 0x252   :  { %v1831_v49 = vmul.f32 %v1816_v51, %v1804_v28  ;;  %v1832_v42 = vmul.f32 %v1816_v51, %v1805_v12  ;;  %v1842_v1 = vmul.f32 %v2017_v21, %v1822_v17  ;;  %v1849_v3 = vmul.f32 %v2017_v21, %v1829_v20 }
 0x253   :  { %v1860_v35 = vadd.f32 %v3821_v29, %v1840_v56  ;;  %v1867_v18 = vadd.f32 %v3821_v29, %v1847_v19  ;;  %v1873_v40 = vmax.f32 %v1857_v41, 0.0  ;;  %v1874_v5 = vmax.f32 %v1858_v7, 0.0 }
 0x254   :  { %v1843_v27 = vmul.f32 %v2017_v21, %v1823_v0  ;;  %v1844_v31 = vmul.f32 %v2017_v21, %v1824_v33  ;;  %v1850_v39 = vmul.f32 %v2017_v21, %v1830_v16  ;;  %v1861_v61 = vadd.f32 %v3821_v29, %v1841_v45 }
 0x255   :  { %v1868_v47 = vadd.f32 %v3821_v29, %v1848_v11  ;;  %v1875_v8 = vmax.f32 %v1859_v59, 0.0  ;;  %v1881_v26 = vmax.f32 %v1865_v25, 0.0  ;;  %v1882_v13 = vmax.f32 %v1866_v36, 0.0 }
 0x256   :  { %v1851_v53 = vmul.f32 %v2017_v21, %v1831_v49  ;;  %v1852_v15 = vmul.f32 %v2017_v21, %v1832_v42  ;;  %v1862_v51 = vadd.f32 %v3821_v29, %v1842_v1  ;;  %v1869_v24 = vadd.f32 %v3821_v29, %v1849_v3 }
 0x257   :  { %v1876_v43 = vmax.f32 %v1860_v35, 0.0  ;;  %v1883_v48 = vmax.f32 %v1867_v18, 0.0  ;;  %v1889_v50 = vsel %vm53_vm1, %v1873_v40, 0.0  ;;  %v1890_v14 = vsel %vm53_vm1, %v1874_v5, 0.0 }
 0x258   :  { %v1863_v58 = vadd.f32 %v3821_v29, %v1843_v27  ;;  %v1870_v23 = vadd.f32 %v3821_v29, %v1850_v39  ;;  %v1877_v22 = vmax.f32 %v1861_v61, 0.0  ;;  %v1891_v54 = vadd.f32 %v1890_v14, %v1889_v50 }
 0x259   :  { %v1884_v6 = vmax.f32 %v1868_v47, 0.0  ;;  %v1892_v46 = vsel %vm53_vm1, %v1875_v8, 0.0  ;;  %v1910_v21 = vsel %vm53_vm1, %v1881_v26, 0.0  ;;  %v1911_v9 = vsel %vm53_vm1, %v1882_v13, 0.0 }
 0x25a   :  { %v1864_v30 = vadd.f32 %v3821_v29, %v1844_v31  ;;  %v1871_v37 = vadd.f32 %v3821_v29, %v1851_v53  ;;  %v1893_v34 = vadd.f32 %v1892_v46, %v1891_v54  ;;  %v1912_v62 = vadd.f32 %v1911_v9, %v1910_v21 }
 0x25b   :  { %v1878_v52 = vmax.f32 %v1862_v51, 0.0  ;;  %v1885_v32 = vmax.f32 %v1869_v24, 0.0  ;;  %v1894_v4 = vsel %vm53_vm1, %v1876_v43, 0.0  ;;  %v1913_v10 = vsel %vm53_vm1, %v1883_v48, 0.0 }
 0x25c   :  { %v1872_v28 = vadd.f32 %v3821_v29, %v1852_v15  ;;  %v1895_v38 = vadd.f32 %v1894_v4, %v1893_v34  ;;  %v1914_v44 = vadd.f32 %v1913_v10, %v1912_v62  ;;  %v1879_v2 = vmax.f32 %v1863_v58, 0.0 }
 0x25d   :  { %v1886_v55 = vmax.f32 %v1870_v23, 0.0  ;;  %v1896_v63 = vsel %vm53_vm1, %v1877_v22, 0.0  ;;  %v1915_v12 = vsel %vm53_vm1, %v1884_v6, 0.0  ;;  %v1880_v17 = vmax.f32 %v1864_v30, 0.0  ;;  %v2019_v6 = vld [vmem:[%s3890_s13] ss:$0 sm:$0xff] }
 0x25e   :  { %v1897_v20 = vadd.f32 %v1896_v63, %v1895_v38  ;;  %v1916_v60 = vadd.f32 %v1915_v12, %v1914_v44  ;;  %v1887_v56 = vmax.f32 %v1871_v37, 0.0  ;;  %v1898_v19 = vsel %vm53_vm1, %v1878_v52, 0.0 }
 0x25f   :  { %v1917_v41 = vsel %vm53_vm1, %v1885_v32, 0.0  ;;  %v1932_v7 = vmul.f32 64.0, %v3838_v57  ;;  %v1888_v33 = vmax.f32 %v1872_v28, 0.0  ;;  %v1900_v16 = vsel %vm53_vm1, %v1879_v2, 0.0 }
 0x260   :  { %v1899_v0 = vadd.f32 %v1898_v19, %v1897_v20  ;;  %v1918_v29 = vadd.f32 %v1917_v41, %v1916_v60  ;;  %v1919_v45 = vsel %vm53_vm1, %v1886_v55, 0.0  ;;  %v1902_v25 = vsel %vm53_vm1, %v1880_v17, 0.0 }
 0x261   :  { %v1921_v36 = vsel %vm53_vm1, %v1887_v56, 0.0  ;;  %v1933_v49 = vsub.f32 1.0, %v1932_v7  ;;  %v1923_v3 = vsel %vm53_vm1, %v1888_v33, 0.0 }
 0x262   :  { %v1901_v11 = vadd.f32 %v1900_v16, %v1899_v0  ;;  %v1920_v59 = vadd.f32 %v1919_v45, %v1918_v29 }
 0x263   :  { %v1934_v40 = vmul.f32 %v3838_v57, %v1933_v49 }
 0x264   :  { %v1903_v42 = vadd.f32 %v1902_v25, %v1901_v11  ;;  %v1922_v1 = vadd.f32 %v1921_v36, %v1920_v59 }
 0x265   :  { %v1935_v61 = vadd.f32 %v3838_v57, %v1934_v40 }
 0x266   :  { %v1904_v35 = vrot.slane %v1903_v42, 4  ;;  %v1924_v18 = vadd.f32 %v1923_v3, %v1922_v1 }
 0x267   :  { %v1937_v53 = vsel %vm1936_vm13, %v3838_v57, %v1935_v61 }
 0x268   :  { %v1905_v5 = vadd.f32 %v1904_v35, %v1903_v42  ;;  %v1925_v27 = vrot.slane %v1924_v18, 4 }
 0x26a   :  { %v1906_v31 = vrot.slane %v1905_v5, 2  ;;  %v1926_v39 = vadd.f32 %v1925_v27, %v1924_v18 }
 0x26c   :  { %v1907_v47 = vadd.f32 %v1906_v31, %v1905_v5  ;;  %v1927_v8 = vrot.slane %v1926_v39, 2 }
 0x26e   :  { %v1908_v26 = vrot.slane %v1907_v47, 1  ;;  %v1928_v13 = vadd.f32 %v1927_v8, %v1926_v39 }
 0x270   :  { %v1909_v15 = vadd.f32 %v1908_v26, %v1907_v47  ;;  %v1929_v51 = vrot.slane %v1928_v13, 1 }
 0x272   :  { %v1930_v24 = vadd.f32 %v1929_v51, %v1928_v13  ;;  %v1938_v43 = vmul.f32 %v1937_v53, %v1909_v15 }
 0x274   :  { %v1939_v48 = vmul.f32 %v1937_v53, %v1930_v24  ;;  %v1940_v50 = vpack.c.bf16 %v1938_v43, %v1938_v43 }
 0x276   :  { %v1941_v14 = vpack.c.bf16 %v1939_v48, %v1939_v48  ;;  %v1949_v58 = vunpack.c.l.b16 %v1940_v50 }
 0x278   :  { %v1950_v23 = vunpack.c.l.b16 %v1941_v14 }
 0x27a   :  { %v1952_v22 = vsel %vm1951_vm14, %v1950_v23, %v1949_v58 }
 0x27b   :  { %v1953_v54 = vpack.c.b16 %v1952_v22, %v1952_v22 }
 0x27d   :  { %2007 = vmatmul.msk.bf16.vlgmr.msrb.gmra.mxu2 %vm53_vm1, %v1953_v54 }
 0x300   :  { %v1969_v57 = vpop.f32.mrf.mxu2 }
 0x301   :  { %v1970_v46 = vadd.f32 %v2019_v6, %v1969_v57 }
 0x303   :  { %1974 = vst.msk [vmem:[#allocation4] sm:$0x3] %vm1973_vm15, %v1970_v46 }
 0x304   :  { %1985 = dma.vmem_to_hbm [thread:$0]  %s1981_s26, 32, %s1983_s29, [#allocation5]  }
 0x308   :  { %v1971_v21 = vpop.f32.mrf.mxu2 }
 0x309   :  { %2052 = dma.done.wait [#allocation5], 32  }
 0x30a   :  { %2053 = vsyncadd [#allocation5], 4294967264 }
 0x30b   :  { %1990 = vsyncpa [#allocation5], 1 }

</bundles_post_ra>
